<compile_context>
chip_gen: v7x
topology: tpu7x:2x2x1
jax: 0.10.0
libtpu: 0.0.40
codegen_flags: <defaults>
</compile_context>

<pallas_src>
import functools

import jax
import jax.numpy as jnp
from jax import lax
from jax.experimental import pallas as pl
from jax.experimental.pallas import tpu as pltpu


_VMEM = pl.BlockSpec(memory_space=pltpu.MemorySpace.VMEM)


def _round_up(n, m):
    return (n + m - 1) // m * m


# --------------------------------- Kernel ------------------------------------


def _stacked_birnn_kernel(ids_ref, emb_ref, *refs, hidden, seq_len, batch,
                          num_layers, vocab_pad):
    """Fused embedding + stacked BiLSTM + max-pool + Linear.

    ids_ref : (S*B, 1) int32, time-major flattened token ids (row = t*B + b)
    emb_ref : (Vp, Dp) f32 embedding table (vocab- and feature-padded with zeros)
    refs    : for each layer l: wih_l (Din, 8H) bf16, whh_l (2H, 8H) bf16 block-diag,
              b_l (1, 8H) f32; then fc_w (1, 2H) f32, fc_b (1, 1) f32;
              then out_ref (B, 1) f32; then scratch x_scr (S*B, Dp) f32,
              gx_scr (S*B, 8H) f32, h_scr (S*B, 2H) f32.
    """
    H = hidden
    HH = 2 * H
    G = 4 * HH
    S = seq_len
    B = batch          # padded batch; wrapper asserts B % 8 == 0 (pl.multiple_of hints)
    L = num_layers
    SB = S * B

    w_refs = refs[:3 * L]
    fcw_ref = refs[3 * L]
    fcb_ref = refs[3 * L + 1]
    out_ref = refs[3 * L + 2]
    x_scr = refs[3 * L + 3]
    gx_scr = refs[3 * L + 4]
    h_scr = refs[3 * L + 5]

    # Direction masks, built once at full (B, .) width and reused by every layer
    # (no per-iteration broadcast inside any loop).
    mask_g = (lax.broadcasted_iota(jnp.int32, (B, G), 1) % HH) < H    # fwd gate cols
    mask_h = lax.broadcasted_iota(jnp.int32, (B, HH), 1) < H          # fwd hidden cols

    # ---- fused embedding lookup: one-hot (SB, Vp) @ table (Vp, Dp) on the MXU ----
    eq = ids_ref[...] == lax.broadcasted_iota(jnp.int32, (SB, vocab_pad), 1)
    onehot = jnp.where(eq, 1.0, 0.0).astype(jnp.bfloat16)
    x_scr[...] = jnp.dot(onehot, emb_ref[...].astype(jnp.bfloat16),
                         preferred_element_type=jnp.float32)

    blend_unroll = min(max(S // 2, 1), 8)
    step_unroll = min(S, 8)

    for l in range(L):
        wih_ref, whh_ref, b_ref = w_refs[3 * l:3 * l + 3]
        in_ref = x_scr if l == 0 else h_scr
        last = (l == L - 1)

        # (a) Hoisted input projection: one big MXU matmul for all timesteps and both
        #     directions, completely off the serial critical path.
        gx_scr[...] = jnp.dot(in_ref[...].astype(jnp.bfloat16), wih_ref[...],
                              preferred_element_type=jnp.float32) + b_ref[...]

        # (b) Prologue blend (vectorized, off critical path): the bwd gate columns of
        #     row-block t must hold the projection of input time S-1-t. In-place
        #     pairwise swap of bwd halves -> per-step the loop reads ONE dense row.
        def gx_blend(t, carry):
            r_a = pl.multiple_of(t * B, 8)
            r_b = pl.multiple_of((S - 1 - t) * B, 8)
            ga = gx_scr[pl.ds(r_a, B), :]
            gb = gx_scr[pl.ds(r_b, B), :]
            gx_scr[pl.ds(r_a, B), :] = jnp.where(mask_g, ga, gb)
            gx_scr[pl.ds(r_b, B), :] = jnp.where(mask_g, gb, ga)
            return carry

        lax.fori_loop(0, S // 2, gx_blend, 0, unroll=blend_unroll)

        # Loop-invariant recurrent weights: load once, keep across the time loop.
        whh = whh_ref[...]                                           # (2H, 8H) bf16

        # (c) Serial recurrence: only the small (B,2H)x(2H,8H) matmul + gate math stay
        #     on the critical path; state h/c (and the pooled max) are vreg carries.
        def step(t, carry):
            h, c, m = carry
            row = pl.multiple_of(t * B, 8)
            gates = gx_scr[pl.ds(row, B), :] + jnp.dot(
                h.astype(jnp.bfloat16), whh, preferred_element_type=jnp.float32)
            sig = jax.nn.sigmoid(gates[:, :3 * HH])      # i, f, o  (lane-aligned slab)
            g_gate = jnp.tanh(gates[:, 3 * HH:])         # g        (lane-aligned slab)
            i_gate = sig[:, :HH]
            f_gate = sig[:, HH:2 * HH]
            o_gate = sig[:, 2 * HH:]
            c_new = f_gate * c + i_gate * g_gate
            h_new = o_gate * jnp.tanh(c_new)
            if last:
                m = jnp.maximum(m, h_new)                # max over time is order-free
            else:
                h_scr[pl.ds(row, B), :] = h_new          # ONE lane-dense (B,2H) store
            return h_new, c_new, m

        z = jnp.zeros((B, HH), jnp.float32)
        m0 = jnp.full((B, HH), -jnp.inf, jnp.float32)
        _, _, pooled = lax.fori_loop(0, S, step, (z, z, m0), unroll=step_unroll)

        if not last:
            # (d) Epilogue blend (vectorized): restore original time order of the bwd
            #     half so h_scr row t == [h_fwd(t) | h_bwd(t)] for the next layer.
            def h_blend(t, carry):
                r_a = pl.multiple_of(t * B, 8)
                r_b = pl.multiple_of((S - 1 - t) * B, 8)
                ha = h_scr[pl.ds(r_a, B), :]
                hb = h_scr[pl.ds(r_b, B), :]
                h_scr[pl.ds(r_a, B), :] = jnp.where(mask_h, ha, hb)
                h_scr[pl.ds(r_b, B), :] = jnp.where(mask_h, hb, ha)
                return carry

            lax.fori_loop(0, S // 2, h_blend, 0, unroll=blend_unroll)
        else:
            # Fused global max-pool + Linear(2H -> 1) head.
            out_ref[...] = (jnp.sum(pooled * fcw_ref[...], axis=1, keepdims=True)
                            + fcb_ref[...])


# ------------------------------ Pallas wrapper --------------------------------


def stacked_birnn_forward(tokens, params):
    # mirror `if x.dim() == 3 and x.shape[1] == 1: x = x.squeeze(1)`
    if tokens.ndim == 3 and tokens.shape[1] == 1:
        tokens = jnp.squeeze(tokens, axis=1)
    B, S = tokens.shape

    # pad batch to a sublane multiple (rows independent; padded junk sliced off)
    Bp = _round_up(B, 8)
    assert Bp % 8 == 0  # contract for the pl.multiple_of row hints inside the kernel
    if Bp != B:
        tokens = jnp.pad(tokens, ((0, Bp - B), (0, 0)))

    # time-major flattened ids (row = t*Bp + b) as a (S*Bp, 1) column for the kernel
    ids = jnp.transpose(tokens, (1, 0)).reshape(S * Bp, 1).astype(jnp.int32)

    emb = params["embedding"]                     # (Vp, Dp) f32, vocab/feature padded
    layers = params["layers"]
    L = len(layers)
    H = layers[0]["whh"].shape[0] // 2
    Vp, Dp = emb.shape
    out_dim = params["fc_w"].shape[0]
    assert out_dim == 1  # module has output_dim=1; general O needs a small matmul head

    args = [ids, emb]
    for lp in layers:
        args += [lp["wih"], lp["whh"], lp["b"]]
    args += [params["fc_w"], params["fc_b"]]

    scratch = [pltpu.VMEM((S * Bp, Dp), jnp.float32),       # embedded input
               pltpu.VMEM((S * Bp, 8 * H), jnp.float32),    # gate pre-activations
               pltpu.VMEM((S * Bp, 2 * H), jnp.float32)]    # layer-output staging

    # Explicit scoped-VMEM budget (defaults are 16/32 MiB): everything is VMEM-resident
    # at these shapes; larger shapes need the time/batch tiling noted in the header.
    vmem_bytes = sum(int(a.size) * a.dtype.itemsize for a in args)
    vmem_bytes += (S * Bp) * (Dp + 8 * H + 2 * H) * 4 + Bp * out_dim * 4
    vmem_limit = min(max(2 * vmem_bytes + (4 << 20), 16 << 20), 64 << 20)

    kernel = functools.partial(_stacked_birnn_kernel, hidden=H, seq_len=S,
                               batch=Bp, num_layers=L, vocab_pad=Vp)
    out = pl.pallas_call(
        kernel,
        out_shape=jax.ShapeDtypeStruct((Bp, out_dim), jnp.float32),
        in_specs=[_VMEM] * len(args),
        out_specs=_VMEM,
        scratch_shapes=scratch,
        compiler_params=pltpu.CompilerParams(vmem_limit_bytes=vmem_limit),
    )(*args)
    return out[:B]


# ------------------------------ Param packing ---------------------------------


def _pack_bidir_layer(fwd, bwd, hidden):
    """Pack per-direction PyTorch-layout LSTM params into the fused kernel layout.

    Input per direction: wih (D, 4H), whh (H, 4H), b (1, 4H) with PyTorch gate order
    (i, f, g, o). Output: wih (D, 8H) bf16, whh (2H, 8H) bf16 block-diagonal,
    b (1, 8H) f32, gate blocks ordered [i | f | o | g], each 2H = [fwd H | bwd H].
    """
    H = hidden

    def split_ifog(w):                       # PyTorch (i,f,g,o) -> (i,f,o,g)
        i, f, g, o = jnp.split(w, 4, axis=-1)
        return i, f, o, g

    def interleave(parts_f, parts_b):
        return jnp.concatenate(
            [jnp.concatenate([a, b], axis=-1)
             for a, b in zip(parts_f, parts_b)], axis=-1)

    wih = interleave(split_ifog(fwd["wih"]), split_ifog(bwd["wih"]))
    bias = interleave(split_ifog(fwd["b"]), split_ifog(bwd["b"]))

    def block_diag(a, b):                    # (H,H),(H,H) -> (2H,2H)
        z = jnp.zeros((H, H), a.dtype)
        return jnp.concatenate(
            [jnp.concatenate([a, z], axis=1),
             jnp.concatenate([z, b], axis=1)], axis=0)

    whh = jnp.concatenate(
        [block_diag(a, b) for a, b in zip(split_ifog(fwd["whh"]),
                                          split_ifog(bwd["whh"]))], axis=1)

    return {"wih": wih.astype(jnp.bfloat16),
            "whh": whh.astype(jnp.bfloat16),
            "b": bias.astype(jnp.float32)}


def init_params(key, vocab_size, embedding_dim, hidden_dim, num_layers, output_dim):
    d_pad = _round_up(embedding_dim, 128)    # lane-pad embedding features (zeros)
    v_pad = _round_up(vocab_size, 128)       # pad vocab for the in-kernel one-hot
    n_keys = 1 + num_layers * 2 * 4 + 2
    keys = jax.random.split(key, n_keys)
    kit = iter(range(n_keys))
    k = float(hidden_dim) ** -0.5

    emb = jax.random.normal(keys[next(kit)], (vocab_size, embedding_dim),
                            jnp.float32) * 0.1
    emb = jnp.pad(emb, ((0, v_pad - vocab_size), (0, d_pad - embedding_dim)))

    raw_lstm, packed = [], []
    for layer in range(num_layers):
        in_dim = d_pad if layer == 0 else 2 * hidden_dim
        dirs = []
        for _direction in range(2):
            wih = jax.random.uniform(keys[next(kit)], (in_dim, 4 * hidden_dim),
                                     jnp.float32, -k, k)
            if layer == 0 and d_pad != embedding_dim:
                # weights on zero-padded features stay zero -> exact 300-feature model
                wih = wih.at[embedding_dim:].set(0.0)
            whh = jax.random.uniform(keys[next(kit)], (hidden_dim, 4 * hidden_dim),
                                     jnp.float32, -k, k)
            b_ih = jax.random.uniform(keys[next(kit)], (1, 4 * hidden_dim),
                                      jnp.float32, -k, k)
            b_hh = jax.random.uniform(keys[next(kit)], (1, 4 * hidden_dim),
                                      jnp.float32, -k, k)
            dirs.append({"wih": wih, "whh": whh, "b": b_ih + b_hh})
        raw_lstm.append(dirs)
        packed.append(_pack_bidir_layer(dirs[0], dirs[1], hidden_dim))

    fc_w = jax.random.uniform(keys[next(kit)], (output_dim, 2 * hidden_dim),
                              jnp.float32, -k, k)
    fc_b = jax.random.uniform(keys[next(kit)], (1, output_dim), jnp.float32, -k, k)

    return {"embedding": emb, "layers": packed, "raw_lstm": raw_lstm,
            "fc_w": fc_w, "fc_b": fc_b}


# ---------------------------- Pure-JAX reference -------------------------------


def _lstm_dir_ref(x, wih, whh, b, mm_dtype):
    S, B, _ = x.shape
    H = whh.shape[0]
    wih_c = wih.astype(mm_dtype)
    whh_c = whh.astype(mm_dtype)

    def step(carry, x_t):
        h, c = carry
        gates = (jnp.dot(x_t.astype(mm_dtype), wih_c,
                         preferred_element_type=jnp.float32)
                 + jnp.dot(h.astype(mm_dtype), whh_c,
                           preferred_element_type=jnp.float32)
                 + b)
        i = jax.nn.sigmoid(gates[:, :H])
        f = jax.nn.sigmoid(gates[:, H:2 * H])
        g = jnp.tanh(gates[:, 2 * H:3 * H])
        o = jax.nn.sigmoid(gates[:, 3 * H:])
        c = f * c + i * g
        h = o * jnp.tanh(c)
        return (h, c), h

    init = (jnp.zeros((B, H), jnp.float32), jnp.zeros((B, H), jnp.float32))
    _, hs = lax.scan(step, init, x)
    return hs


def stacked_birnn_ref(tokens, params, matmul_dtype=jnp.float32):
    if tokens.ndim == 3 and tokens.shape[1] == 1:
        tokens = jnp.squeeze(tokens, axis=1)
    emb = params["embedding"][tokens].astype(jnp.float32)    # (B, S, Dp)
    x = jnp.transpose(emb, (1, 0, 2))                        # (S, B, Dp)
    for layer in params["raw_lstm"]:
        outs = []
        for direction, p in enumerate(layer):
            xin = x if direction == 0 else jnp.flip(x, axis=0)
            hs = _lstm_dir_ref(xin, p["wih"], p["whh"], p["b"], matmul_dtype)
            if direction == 1:
                hs = jnp.flip(hs, axis=0)
            outs.append(hs)
        x = jnp.concatenate(outs, axis=-1)                   # (S, B, 2H)
    pooled = jnp.max(x, axis=0)                              # (B, 2H)
    return pooled @ params["fc_w"].T + params["fc_b"]        # (B, 1)


# ----------------------------------- Main --------------------------------------

if __name__ == "__main__":
    VOCAB = 50
    EMBED_DIM = 300
    HIDDEN = 64
    NUM_LAYERS = 2
    OUTPUT_DIM = 1
    B, S = 2, 8

    key = jax.random.PRNGKey(0)
    k_params, k_tokens = jax.random.split(key)

    params = init_params(k_params, VOCAB, EMBED_DIM, HIDDEN, NUM_LAYERS, OUTPUT_DIM)
    tokens = jax.random.randint(k_tokens, (B, S), 0, VOCAB, dtype=jnp.int32)

    out = jax.block_until_ready(stacked_birnn_forward(tokens, params))
    assert out.shape == (B, OUTPUT_DIM), out.shape

    # Tight check vs a reference using the same bf16 MXU operand precision
    # (validates gate packing, block-diag Whh, fwd/bwd blend passes, pool+FC fusion).
    ref_bf16 = stacked_birnn_ref(tokens, params, matmul_dtype=jnp.bfloat16)
    assert jnp.allclose(out, ref_bf16, rtol=5e-3, atol=5e-3), (out, ref_bf16)

    # Module-semantics check vs the full-f32 reference; loose tolerance covers the
    # bf16 matmul-operand rounding used for MXU efficiency.
    ref_f32 = stacked_birnn_ref(tokens, params, matmul_dtype=jnp.float32)
    assert jnp.allclose(out, ref_f32, rtol=5e-2, atol=5e-2), (out, ref_f32)

    print("KERNEL_OK")
</pallas_src>

<mosaic_0001>
module attributes {stable_mosaic.version = 11 : i64} {
  func.func @_stacked_birnn_kernel(%arg0: memref<64x1xi32, #tpu.memory_space<vmem>>, %arg1: memref<128x384xf32, #tpu.memory_space<vmem>>, %arg2: memref<384x512xbf16, #tpu.memory_space<vmem>>, %arg3: memref<128x512xbf16, #tpu.memory_space<vmem>>, %arg4: memref<1x512xf32, #tpu.memory_space<vmem>>, %arg5: memref<128x512xbf16, #tpu.memory_space<vmem>>, %arg6: memref<128x512xbf16, #tpu.memory_space<vmem>>, %arg7: memref<1x512xf32, #tpu.memory_space<vmem>>, %arg8: memref<1x128xf32, #tpu.memory_space<vmem>>, %arg9: memref<1x1xf32, #tpu.memory_space<vmem>>, %arg10: memref<8x1xf32, #tpu.memory_space<vmem>>, %arg11: memref<64x384xf32, #tpu.memory_space<vmem>>, %arg12: memref<64x512xf32, #tpu.memory_space<vmem>>, %arg13: memref<64x128xf32, #tpu.memory_space<vmem>>) attributes {dimension_semantics = [], scalar_prefetch = 0 : i64, scratch_operands = 3 : i64, tpu.core_type = #tpu.core_type<tc>} {
    %0 = tpu.iota {dimensions = array<i32: 1>} : vector<8x512xi32>
    %c128_i32 = arith.constant 128 : i32
    %c0_i32 = arith.constant 0 : i32
    %1 = arith.cmpi eq, %c128_i32, %c0_i32 : i32
    %c1_i32 = arith.constant 1 : i32
    %2 = arith.select %1, %c1_i32, %c128_i32 : i32
    %3 = vector.broadcast %2 : i32 to vector<8x512xi32>
    %4 = arith.remsi %0, %3 : vector<8x512xi32>
    %c0_i32_0 = arith.constant 0 : i32
    %5 = vector.broadcast %c0_i32_0 : i32 to vector<8x512xi32>
    %6 = arith.cmpi ne, %4, %5 : vector<8x512xi32>
    %c0_i32_1 = arith.constant 0 : i32
    %7 = vector.broadcast %c0_i32_1 : i32 to vector<8x512xi32>
    %8 = arith.cmpi slt, %4, %7 : vector<8x512xi32>
    %c0_i32_2 = arith.constant 0 : i32
    %9 = arith.cmpi slt, %2, %c0_i32_2 : i32
    %10 = vector.broadcast %9 : i1 to vector<8x512xi1>
    %11 = vector.broadcast %10 : vector<8x512xi1> to vector<8x512xi1>
    %12 = arith.xori %8, %11 : vector<8x512xi1>
    %13 = arith.andi %12, %6 : vector<8x512xi1>
    %14 = vector.broadcast %2 : i32 to vector<8x512xi32>
    %15 = arith.addi %4, %14 : vector<8x512xi32>
    %16 = arith.select %13, %15, %4 : vector<8x512xi1>, vector<8x512xi32>
    %c64_i32 = arith.constant 64 : i32
    %17 = vector.broadcast %c64_i32 : i32 to vector<8x512xi32>
    %18 = arith.cmpi slt, %16, %17 : vector<8x512xi32>
    %19 = tpu.iota {dimensions = array<i32: 1>} : vector<8x128xi32>
    %c64_i32_3 = arith.constant 64 : i32
    %20 = vector.broadcast %c64_i32_3 : i32 to vector<8x128xi32>
    %21 = arith.cmpi slt, %19, %20 : vector<8x128xi32>
    %c0 = arith.constant 0 : index
    %c0_4 = arith.constant 0 : index
    %22 = vector.load %arg0[%c0, %c0_4] : memref<64x1xi32, #tpu.memory_space<vmem>>, vector<64x1xi32>
    %23 = tpu.iota {dimensions = array<i32: 1>} : vector<64x128xi32>
    %24 = vector.broadcast %22 : vector<64x1xi32> to vector<64x128xi32>
    %25 = arith.cmpi eq, %24, %23 : vector<64x128xi32>
    %cst = arith.constant 1.000000e+00 : f32
    %cst_5 = arith.constant 0.000000e+00 : f32
    %26 = vector.broadcast %cst : f32 to vector<64x128xf32>
    %27 = vector.broadcast %cst_5 : f32 to vector<64x128xf32>
    %28 = arith.select %25, %26, %27 : vector<64x128xi1>, vector<64x128xf32>
    %29 = arith.truncf %28 : vector<64x128xf32> to vector<64x128xbf16>
    %c0_6 = arith.constant 0 : index
    %c0_7 = arith.constant 0 : index
    %30 = vector.load %arg1[%c0_6, %c0_7] : memref<128x384xf32, #tpu.memory_space<vmem>>, vector<128x384xf32>
    %31 = arith.truncf %30 : vector<128x384xf32> to vector<128x384xbf16>
    %cst_8 = arith.constant dense<0.000000e+00> : vector<64x384xf32>
    %32 = tpu.matmul %29, %31, %cst_8 {dimension_numbers = #tpu.dot_dimension_numbers<[1], [0], [0], [1], [0, 0, 1, 1], [], []>} : vector<64x128xbf16>, vector<128x384xbf16>, vector<64x384xf32> -> vector<64x384xf32>
    %c0_9 = arith.constant 0 : index
    %c0_10 = arith.constant 0 : index
    %33 = vector.load %arg11[%c0_9, %c0_10] : memref<64x384xf32, #tpu.memory_space<vmem>>, vector<64x384xf32>
    tpu.vector_store %arg11[%c0_9, %c0_10], %32 {strides = array<i32>} : memref<64x384xf32, #tpu.memory_space<vmem>>, vector<64x384xf32>,
    %c0_11 = arith.constant 0 : index
    %c0_12 = arith.constant 0 : index
    %34 = vector.load %arg11[%c0_11, %c0_12] : memref<64x384xf32, #tpu.memory_space<vmem>>, vector<64x384xf32>
    %35 = arith.truncf %34 : vector<64x384xf32> to vector<64x384xbf16>
    %c0_13 = arith.constant 0 : index
    %c0_14 = arith.constant 0 : index
    %36 = vector.load %arg2[%c0_13, %c0_14] : memref<384x512xbf16, #tpu.memory_space<vmem>>, vector<384x512xbf16>
    %cst_15 = arith.constant dense<0.000000e+00> : vector<64x512xf32>
    %37 = tpu.matmul %35, %36, %cst_15 {dimension_numbers = #tpu.dot_dimension_numbers<[1], [0], [0], [1], [0, 0, 1, 1], [], []>} : vector<64x384xbf16>, vector<384x512xbf16>, vector<64x512xf32> -> vector<64x512xf32>
    %c0_16 = arith.constant 0 : index
    %c0_17 = arith.constant 0 : index
    %38 = vector.load %arg4[%c0_16, %c0_17] : memref<1x512xf32, #tpu.memory_space<vmem>>, vector<1x512xf32>
    %39 = vector.broadcast %38 : vector<1x512xf32> to vector<64x512xf32>
    %40 = arith.addf %37, %39 : vector<64x512xf32>
    %c0_18 = arith.constant 0 : index
    %c0_19 = arith.constant 0 : index
    %41 = vector.load %arg12[%c0_18, %c0_19] : memref<64x512xf32, #tpu.memory_space<vmem>>, vector<64x512xf32>
    tpu.vector_store %arg12[%c0_18, %c0_19], %40 {strides = array<i32>} : memref<64x512xf32, #tpu.memory_space<vmem>>, vector<64x512xf32>,
    %c0_i32_20 = arith.constant 0 : i32
    %c8_i32 = arith.constant 8 : i32
    %42 = arith.muli %c0_i32_20, %c8_i32 : i32
    %43 = tpu.assume_multiple %42, 8 : i32
    %c7_i32 = arith.constant 7 : i32
    %44 = arith.subi %c7_i32, %c0_i32_20 : i32
    %c8_i32_21 = arith.constant 8 : i32
    %45 = arith.muli %44, %c8_i32_21 : i32
    %46 = tpu.assume_multiple %45, 8 : i32
    %47 = arith.index_cast %43 : i32 to index
    %c0_22 = arith.constant 0 : index
    %48 = vector.load %arg12[%47, %c0_22] : memref<64x512xf32, #tpu.memory_space<vmem>>, vector<8x512xf32>
    %49 = arith.index_cast %46 : i32 to index
    %c0_23 = arith.constant 0 : index
    %50 = vector.load %arg12[%49, %c0_23] : memref<64x512xf32, #tpu.memory_space<vmem>>, vector<8x512xf32>
    %51 = arith.select %18, %48, %50 : vector<8x512xi1>, vector<8x512xf32>
    %52 = arith.index_cast %43 : i32 to index
    %c0_24 = arith.constant 0 : index
    %53 = vector.load %arg12[%52, %c0_24] : memref<64x512xf32, #tpu.memory_space<vmem>>, vector<8x512xf32>
    tpu.vector_store %arg12[%52, %c0_24], %51 {strides = array<i32>} : memref<64x512xf32, #tpu.memory_space<vmem>>, vector<8x512xf32>,
    %54 = arith.select %18, %50, %48 : vector<8x512xi1>, vector<8x512xf32>
    %55 = arith.index_cast %46 : i32 to index
    %c0_25 = arith.constant 0 : index
    %56 = vector.load %arg12[%55, %c0_25] : memref<64x512xf32, #tpu.memory_space<vmem>>, vector<8x512xf32>
    tpu.vector_store %arg12[%55, %c0_25], %54 {strides = array<i32>} : memref<64x512xf32, #tpu.memory_space<vmem>>, vector<8x512xf32>,
    %c1_i32_26 = arith.constant 1 : i32
    %c8_i32_27 = arith.constant 8 : i32
    %57 = arith.muli %c1_i32_26, %c8_i32_27 : i32
    %58 = tpu.assume_multiple %57, 8 : i32
    %c7_i32_28 = arith.constant 7 : i32
    %59 = arith.subi %c7_i32_28, %c1_i32_26 : i32
    %c8_i32_29 = arith.constant 8 : i32
    %60 = arith.muli %59, %c8_i32_29 : i32
    %61 = tpu.assume_multiple %60, 8 : i32
    %62 = arith.index_cast %58 : i32 to index
    %c0_30 = arith.constant 0 : index
    %63 = vector.load %arg12[%62, %c0_30] : memref<64x512xf32, #tpu.memory_space<vmem>>, vector<8x512xf32>
    %64 = arith.index_cast %61 : i32 to index
    %c0_31 = arith.constant 0 : index
    %65 = vector.load %arg12[%64, %c0_31] : memref<64x512xf32, #tpu.memory_space<vmem>>, vector<8x512xf32>
    %66 = arith.select %18, %63, %65 : vector<8x512xi1>, vector<8x512xf32>
    %67 = arith.index_cast %58 : i32 to index
    %c0_32 = arith.constant 0 : index
    %68 = vector.load %arg12[%67, %c0_32] : memref<64x512xf32, #tpu.memory_space<vmem>>, vector<8x512xf32>
    tpu.vector_store %arg12[%67, %c0_32], %66 {strides = array<i32>} : memref<64x512xf32, #tpu.memory_space<vmem>>, vector<8x512xf32>,
    %69 = arith.select %18, %65, %63 : vector<8x512xi1>, vector<8x512xf32>
    %70 = arith.index_cast %61 : i32 to index
    %c0_33 = arith.constant 0 : index
    %71 = vector.load %arg12[%70, %c0_33] : memref<64x512xf32, #tpu.memory_space<vmem>>, vector<8x512xf32>
    tpu.vector_store %arg12[%70, %c0_33], %69 {strides = array<i32>} : memref<64x512xf32, #tpu.memory_space<vmem>>, vector<8x512xf32>,
    %c2_i32 = arith.constant 2 : i32
    %c8_i32_34 = arith.constant 8 : i32
    %72 = arith.muli %c2_i32, %c8_i32_34 : i32
    %73 = tpu.assume_multiple %72, 8 : i32
    %c7_i32_35 = arith.constant 7 : i32
    %74 = arith.subi %c7_i32_35, %c2_i32 : i32
    %c8_i32_36 = arith.constant 8 : i32
    %75 = arith.muli %74, %c8_i32_36 : i32
    %76 = tpu.assume_multiple %75, 8 : i32
    %77 = arith.index_cast %73 : i32 to index
    %c0_37 = arith.constant 0 : index
    %78 = vector.load %arg12[%77, %c0_37] : memref<64x512xf32, #tpu.memory_space<vmem>>, vector<8x512xf32>
    %79 = arith.index_cast %76 : i32 to index
    %c0_38 = arith.constant 0 : index
    %80 = vector.load %arg12[%79, %c0_38] : memref<64x512xf32, #tpu.memory_space<vmem>>, vector<8x512xf32>
    %81 = arith.select %18, %78, %80 : vector<8x512xi1>, vector<8x512xf32>
    %82 = arith.index_cast %73 : i32 to index
    %c0_39 = arith.constant 0 : index
    %83 = vector.load %arg12[%82, %c0_39] : memref<64x512xf32, #tpu.memory_space<vmem>>, vector<8x512xf32>
    tpu.vector_store %arg12[%82, %c0_39], %81 {strides = array<i32>} : memref<64x512xf32, #tpu.memory_space<vmem>>, vector<8x512xf32>,
    %84 = arith.select %18, %80, %78 : vector<8x512xi1>, vector<8x512xf32>
    %85 = arith.index_cast %76 : i32 to index
    %c0_40 = arith.constant 0 : index
    %86 = vector.load %arg12[%85, %c0_40] : memref<64x512xf32, #tpu.memory_space<vmem>>, vector<8x512xf32>
    tpu.vector_store %arg12[%85, %c0_40], %84 {strides = array<i32>} : memref<64x512xf32, #tpu.memory_space<vmem>>, vector<8x512xf32>,
    %c3_i32 = arith.constant 3 : i32
    %c8_i32_41 = arith.constant 8 : i32
    %87 = arith.muli %c3_i32, %c8_i32_41 : i32
    %88 = tpu.assume_multiple %87, 8 : i32
    %c7_i32_42 = arith.constant 7 : i32
    %89 = arith.subi %c7_i32_42, %c3_i32 : i32
    %c8_i32_43 = arith.constant 8 : i32
    %90 = arith.muli %89, %c8_i32_43 : i32
    %91 = tpu.assume_multiple %90, 8 : i32
    %92 = arith.index_cast %88 : i32 to index
    %c0_44 = arith.constant 0 : index
    %93 = vector.load %arg12[%92, %c0_44] : memref<64x512xf32, #tpu.memory_space<vmem>>, vector<8x512xf32>
    %94 = arith.index_cast %91 : i32 to index
    %c0_45 = arith.constant 0 : index
    %95 = vector.load %arg12[%94, %c0_45] : memref<64x512xf32, #tpu.memory_space<vmem>>, vector<8x512xf32>
    %96 = arith.select %18, %93, %95 : vector<8x512xi1>, vector<8x512xf32>
    %97 = arith.index_cast %88 : i32 to index
    %c0_46 = arith.constant 0 : index
    %98 = vector.load %arg12[%97, %c0_46] : memref<64x512xf32, #tpu.memory_space<vmem>>, vector<8x512xf32>
    tpu.vector_store %arg12[%97, %c0_46], %96 {strides = array<i32>} : memref<64x512xf32, #tpu.memory_space<vmem>>, vector<8x512xf32>,
    %99 = arith.select %18, %95, %93 : vector<8x512xi1>, vector<8x512xf32>
    %100 = arith.index_cast %91 : i32 to index
    %c0_47 = arith.constant 0 : index
    %101 = vector.load %arg12[%100, %c0_47] : memref<64x512xf32, #tpu.memory_space<vmem>>, vector<8x512xf32>
    tpu.vector_store %arg12[%100, %c0_47], %99 {strides = array<i32>} : memref<64x512xf32, #tpu.memory_space<vmem>>, vector<8x512xf32>,
    %c4_i32 = arith.constant 4 : i32
    %c0_48 = arith.constant 0 : index
    %c0_49 = arith.constant 0 : index
    %102 = vector.load %arg3[%c0_48, %c0_49] : memref<128x512xbf16, #tpu.memory_space<vmem>>, vector<128x512xbf16>
    %cst_50 = arith.constant 0.000000e+00 : f32
    %103 = vector.broadcast %cst_50 : f32 to vector<8x128xf32>
    %c0_i32_51 = arith.constant 0 : i32
    %c8_i32_52 = arith.constant 8 : i32
    %104 = arith.muli %c0_i32_51, %c8_i32_52 : i32
    %105 = tpu.assume_multiple %104, 8 : i32
    %106 = arith.index_cast %105 : i32 to index
    %c0_53 = arith.constant 0 : index
    %107 = vector.load %arg12[%106, %c0_53] : memref<64x512xf32, #tpu.memory_space<vmem>>, vector<8x512xf32>
    %108 = arith.truncf %103 : vector<8x128xf32> to vector<8x128xbf16>
    %cst_54 = arith.constant dense<0.000000e+00> : vector<8x512xf32>
    %109 = tpu.matmul %108, %102, %cst_54 {dimension_numbers = #tpu.dot_dimension_numbers<[1], [0], [0], [1], [0, 0, 1, 1], [], []>} : vector<8x128xbf16>, vector<128x512xbf16>, vector<8x512xf32> -> vector<8x512xf32>
    %110 = arith.addf %107, %109 : vector<8x512xf32>
    %111 = vector.extract_strided_slice %110 {offsets = [0, 0], sizes = [8, 384], strides = [1, 1]} : vector<8x512xf32> to vector<8x384xf32>
    %112 = arith.negf %111 : vector<8x384xf32>
    %113 = math.exp %112 : vector<8x384xf32>
    %cst_55 = arith.constant 1.000000e+00 : f32
    %114 = vector.broadcast %cst_55 : f32 to vector<8x384xf32>
    %115 = arith.addf %114, %113 : vector<8x384xf32>
    %116 = arith.divf %114, %115 : vector<8x384xf32>
    %117 = vector.extract_strided_slice %110 {offsets = [0, 384], sizes = [8, 128], strides = [1, 1]} : vector<8x512xf32> to vector<8x128xf32>
    %118 = math.tanh %117 : vector<8x128xf32>
    %119 = vector.extract_strided_slice %116 {offsets = [0, 0], sizes = [8, 128], strides = [1, 1]} : vector<8x384xf32> to vector<8x128xf32>
    %120 = vector.extract_strided_slice %116 {offsets = [0, 128], sizes = [8, 128], strides = [1, 1]} : vector<8x384xf32> to vector<8x128xf32>
    %121 = vector.extract_strided_slice %116 {offsets = [0, 256], sizes = [8, 128], strides = [1, 1]} : vector<8x384xf32> to vector<8x128xf32>
    %122 = arith.mulf %120, %103 : vector<8x128xf32>
    %123 = arith.mulf %119, %118 : vector<8x128xf32>
    %124 = arith.addf %122, %123 : vector<8x128xf32>
    %125 = math.tanh %124 : vector<8x128xf32>
    %126 = arith.mulf %121, %125 : vector<8x128xf32>
    %127 = arith.index_cast %105 : i32 to index
    %c0_56 = arith.constant 0 : index
    %128 = vector.load %arg13[%127, %c0_56] : memref<64x128xf32, #tpu.memory_space<vmem>>, vector<8x128xf32>
    tpu.vector_store %arg13[%127, %c0_56], %126 {strides = array<i32>} : memref<64x128xf32, #tpu.memory_space<vmem>>, vector<8x128xf32>,
    %c1_i32_57 = arith.constant 1 : i32
    %c8_i32_58 = arith.constant 8 : i32
    %129 = arith.muli %c1_i32_57, %c8_i32_58 : i32
    %130 = tpu.assume_multiple %129, 8 : i32
    %131 = arith.index_cast %130 : i32 to index
    %c0_59 = arith.constant 0 : index
    %132 = vector.load %arg12[%131, %c0_59] : memref<64x512xf32, #tpu.memory_space<vmem>>, vector<8x512xf32>
    %133 = arith.truncf %126 : vector<8x128xf32> to vector<8x128xbf16>
    %cst_60 = arith.constant dense<0.000000e+00> : vector<8x512xf32>
    %134 = tpu.matmul %133, %102, %cst_60 {dimension_numbers = #tpu.dot_dimension_numbers<[1], [0], [0], [1], [0, 0, 1, 1], [], []>} : vector<8x128xbf16>, vector<128x512xbf16>, vector<8x512xf32> -> vector<8x512xf32>
    %135 = arith.addf %132, %134 : vector<8x512xf32>
    %136 = vector.extract_strided_slice %135 {offsets = [0, 0], sizes = [8, 384], strides = [1, 1]} : vector<8x512xf32> to vector<8x384xf32>
    %137 = arith.negf %136 : vector<8x384xf32>
    %138 = math.exp %137 : vector<8x384xf32>
    %cst_61 = arith.constant 1.000000e+00 : f32
    %139 = vector.broadcast %cst_61 : f32 to vector<8x384xf32>
    %140 = arith.addf %139, %138 : vector<8x384xf32>
    %141 = arith.divf %139, %140 : vector<8x384xf32>
    %142 = vector.extract_strided_slice %135 {offsets = [0, 384], sizes = [8, 128], strides = [1, 1]} : vector<8x512xf32> to vector<8x128xf32>
    %143 = math.tanh %142 : vector<8x128xf32>
    %144 = vector.extract_strided_slice %141 {offsets = [0, 0], sizes = [8, 128], strides = [1, 1]} : vector<8x384xf32> to vector<8x128xf32>
    %145 = vector.extract_strided_slice %141 {offsets = [0, 128], sizes = [8, 128], strides = [1, 1]} : vector<8x384xf32> to vector<8x128xf32>
    %146 = vector.extract_strided_slice %141 {offsets = [0, 256], sizes = [8, 128], strides = [1, 1]} : vector<8x384xf32> to vector<8x128xf32>
    %147 = arith.mulf %145, %124 : vector<8x128xf32>
    %148 = arith.mulf %144, %143 : vector<8x128xf32>
    %149 = arith.addf %147, %148 : vector<8x128xf32>
    %150 = math.tanh %149 : vector<8x128xf32>
    %151 = arith.mulf %146, %150 : vector<8x128xf32>
    %152 = arith.index_cast %130 : i32 to index
    %c0_62 = arith.constant 0 : index
    %153 = vector.load %arg13[%152, %c0_62] : memref<64x128xf32, #tpu.memory_space<vmem>>, vector<8x128xf32>
    tpu.vector_store %arg13[%152, %c0_62], %151 {strides = array<i32>} : memref<64x128xf32, #tpu.memory_space<vmem>>, vector<8x128xf32>,
    %c2_i32_63 = arith.constant 2 : i32
    %c8_i32_64 = arith.constant 8 : i32
    %154 = arith.muli %c2_i32_63, %c8_i32_64 : i32
    %155 = tpu.assume_multiple %154, 8 : i32
    %156 = arith.index_cast %155 : i32 to index
    %c0_65 = arith.constant 0 : index
    %157 = vector.load %arg12[%156, %c0_65] : memref<64x512xf32, #tpu.memory_space<vmem>>, vector<8x512xf32>
    %158 = arith.truncf %151 : vector<8x128xf32> to vector<8x128xbf16>
    %cst_66 = arith.constant dense<0.000000e+00> : vector<8x512xf32>
    %159 = tpu.matmul %158, %102, %cst_66 {dimension_numbers = #tpu.dot_dimension_numbers<[1], [0], [0], [1], [0, 0, 1, 1], [], []>} : vector<8x128xbf16>, vector<128x512xbf16>, vector<8x512xf32> -> vector<8x512xf32>
    %160 = arith.addf %157, %159 : vector<8x512xf32>
    %161 = vector.extract_strided_slice %160 {offsets = [0, 0], sizes = [8, 384], strides = [1, 1]} : vector<8x512xf32> to vector<8x384xf32>
    %162 = arith.negf %161 : vector<8x384xf32>
    %163 = math.exp %162 : vector<8x384xf32>
    %cst_67 = arith.constant 1.000000e+00 : f32
    %164 = vector.broadcast %cst_67 : f32 to vector<8x384xf32>
    %165 = arith.addf %164, %163 : vector<8x384xf32>
    %166 = arith.divf %164, %165 : vector<8x384xf32>
    %167 = vector.extract_strided_slice %160 {offsets = [0, 384], sizes = [8, 128], strides = [1, 1]} : vector<8x512xf32> to vector<8x128xf32>
    %168 = math.tanh %167 : vector<8x128xf32>
    %169 = vector.extract_strided_slice %166 {offsets = [0, 0], sizes = [8, 128], strides = [1, 1]} : vector<8x384xf32> to vector<8x128xf32>
    %170 = vector.extract_strided_slice %166 {offsets = [0, 128], sizes = [8, 128], strides = [1, 1]} : vector<8x384xf32> to vector<8x128xf32>
    %171 = vector.extract_strided_slice %166 {offsets = [0, 256], sizes = [8, 128], strides = [1, 1]} : vector<8x384xf32> to vector<8x128xf32>
    %172 = arith.mulf %170, %149 : vector<8x128xf32>
    %173 = arith.mulf %169, %168 : vector<8x128xf32>
    %174 = arith.addf %172, %173 : vector<8x128xf32>
    %175 = math.tanh %174 : vector<8x128xf32>
    %176 = arith.mulf %171, %175 : vector<8x128xf32>
    %177 = arith.index_cast %155 : i32 to index
    %c0_68 = arith.constant 0 : index
    %178 = vector.load %arg13[%177, %c0_68] : memref<64x128xf32, #tpu.memory_space<vmem>>, vector<8x128xf32>
    tpu.vector_store %arg13[%177, %c0_68], %176 {strides = array<i32>} : memref<64x128xf32, #tpu.memory_space<vmem>>, vector<8x128xf32>,
    %c3_i32_69 = arith.constant 3 : i32
    %c8_i32_70 = arith.constant 8 : i32
    %179 = arith.muli %c3_i32_69, %c8_i32_70 : i32
    %180 = tpu.assume_multiple %179, 8 : i32
    %181 = arith.index_cast %180 : i32 to index
    %c0_71 = arith.constant 0 : index
    %182 = vector.load %arg12[%181, %c0_71] : memref<64x512xf32, #tpu.memory_space<vmem>>, vector<8x512xf32>
    %183 = arith.truncf %176 : vector<8x128xf32> to vector<8x128xbf16>
    %cst_72 = arith.constant dense<0.000000e+00> : vector<8x512xf32>
    %184 = tpu.matmul %183, %102, %cst_72 {dimension_numbers = #tpu.dot_dimension_numbers<[1], [0], [0], [1], [0, 0, 1, 1], [], []>} : vector<8x128xbf16>, vector<128x512xbf16>, vector<8x512xf32> -> vector<8x512xf32>
    %185 = arith.addf %182, %184 : vector<8x512xf32>
    %186 = vector.extract_strided_slice %185 {offsets = [0, 0], sizes = [8, 384], strides = [1, 1]} : vector<8x512xf32> to vector<8x384xf32>
    %187 = arith.negf %186 : vector<8x384xf32>
    %188 = math.exp %187 : vector<8x384xf32>
    %cst_73 = arith.constant 1.000000e+00 : f32
    %189 = vector.broadcast %cst_73 : f32 to vector<8x384xf32>
    %190 = arith.addf %189, %188 : vector<8x384xf32>
    %191 = arith.divf %189, %190 : vector<8x384xf32>
    %192 = vector.extract_strided_slice %185 {offsets = [0, 384], sizes = [8, 128], strides = [1, 1]} : vector<8x512xf32> to vector<8x128xf32>
    %193 = math.tanh %192 : vector<8x128xf32>
    %194 = vector.extract_strided_slice %191 {offsets = [0, 0], sizes = [8, 128], strides = [1, 1]} : vector<8x384xf32> to vector<8x128xf32>
    %195 = vector.extract_strided_slice %191 {offsets = [0, 128], sizes = [8, 128], strides = [1, 1]} : vector<8x384xf32> to vector<8x128xf32>
    %196 = vector.extract_strided_slice %191 {offsets = [0, 256], sizes = [8, 128], strides = [1, 1]} : vector<8x384xf32> to vector<8x128xf32>
    %197 = arith.mulf %195, %174 : vector<8x128xf32>
    %198 = arith.mulf %194, %193 : vector<8x128xf32>
    %199 = arith.addf %197, %198 : vector<8x128xf32>
    %200 = math.tanh %199 : vector<8x128xf32>
    %201 = arith.mulf %196, %200 : vector<8x128xf32>
    %202 = arith.index_cast %180 : i32 to index
    %c0_74 = arith.constant 0 : index
    %203 = vector.load %arg13[%202, %c0_74] : memref<64x128xf32, #tpu.memory_space<vmem>>, vector<8x128xf32>
    tpu.vector_store %arg13[%202, %c0_74], %201 {strides = array<i32>} : memref<64x128xf32, #tpu.memory_space<vmem>>, vector<8x128xf32>,
    %c4_i32_75 = arith.constant 4 : i32
    %c8_i32_76 = arith.constant 8 : i32
    %204 = arith.muli %c4_i32_75, %c8_i32_76 : i32
    %205 = tpu.assume_multiple %204, 8 : i32
    %206 = arith.index_cast %205 : i32 to index
    %c0_77 = arith.constant 0 : index
    %207 = vector.load %arg12[%206, %c0_77] : memref<64x512xf32, #tpu.memory_space<vmem>>, vector<8x512xf32>
    %208 = arith.truncf %201 : vector<8x128xf32> to vector<8x128xbf16>
    %cst_78 = arith.constant dense<0.000000e+00> : vector<8x512xf32>
    %209 = tpu.matmul %208, %102, %cst_78 {dimension_numbers = #tpu.dot_dimension_numbers<[1], [0], [0], [1], [0, 0, 1, 1], [], []>} : vector<8x128xbf16>, vector<128x512xbf16>, vector<8x512xf32> -> vector<8x512xf32>
    %210 = arith.addf %207, %209 : vector<8x512xf32>
    %211 = vector.extract_strided_slice %210 {offsets = [0, 0], sizes = [8, 384], strides = [1, 1]} : vector<8x512xf32> to vector<8x384xf32>
    %212 = arith.negf %211 : vector<8x384xf32>
    %213 = math.exp %212 : vector<8x384xf32>
    %cst_79 = arith.constant 1.000000e+00 : f32
    %214 = vector.broadcast %cst_79 : f32 to vector<8x384xf32>
    %215 = arith.addf %214, %213 : vector<8x384xf32>
    %216 = arith.divf %214, %215 : vector<8x384xf32>
    %217 = vector.extract_strided_slice %210 {offsets = [0, 384], sizes = [8, 128], strides = [1, 1]} : vector<8x512xf32> to vector<8x128xf32>
    %218 = math.tanh %217 : vector<8x128xf32>
    %219 = vector.extract_strided_slice %216 {offsets = [0, 0], sizes = [8, 128], strides = [1, 1]} : vector<8x384xf32> to vector<8x128xf32>
    %220 = vector.extract_strided_slice %216 {offsets = [0, 128], sizes = [8, 128], strides = [1, 1]} : vector<8x384xf32> to vector<8x128xf32>
    %221 = vector.extract_strided_slice %216 {offsets = [0, 256], sizes = [8, 128], strides = [1, 1]} : vector<8x384xf32> to vector<8x128xf32>
    %222 = arith.mulf %220, %199 : vector<8x128xf32>
    %223 = arith.mulf %219, %218 : vector<8x128xf32>
    %224 = arith.addf %222, %223 : vector<8x128xf32>
    %225 = math.tanh %224 : vector<8x128xf32>
    %226 = arith.mulf %221, %225 : vector<8x128xf32>
    %227 = arith.index_cast %205 : i32 to index
    %c0_80 = arith.constant 0 : index
    %228 = vector.load %arg13[%227, %c0_80] : memref<64x128xf32, #tpu.memory_space<vmem>>, vector<8x128xf32>
    tpu.vector_store %arg13[%227, %c0_80], %226 {strides = array<i32>} : memref<64x128xf32, #tpu.memory_space<vmem>>, vector<8x128xf32>,
    %c5_i32 = arith.constant 5 : i32
    %c8_i32_81 = arith.constant 8 : i32
    %229 = arith.muli %c5_i32, %c8_i32_81 : i32
    %230 = tpu.assume_multiple %229, 8 : i32
    %231 = arith.index_cast %230 : i32 to index
    %c0_82 = arith.constant 0 : index
    %232 = vector.load %arg12[%231, %c0_82] : memref<64x512xf32, #tpu.memory_space<vmem>>, vector<8x512xf32>
    %233 = arith.truncf %226 : vector<8x128xf32> to vector<8x128xbf16>
    %cst_83 = arith.constant dense<0.000000e+00> : vector<8x512xf32>
    %234 = tpu.matmul %233, %102, %cst_83 {dimension_numbers = #tpu.dot_dimension_numbers<[1], [0], [0], [1], [0, 0, 1, 1], [], []>} : vector<8x128xbf16>, vector<128x512xbf16>, vector<8x512xf32> -> vector<8x512xf32>
    %235 = arith.addf %232, %234 : vector<8x512xf32>
    %236 = vector.extract_strided_slice %235 {offsets = [0, 0], sizes = [8, 384], strides = [1, 1]} : vector<8x512xf32> to vector<8x384xf32>
    %237 = arith.negf %236 : vector<8x384xf32>
    %238 = math.exp %237 : vector<8x384xf32>
    %cst_84 = arith.constant 1.000000e+00 : f32
    %239 = vector.broadcast %cst_84 : f32 to vector<8x384xf32>
    %240 = arith.addf %239, %238 : vector<8x384xf32>
    %241 = arith.divf %239, %240 : vector<8x384xf32>
    %242 = vector.extract_strided_slice %235 {offsets = [0, 384], sizes = [8, 128], strides = [1, 1]} : vector<8x512xf32> to vector<8x128xf32>
    %243 = math.tanh %242 : vector<8x128xf32>
    %244 = vector.extract_strided_slice %241 {offsets = [0, 0], sizes = [8, 128], strides = [1, 1]} : vector<8x384xf32> to vector<8x128xf32>
    %245 = vector.extract_strided_slice %241 {offsets = [0, 128], sizes = [8, 128], strides = [1, 1]} : vector<8x384xf32> to vector<8x128xf32>
    %246 = vector.extract_strided_slice %241 {offsets = [0, 256], sizes = [8, 128], strides = [1, 1]} : vector<8x384xf32> to vector<8x128xf32>
    %247 = arith.mulf %245, %224 : vector<8x128xf32>
    %248 = arith.mulf %244, %243 : vector<8x128xf32>
    %249 = arith.addf %247, %248 : vector<8x128xf32>
    %250 = math.tanh %249 : vector<8x128xf32>
    %251 = arith.mulf %246, %250 : vector<8x128xf32>
    %252 = arith.index_cast %230 : i32 to index
    %c0_85 = arith.constant 0 : index
    %253 = vector.load %arg13[%252, %c0_85] : memref<64x128xf32, #tpu.memory_space<vmem>>, vector<8x128xf32>
    tpu.vector_store %arg13[%252, %c0_85], %251 {strides = array<i32>} : memref<64x128xf32, #tpu.memory_space<vmem>>, vector<8x128xf32>,
    %c6_i32 = arith.constant 6 : i32
    %c8_i32_86 = arith.constant 8 : i32
    %254 = arith.muli %c6_i32, %c8_i32_86 : i32
    %255 = tpu.assume_multiple %254, 8 : i32
    %256 = arith.index_cast %255 : i32 to index
    %c0_87 = arith.constant 0 : index
    %257 = vector.load %arg12[%256, %c0_87] : memref<64x512xf32, #tpu.memory_space<vmem>>, vector<8x512xf32>
    %258 = arith.truncf %251 : vector<8x128xf32> to vector<8x128xbf16>
    %cst_88 = arith.constant dense<0.000000e+00> : vector<8x512xf32>
    %259 = tpu.matmul %258, %102, %cst_88 {dimension_numbers = #tpu.dot_dimension_numbers<[1], [0], [0], [1], [0, 0, 1, 1], [], []>} : vector<8x128xbf16>, vector<128x512xbf16>, vector<8x512xf32> -> vector<8x512xf32>
    %260 = arith.addf %257, %259 : vector<8x512xf32>
    %261 = vector.extract_strided_slice %260 {offsets = [0, 0], sizes = [8, 384], strides = [1, 1]} : vector<8x512xf32> to vector<8x384xf32>
    %262 = arith.negf %261 : vector<8x384xf32>
    %263 = math.exp %262 : vector<8x384xf32>
    %cst_89 = arith.constant 1.000000e+00 : f32
    %264 = vector.broadcast %cst_89 : f32 to vector<8x384xf32>
    %265 = arith.addf %264, %263 : vector<8x384xf32>
    %266 = arith.divf %264, %265 : vector<8x384xf32>
    %267 = vector.extract_strided_slice %260 {offsets = [0, 384], sizes = [8, 128], strides = [1, 1]} : vector<8x512xf32> to vector<8x128xf32>
    %268 = math.tanh %267 : vector<8x128xf32>
    %269 = vector.extract_strided_slice %266 {offsets = [0, 0], sizes = [8, 128], strides = [1, 1]} : vector<8x384xf32> to vector<8x128xf32>
    %270 = vector.extract_strided_slice %266 {offsets = [0, 128], sizes = [8, 128], strides = [1, 1]} : vector<8x384xf32> to vector<8x128xf32>
    %271 = vector.extract_strided_slice %266 {offsets = [0, 256], sizes = [8, 128], strides = [1, 1]} : vector<8x384xf32> to vector<8x128xf32>
    %272 = arith.mulf %270, %249 : vector<8x128xf32>
    %273 = arith.mulf %269, %268 : vector<8x128xf32>
    %274 = arith.addf %272, %273 : vector<8x128xf32>
    %275 = math.tanh %274 : vector<8x128xf32>
    %276 = arith.mulf %271, %275 : vector<8x128xf32>
    %277 = arith.index_cast %255 : i32 to index
    %c0_90 = arith.constant 0 : index
    %278 = vector.load %arg13[%277, %c0_90] : memref<64x128xf32, #tpu.memory_space<vmem>>, vector<8x128xf32>
    tpu.vector_store %arg13[%277, %c0_90], %276 {strides = array<i32>} : memref<64x128xf32, #tpu.memory_space<vmem>>, vector<8x128xf32>,
    %c7_i32_91 = arith.constant 7 : i32
    %c8_i32_92 = arith.constant 8 : i32
    %279 = arith.muli %c7_i32_91, %c8_i32_92 : i32
    %280 = tpu.assume_multiple %279, 8 : i32
    %281 = arith.index_cast %280 : i32 to index
    %c0_93 = arith.constant 0 : index
    %282 = vector.load %arg12[%281, %c0_93] : memref<64x512xf32, #tpu.memory_space<vmem>>, vector<8x512xf32>
    %283 = arith.truncf %276 : vector<8x128xf32> to vector<8x128xbf16>
    %cst_94 = arith.constant dense<0.000000e+00> : vector<8x512xf32>
    %284 = tpu.matmul %283, %102, %cst_94 {dimension_numbers = #tpu.dot_dimension_numbers<[1], [0], [0], [1], [0, 0, 1, 1], [], []>} : vector<8x128xbf16>, vector<128x512xbf16>, vector<8x512xf32> -> vector<8x512xf32>
    %285 = arith.addf %282, %284 : vector<8x512xf32>
    %286 = vector.extract_strided_slice %285 {offsets = [0, 0], sizes = [8, 384], strides = [1, 1]} : vector<8x512xf32> to vector<8x384xf32>
    %287 = arith.negf %286 : vector<8x384xf32>
    %288 = math.exp %287 : vector<8x384xf32>
    %cst_95 = arith.constant 1.000000e+00 : f32
    %289 = vector.broadcast %cst_95 : f32 to vector<8x384xf32>
    %290 = arith.addf %289, %288 : vector<8x384xf32>
    %291 = arith.divf %289, %290 : vector<8x384xf32>
    %292 = vector.extract_strided_slice %285 {offsets = [0, 384], sizes = [8, 128], strides = [1, 1]} : vector<8x512xf32> to vector<8x128xf32>
    %293 = math.tanh %292 : vector<8x128xf32>
    %294 = vector.extract_strided_slice %291 {offsets = [0, 0], sizes = [8, 128], strides = [1, 1]} : vector<8x384xf32> to vector<8x128xf32>
    %295 = vector.extract_strided_slice %291 {offsets = [0, 128], sizes = [8, 128], strides = [1, 1]} : vector<8x384xf32> to vector<8x128xf32>
    %296 = vector.extract_strided_slice %291 {offsets = [0, 256], sizes = [8, 128], strides = [1, 1]} : vector<8x384xf32> to vector<8x128xf32>
    %297 = arith.mulf %295, %274 : vector<8x128xf32>
    %298 = arith.mulf %294, %293 : vector<8x128xf32>
    %299 = arith.addf %297, %298 : vector<8x128xf32>
    %300 = math.tanh %299 : vector<8x128xf32>
    %301 = arith.mulf %296, %300 : vector<8x128xf32>
    %302 = arith.index_cast %280 : i32 to index
    %c0_96 = arith.constant 0 : index
    %303 = vector.load %arg13[%302, %c0_96] : memref<64x128xf32, #tpu.memory_space<vmem>>, vector<8x128xf32>
    tpu.vector_store %arg13[%302, %c0_96], %301 {strides = array<i32>} : memref<64x128xf32, #tpu.memory_space<vmem>>, vector<8x128xf32>,
    %c8_i32_97 = arith.constant 8 : i32
    %c0_i32_98 = arith.constant 0 : i32
    %c8_i32_99 = arith.constant 8 : i32
    %304 = arith.muli %c0_i32_98, %c8_i32_99 : i32
    %305 = tpu.assume_multiple %304, 8 : i32
    %c7_i32_100 = arith.constant 7 : i32
    %306 = arith.subi %c7_i32_100, %c0_i32_98 : i32
    %c8_i32_101 = arith.constant 8 : i32
    %307 = arith.muli %306, %c8_i32_101 : i32
    %308 = tpu.assume_multiple %307, 8 : i32
    %309 = arith.index_cast %305 : i32 to index
    %c0_102 = arith.constant 0 : index
    %310 = vector.load %arg13[%309, %c0_102] : memref<64x128xf32, #tpu.memory_space<vmem>>, vector<8x128xf32>
    %311 = arith.index_cast %308 : i32 to index
    %c0_103 = arith.constant 0 : index
    %312 = vector.load %arg13[%311, %c0_103] : memref<64x128xf32, #tpu.memory_space<vmem>>, vector<8x128xf32>
    %313 = arith.select %21, %310, %312 : vector<8x128xi1>, vector<8x128xf32>
    %314 = arith.index_cast %305 : i32 to index
    %c0_104 = arith.constant 0 : index
    %315 = vector.load %arg13[%314, %c0_104] : memref<64x128xf32, #tpu.memory_space<vmem>>, vector<8x128xf32>
    tpu.vector_store %arg13[%314, %c0_104], %313 {strides = array<i32>} : memref<64x128xf32, #tpu.memory_space<vmem>>, vector<8x128xf32>,
    %316 = arith.select %21, %312, %310 : vector<8x128xi1>, vector<8x128xf32>
    %317 = arith.index_cast %308 : i32 to index
    %c0_105 = arith.constant 0 : index
    %318 = vector.load %arg13[%317, %c0_105] : memref<64x128xf32, #tpu.memory_space<vmem>>, vector<8x128xf32>
    tpu.vector_store %arg13[%317, %c0_105], %316 {strides = array<i32>} : memref<64x128xf32, #tpu.memory_space<vmem>>, vector<8x128xf32>,
    %c1_i32_106 = arith.constant 1 : i32
    %c8_i32_107 = arith.constant 8 : i32
    %319 = arith.muli %c1_i32_106, %c8_i32_107 : i32
    %320 = tpu.assume_multiple %319, 8 : i32
    %c7_i32_108 = arith.constant 7 : i32
    %321 = arith.subi %c7_i32_108, %c1_i32_106 : i32
    %c8_i32_109 = arith.constant 8 : i32
    %322 = arith.muli %321, %c8_i32_109 : i32
    %323 = tpu.assume_multiple %322, 8 : i32
    %324 = arith.index_cast %320 : i32 to index
    %c0_110 = arith.constant 0 : index
    %325 = vector.load %arg13[%324, %c0_110] : memref<64x128xf32, #tpu.memory_space<vmem>>, vector<8x128xf32>
    %326 = arith.index_cast %323 : i32 to index
    %c0_111 = arith.constant 0 : index
    %327 = vector.load %arg13[%326, %c0_111] : memref<64x128xf32, #tpu.memory_space<vmem>>, vector<8x128xf32>
    %328 = arith.select %21, %325, %327 : vector<8x128xi1>, vector<8x128xf32>
    %329 = arith.index_cast %320 : i32 to index
    %c0_112 = arith.constant 0 : index
    %330 = vector.load %arg13[%329, %c0_112] : memref<64x128xf32, #tpu.memory_space<vmem>>, vector<8x128xf32>
    tpu.vector_store %arg13[%329, %c0_112], %328 {strides = array<i32>} : memref<64x128xf32, #tpu.memory_space<vmem>>, vector<8x128xf32>,
    %331 = arith.select %21, %327, %325 : vector<8x128xi1>, vector<8x128xf32>
    %332 = arith.index_cast %323 : i32 to index
    %c0_113 = arith.constant 0 : index
    %333 = vector.load %arg13[%332, %c0_113] : memref<64x128xf32, #tpu.memory_space<vmem>>, vector<8x128xf32>
    tpu.vector_store %arg13[%332, %c0_113], %331 {strides = array<i32>} : memref<64x128xf32, #tpu.memory_space<vmem>>, vector<8x128xf32>,
    %c2_i32_114 = arith.constant 2 : i32
    %c8_i32_115 = arith.constant 8 : i32
    %334 = arith.muli %c2_i32_114, %c8_i32_115 : i32
    %335 = tpu.assume_multiple %334, 8 : i32
    %c7_i32_116 = arith.constant 7 : i32
    %336 = arith.subi %c7_i32_116, %c2_i32_114 : i32
    %c8_i32_117 = arith.constant 8 : i32
    %337 = arith.muli %336, %c8_i32_117 : i32
    %338 = tpu.assume_multiple %337, 8 : i32
    %339 = arith.index_cast %335 : i32 to index
    %c0_118 = arith.constant 0 : index
    %340 = vector.load %arg13[%339, %c0_118] : memref<64x128xf32, #tpu.memory_space<vmem>>, vector<8x128xf32>
    %341 = arith.index_cast %338 : i32 to index
    %c0_119 = arith.constant 0 : index
    %342 = vector.load %arg13[%341, %c0_119] : memref<64x128xf32, #tpu.memory_space<vmem>>, vector<8x128xf32>
    %343 = arith.select %21, %340, %342 : vector<8x128xi1>, vector<8x128xf32>
    %344 = arith.index_cast %335 : i32 to index
    %c0_120 = arith.constant 0 : index
    %345 = vector.load %arg13[%344, %c0_120] : memref<64x128xf32, #tpu.memory_space<vmem>>, vector<8x128xf32>
    tpu.vector_store %arg13[%344, %c0_120], %343 {strides = array<i32>} : memref<64x128xf32, #tpu.memory_space<vmem>>, vector<8x128xf32>,
    %346 = arith.select %21, %342, %340 : vector<8x128xi1>, vector<8x128xf32>
    %347 = arith.index_cast %338 : i32 to index
    %c0_121 = arith.constant 0 : index
    %348 = vector.load %arg13[%347, %c0_121] : memref<64x128xf32, #tpu.memory_space<vmem>>, vector<8x128xf32>
    tpu.vector_store %arg13[%347, %c0_121], %346 {strides = array<i32>} : memref<64x128xf32, #tpu.memory_space<vmem>>, vector<8x128xf32>,
    %c3_i32_122 = arith.constant 3 : i32
    %c8_i32_123 = arith.constant 8 : i32
    %349 = arith.muli %c3_i32_122, %c8_i32_123 : i32
    %350 = tpu.assume_multiple %349, 8 : i32
    %c7_i32_124 = arith.constant 7 : i32
    %351 = arith.subi %c7_i32_124, %c3_i32_122 : i32
    %c8_i32_125 = arith.constant 8 : i32
    %352 = arith.muli %351, %c8_i32_125 : i32
    %353 = tpu.assume_multiple %352, 8 : i32
    %354 = arith.index_cast %350 : i32 to index
    %c0_126 = arith.constant 0 : index
    %355 = vector.load %arg13[%354, %c0_126] : memref<64x128xf32, #tpu.memory_space<vmem>>, vector<8x128xf32>
    %356 = arith.index_cast %353 : i32 to index
    %c0_127 = arith.constant 0 : index
    %357 = vector.load %arg13[%356, %c0_127] : memref<64x128xf32, #tpu.memory_space<vmem>>, vector<8x128xf32>
    %358 = arith.select %21, %355, %357 : vector<8x128xi1>, vector<8x128xf32>
    %359 = arith.index_cast %350 : i32 to index
    %c0_128 = arith.constant 0 : index
    %360 = vector.load %arg13[%359, %c0_128] : memref<64x128xf32, #tpu.memory_space<vmem>>, vector<8x128xf32>
    tpu.vector_store %arg13[%359, %c0_128], %358 {strides = array<i32>} : memref<64x128xf32, #tpu.memory_space<vmem>>, vector<8x128xf32>,
    %361 = arith.select %21, %357, %355 : vector<8x128xi1>, vector<8x128xf32>
    %362 = arith.index_cast %353 : i32 to index
    %c0_129 = arith.constant 0 : index
    %363 = vector.load %arg13[%362, %c0_129] : memref<64x128xf32, #tpu.memory_space<vmem>>, vector<8x128xf32>
    tpu.vector_store %arg13[%362, %c0_129], %361 {strides = array<i32>} : memref<64x128xf32, #tpu.memory_space<vmem>>, vector<8x128xf32>,
    %c4_i32_130 = arith.constant 4 : i32
    %c0_131 = arith.constant 0 : index
    %c0_132 = arith.constant 0 : index
    %364 = vector.load %arg13[%c0_131, %c0_132] : memref<64x128xf32, #tpu.memory_space<vmem>>, vector<64x128xf32>
    %365 = arith.truncf %364 : vector<64x128xf32> to vector<64x128xbf16>
    %c0_133 = arith.constant 0 : index
    %c0_134 = arith.constant 0 : index
    %366 = vector.load %arg5[%c0_133, %c0_134] : memref<128x512xbf16, #tpu.memory_space<vmem>>, vector<128x512xbf16>
    %cst_135 = arith.constant dense<0.000000e+00> : vector<64x512xf32>
    %367 = tpu.matmul %365, %366, %cst_135 {dimension_numbers = #tpu.dot_dimension_numbers<[1], [0], [0], [1], [0, 0, 1, 1], [], []>} : vector<64x128xbf16>, vector<128x512xbf16>, vector<64x512xf32> -> vector<64x512xf32>
    %c0_136 = arith.constant 0 : index
    %c0_137 = arith.constant 0 : index
    %368 = vector.load %arg7[%c0_136, %c0_137] : memref<1x512xf32, #tpu.memory_space<vmem>>, vector<1x512xf32>
    %369 = vector.broadcast %368 : vector<1x512xf32> to vector<64x512xf32>
    %370 = arith.addf %367, %369 : vector<64x512xf32>
    %c0_138 = arith.constant 0 : index
    %c0_139 = arith.constant 0 : index
    %371 = vector.load %arg12[%c0_138, %c0_139] : memref<64x512xf32, #tpu.memory_space<vmem>>, vector<64x512xf32>
    tpu.vector_store %arg12[%c0_138, %c0_139], %370 {strides = array<i32>} : memref<64x512xf32, #tpu.memory_space<vmem>>, vector<64x512xf32>,
    %c0_i32_140 = arith.constant 0 : i32
    %c8_i32_141 = arith.constant 8 : i32
    %372 = arith.muli %c0_i32_140, %c8_i32_141 : i32
    %373 = tpu.assume_multiple %372, 8 : i32
    %c7_i32_142 = arith.constant 7 : i32
    %374 = arith.subi %c7_i32_142, %c0_i32_140 : i32
    %c8_i32_143 = arith.constant 8 : i32
    %375 = arith.muli %374, %c8_i32_143 : i32
    %376 = tpu.assume_multiple %375, 8 : i32
    %377 = arith.index_cast %373 : i32 to index
    %c0_144 = arith.constant 0 : index
    %378 = vector.load %arg12[%377, %c0_144] : memref<64x512xf32, #tpu.memory_space<vmem>>, vector<8x512xf32>
    %379 = arith.index_cast %376 : i32 to index
    %c0_145 = arith.constant 0 : index
    %380 = vector.load %arg12[%379, %c0_145] : memref<64x512xf32, #tpu.memory_space<vmem>>, vector<8x512xf32>
    %381 = arith.select %18, %378, %380 : vector<8x512xi1>, vector<8x512xf32>
    %382 = arith.index_cast %373 : i32 to index
    %c0_146 = arith.constant 0 : index
    %383 = vector.load %arg12[%382, %c0_146] : memref<64x512xf32, #tpu.memory_space<vmem>>, vector<8x512xf32>
    tpu.vector_store %arg12[%382, %c0_146], %381 {strides = array<i32>} : memref<64x512xf32, #tpu.memory_space<vmem>>, vector<8x512xf32>,
    %384 = arith.select %18, %380, %378 : vector<8x512xi1>, vector<8x512xf32>
    %385 = arith.index_cast %376 : i32 to index
    %c0_147 = arith.constant 0 : index
    %386 = vector.load %arg12[%385, %c0_147] : memref<64x512xf32, #tpu.memory_space<vmem>>, vector<8x512xf32>
    tpu.vector_store %arg12[%385, %c0_147], %384 {strides = array<i32>} : memref<64x512xf32, #tpu.memory_space<vmem>>, vector<8x512xf32>,
    %c1_i32_148 = arith.constant 1 : i32
    %c8_i32_149 = arith.constant 8 : i32
    %387 = arith.muli %c1_i32_148, %c8_i32_149 : i32
    %388 = tpu.assume_multiple %387, 8 : i32
    %c7_i32_150 = arith.constant 7 : i32
    %389 = arith.subi %c7_i32_150, %c1_i32_148 : i32
    %c8_i32_151 = arith.constant 8 : i32
    %390 = arith.muli %389, %c8_i32_151 : i32
    %391 = tpu.assume_multiple %390, 8 : i32
    %392 = arith.index_cast %388 : i32 to index
    %c0_152 = arith.constant 0 : index
    %393 = vector.load %arg12[%392, %c0_152] : memref<64x512xf32, #tpu.memory_space<vmem>>, vector<8x512xf32>
    %394 = arith.index_cast %391 : i32 to index
    %c0_153 = arith.constant 0 : index
    %395 = vector.load %arg12[%394, %c0_153] : memref<64x512xf32, #tpu.memory_space<vmem>>, vector<8x512xf32>
    %396 = arith.select %18, %393, %395 : vector<8x512xi1>, vector<8x512xf32>
    %397 = arith.index_cast %388 : i32 to index
    %c0_154 = arith.constant 0 : index
    %398 = vector.load %arg12[%397, %c0_154] : memref<64x512xf32, #tpu.memory_space<vmem>>, vector<8x512xf32>
    tpu.vector_store %arg12[%397, %c0_154], %396 {strides = array<i32>} : memref<64x512xf32, #tpu.memory_space<vmem>>, vector<8x512xf32>,
    %399 = arith.select %18, %395, %393 : vector<8x512xi1>, vector<8x512xf32>
    %400 = arith.index_cast %391 : i32 to index
    %c0_155 = arith.constant 0 : index
    %401 = vector.load %arg12[%400, %c0_155] : memref<64x512xf32, #tpu.memory_space<vmem>>, vector<8x512xf32>
    tpu.vector_store %arg12[%400, %c0_155], %399 {strides = array<i32>} : memref<64x512xf32, #tpu.memory_space<vmem>>, vector<8x512xf32>,
    %c2_i32_156 = arith.constant 2 : i32
    %c8_i32_157 = arith.constant 8 : i32
    %402 = arith.muli %c2_i32_156, %c8_i32_157 : i32
    %403 = tpu.assume_multiple %402, 8 : i32
    %c7_i32_158 = arith.constant 7 : i32
    %404 = arith.subi %c7_i32_158, %c2_i32_156 : i32
    %c8_i32_159 = arith.constant 8 : i32
    %405 = arith.muli %404, %c8_i32_159 : i32
    %406 = tpu.assume_multiple %405, 8 : i32
    %407 = arith.index_cast %403 : i32 to index
    %c0_160 = arith.constant 0 : index
    %408 = vector.load %arg12[%407, %c0_160] : memref<64x512xf32, #tpu.memory_space<vmem>>, vector<8x512xf32>
    %409 = arith.index_cast %406 : i32 to index
    %c0_161 = arith.constant 0 : index
    %410 = vector.load %arg12[%409, %c0_161] : memref<64x512xf32, #tpu.memory_space<vmem>>, vector<8x512xf32>
    %411 = arith.select %18, %408, %410 : vector<8x512xi1>, vector<8x512xf32>
    %412 = arith.index_cast %403 : i32 to index
    %c0_162 = arith.constant 0 : index
    %413 = vector.load %arg12[%412, %c0_162] : memref<64x512xf32, #tpu.memory_space<vmem>>, vector<8x512xf32>
    tpu.vector_store %arg12[%412, %c0_162], %411 {strides = array<i32>} : memref<64x512xf32, #tpu.memory_space<vmem>>, vector<8x512xf32>,
    %414 = arith.select %18, %410, %408 : vector<8x512xi1>, vector<8x512xf32>
    %415 = arith.index_cast %406 : i32 to index
    %c0_163 = arith.constant 0 : index
    %416 = vector.load %arg12[%415, %c0_163] : memref<64x512xf32, #tpu.memory_space<vmem>>, vector<8x512xf32>
    tpu.vector_store %arg12[%415, %c0_163], %414 {strides = array<i32>} : memref<64x512xf32, #tpu.memory_space<vmem>>, vector<8x512xf32>,
    %c3_i32_164 = arith.constant 3 : i32
    %c8_i32_165 = arith.constant 8 : i32
    %417 = arith.muli %c3_i32_164, %c8_i32_165 : i32
    %418 = tpu.assume_multiple %417, 8 : i32
    %c7_i32_166 = arith.constant 7 : i32
    %419 = arith.subi %c7_i32_166, %c3_i32_164 : i32
    %c8_i32_167 = arith.constant 8 : i32
    %420 = arith.muli %419, %c8_i32_167 : i32
    %421 = tpu.assume_multiple %420, 8 : i32
    %422 = arith.index_cast %418 : i32 to index
    %c0_168 = arith.constant 0 : index
    %423 = vector.load %arg12[%422, %c0_168] : memref<64x512xf32, #tpu.memory_space<vmem>>, vector<8x512xf32>
    %424 = arith.index_cast %421 : i32 to index
    %c0_169 = arith.constant 0 : index
    %425 = vector.load %arg12[%424, %c0_169] : memref<64x512xf32, #tpu.memory_space<vmem>>, vector<8x512xf32>
    %426 = arith.select %18, %423, %425 : vector<8x512xi1>, vector<8x512xf32>
    %427 = arith.index_cast %418 : i32 to index
    %c0_170 = arith.constant 0 : index
    %428 = vector.load %arg12[%427, %c0_170] : memref<64x512xf32, #tpu.memory_space<vmem>>, vector<8x512xf32>
    tpu.vector_store %arg12[%427, %c0_170], %426 {strides = array<i32>} : memref<64x512xf32, #tpu.memory_space<vmem>>, vector<8x512xf32>,
    %429 = arith.select %18, %425, %423 : vector<8x512xi1>, vector<8x512xf32>
    %430 = arith.index_cast %421 : i32 to index
    %c0_171 = arith.constant 0 : index
    %431 = vector.load %arg12[%430, %c0_171] : memref<64x512xf32, #tpu.memory_space<vmem>>, vector<8x512xf32>
    tpu.vector_store %arg12[%430, %c0_171], %429 {strides = array<i32>} : memref<64x512xf32, #tpu.memory_space<vmem>>, vector<8x512xf32>,
    %c4_i32_172 = arith.constant 4 : i32
    %c0_173 = arith.constant 0 : index
    %c0_174 = arith.constant 0 : index
    %432 = vector.load %arg6[%c0_173, %c0_174] : memref<128x512xbf16, #tpu.memory_space<vmem>>, vector<128x512xbf16>
    %cst_175 = arith.constant 0.000000e+00 : f32
    %433 = vector.broadcast %cst_175 : f32 to vector<8x128xf32>
    %cst_176 = arith.constant 0xFF800000 : f32
    %434 = vector.broadcast %cst_176 : f32 to vector<8x128xf32>
    %c0_i32_177 = arith.constant 0 : i32
    %c8_i32_178 = arith.constant 8 : i32
    %435 = arith.muli %c0_i32_177, %c8_i32_178 : i32
    %436 = tpu.assume_multiple %435, 8 : i32
    %437 = arith.index_cast %436 : i32 to index
    %c0_179 = arith.constant 0 : index
    %438 = vector.load %arg12[%437, %c0_179] : memref<64x512xf32, #tpu.memory_space<vmem>>, vector<8x512xf32>
    %439 = arith.truncf %433 : vector<8x128xf32> to vector<8x128xbf16>
    %cst_180 = arith.constant dense<0.000000e+00> : vector<8x512xf32>
    %440 = tpu.matmul %439, %432, %cst_180 {dimension_numbers = #tpu.dot_dimension_numbers<[1], [0], [0], [1], [0, 0, 1, 1], [], []>} : vector<8x128xbf16>, vector<128x512xbf16>, vector<8x512xf32> -> vector<8x512xf32>
    %441 = arith.addf %438, %440 : vector<8x512xf32>
    %442 = vector.extract_strided_slice %441 {offsets = [0, 0], sizes = [8, 384], strides = [1, 1]} : vector<8x512xf32> to vector<8x384xf32>
    %443 = arith.negf %442 : vector<8x384xf32>
    %444 = math.exp %443 : vector<8x384xf32>
    %cst_181 = arith.constant 1.000000e+00 : f32
    %445 = vector.broadcast %cst_181 : f32 to vector<8x384xf32>
    %446 = arith.addf %445, %444 : vector<8x384xf32>
    %447 = arith.divf %445, %446 : vector<8x384xf32>
    %448 = vector.extract_strided_slice %441 {offsets = [0, 384], sizes = [8, 128], strides = [1, 1]} : vector<8x512xf32> to vector<8x128xf32>
    %449 = math.tanh %448 : vector<8x128xf32>
    %450 = vector.extract_strided_slice %447 {offsets = [0, 0], sizes = [8, 128], strides = [1, 1]} : vector<8x384xf32> to vector<8x128xf32>
    %451 = vector.extract_strided_slice %447 {offsets = [0, 128], sizes = [8, 128], strides = [1, 1]} : vector<8x384xf32> to vector<8x128xf32>
    %452 = vector.extract_strided_slice %447 {offsets = [0, 256], sizes = [8, 128], strides = [1, 1]} : vector<8x384xf32> to vector<8x128xf32>
    %453 = arith.mulf %451, %433 : vector<8x128xf32>
    %454 = arith.mulf %450, %449 : vector<8x128xf32>
    %455 = arith.addf %453, %454 : vector<8x128xf32>
    %456 = math.tanh %455 : vector<8x128xf32>
    %457 = arith.mulf %452, %456 : vector<8x128xf32>
    %458 = arith.maximumf %434, %457 : vector<8x128xf32>
    %c1_i32_182 = arith.constant 1 : i32
    %c8_i32_183 = arith.constant 8 : i32
    %459 = arith.muli %c1_i32_182, %c8_i32_183 : i32
    %460 = tpu.assume_multiple %459, 8 : i32
    %461 = arith.index_cast %460 : i32 to index
    %c0_184 = arith.constant 0 : index
    %462 = vector.load %arg12[%461, %c0_184] : memref<64x512xf32, #tpu.memory_space<vmem>>, vector<8x512xf32>
    %463 = arith.truncf %457 : vector<8x128xf32> to vector<8x128xbf16>
    %cst_185 = arith.constant dense<0.000000e+00> : vector<8x512xf32>
    %464 = tpu.matmul %463, %432, %cst_185 {dimension_numbers = #tpu.dot_dimension_numbers<[1], [0], [0], [1], [0, 0, 1, 1], [], []>} : vector<8x128xbf16>, vector<128x512xbf16>, vector<8x512xf32> -> vector<8x512xf32>
    %465 = arith.addf %462, %464 : vector<8x512xf32>
    %466 = vector.extract_strided_slice %465 {offsets = [0, 0], sizes = [8, 384], strides = [1, 1]} : vector<8x512xf32> to vector<8x384xf32>
    %467 = arith.negf %466 : vector<8x384xf32>
    %468 = math.exp %467 : vector<8x384xf32>
    %cst_186 = arith.constant 1.000000e+00 : f32
    %469 = vector.broadcast %cst_186 : f32 to vector<8x384xf32>
    %470 = arith.addf %469, %468 : vector<8x384xf32>
    %471 = arith.divf %469, %470 : vector<8x384xf32>
    %472 = vector.extract_strided_slice %465 {offsets = [0, 384], sizes = [8, 128], strides = [1, 1]} : vector<8x512xf32> to vector<8x128xf32>
    %473 = math.tanh %472 : vector<8x128xf32>
    %474 = vector.extract_strided_slice %471 {offsets = [0, 0], sizes = [8, 128], strides = [1, 1]} : vector<8x384xf32> to vector<8x128xf32>
    %475 = vector.extract_strided_slice %471 {offsets = [0, 128], sizes = [8, 128], strides = [1, 1]} : vector<8x384xf32> to vector<8x128xf32>
    %476 = vector.extract_strided_slice %471 {offsets = [0, 256], sizes = [8, 128], strides = [1, 1]} : vector<8x384xf32> to vector<8x128xf32>
    %477 = arith.mulf %475, %455 : vector<8x128xf32>
    %478 = arith.mulf %474, %473 : vector<8x128xf32>
    %479 = arith.addf %477, %478 : vector<8x128xf32>
    %480 = math.tanh %479 : vector<8x128xf32>
    %481 = arith.mulf %476, %480 : vector<8x128xf32>
    %482 = arith.maximumf %458, %481 : vector<8x128xf32>
    %c2_i32_187 = arith.constant 2 : i32
    %c8_i32_188 = arith.constant 8 : i32
    %483 = arith.muli %c2_i32_187, %c8_i32_188 : i32
    %484 = tpu.assume_multiple %483, 8 : i32
    %485 = arith.index_cast %484 : i32 to index
    %c0_189 = arith.constant 0 : index
    %486 = vector.load %arg12[%485, %c0_189] : memref<64x512xf32, #tpu.memory_space<vmem>>, vector<8x512xf32>
    %487 = arith.truncf %481 : vector<8x128xf32> to vector<8x128xbf16>
    %cst_190 = arith.constant dense<0.000000e+00> : vector<8x512xf32>
    %488 = tpu.matmul %487, %432, %cst_190 {dimension_numbers = #tpu.dot_dimension_numbers<[1], [0], [0], [1], [0, 0, 1, 1], [], []>} : vector<8x128xbf16>, vector<128x512xbf16>, vector<8x512xf32> -> vector<8x512xf32>
    %489 = arith.addf %486, %488 : vector<8x512xf32>
    %490 = vector.extract_strided_slice %489 {offsets = [0, 0], sizes = [8, 384], strides = [1, 1]} : vector<8x512xf32> to vector<8x384xf32>
    %491 = arith.negf %490 : vector<8x384xf32>
    %492 = math.exp %491 : vector<8x384xf32>
    %cst_191 = arith.constant 1.000000e+00 : f32
    %493 = vector.broadcast %cst_191 : f32 to vector<8x384xf32>
    %494 = arith.addf %493, %492 : vector<8x384xf32>
    %495 = arith.divf %493, %494 : vector<8x384xf32>
    %496 = vector.extract_strided_slice %489 {offsets = [0, 384], sizes = [8, 128], strides = [1, 1]} : vector<8x512xf32> to vector<8x128xf32>
    %497 = math.tanh %496 : vector<8x128xf32>
    %498 = vector.extract_strided_slice %495 {offsets = [0, 0], sizes = [8, 128], strides = [1, 1]} : vector<8x384xf32> to vector<8x128xf32>
    %499 = vector.extract_strided_slice %495 {offsets = [0, 128], sizes = [8, 128], strides = [1, 1]} : vector<8x384xf32> to vector<8x128xf32>
    %500 = vector.extract_strided_slice %495 {offsets = [0, 256], sizes = [8, 128], strides = [1, 1]} : vector<8x384xf32> to vector<8x128xf32>
    %501 = arith.mulf %499, %479 : vector<8x128xf32>
    %502 = arith.mulf %498, %497 : vector<8x128xf32>
    %503 = arith.addf %501, %502 : vector<8x128xf32>
    %504 = math.tanh %503 : vector<8x128xf32>
    %505 = arith.mulf %500, %504 : vector<8x128xf32>
    %506 = arith.maximumf %482, %505 : vector<8x128xf32>
    %c3_i32_192 = arith.constant 3 : i32
    %c8_i32_193 = arith.constant 8 : i32
    %507 = arith.muli %c3_i32_192, %c8_i32_193 : i32
    %508 = tpu.assume_multiple %507, 8 : i32
    %509 = arith.index_cast %508 : i32 to index
    %c0_194 = arith.constant 0 : index
    %510 = vector.load %arg12[%509, %c0_194] : memref<64x512xf32, #tpu.memory_space<vmem>>, vector<8x512xf32>
    %511 = arith.truncf %505 : vector<8x128xf32> to vector<8x128xbf16>
    %cst_195 = arith.constant dense<0.000000e+00> : vector<8x512xf32>
    %512 = tpu.matmul %511, %432, %cst_195 {dimension_numbers = #tpu.dot_dimension_numbers<[1], [0], [0], [1], [0, 0, 1, 1], [], []>} : vector<8x128xbf16>, vector<128x512xbf16>, vector<8x512xf32> -> vector<8x512xf32>
    %513 = arith.addf %510, %512 : vector<8x512xf32>
    %514 = vector.extract_strided_slice %513 {offsets = [0, 0], sizes = [8, 384], strides = [1, 1]} : vector<8x512xf32> to vector<8x384xf32>
    %515 = arith.negf %514 : vector<8x384xf32>
    %516 = math.exp %515 : vector<8x384xf32>
    %cst_196 = arith.constant 1.000000e+00 : f32
    %517 = vector.broadcast %cst_196 : f32 to vector<8x384xf32>
    %518 = arith.addf %517, %516 : vector<8x384xf32>
    %519 = arith.divf %517, %518 : vector<8x384xf32>
    %520 = vector.extract_strided_slice %513 {offsets = [0, 384], sizes = [8, 128], strides = [1, 1]} : vector<8x512xf32> to vector<8x128xf32>
    %521 = math.tanh %520 : vector<8x128xf32>
    %522 = vector.extract_strided_slice %519 {offsets = [0, 0], sizes = [8, 128], strides = [1, 1]} : vector<8x384xf32> to vector<8x128xf32>
    %523 = vector.extract_strided_slice %519 {offsets = [0, 128], sizes = [8, 128], strides = [1, 1]} : vector<8x384xf32> to vector<8x128xf32>
    %524 = vector.extract_strided_slice %519 {offsets = [0, 256], sizes = [8, 128], strides = [1, 1]} : vector<8x384xf32> to vector<8x128xf32>
    %525 = arith.mulf %523, %503 : vector<8x128xf32>
    %526 = arith.mulf %522, %521 : vector<8x128xf32>
    %527 = arith.addf %525, %526 : vector<8x128xf32>
    %528 = math.tanh %527 : vector<8x128xf32>
    %529 = arith.mulf %524, %528 : vector<8x128xf32>
    %530 = arith.maximumf %506, %529 : vector<8x128xf32>
    %c4_i32_197 = arith.constant 4 : i32
    %c8_i32_198 = arith.constant 8 : i32
    %531 = arith.muli %c4_i32_197, %c8_i32_198 : i32
    %532 = tpu.assume_multiple %531, 8 : i32
    %533 = arith.index_cast %532 : i32 to index
    %c0_199 = arith.constant 0 : index
    %534 = vector.load %arg12[%533, %c0_199] : memref<64x512xf32, #tpu.memory_space<vmem>>, vector<8x512xf32>
    %535 = arith.truncf %529 : vector<8x128xf32> to vector<8x128xbf16>
    %cst_200 = arith.constant dense<0.000000e+00> : vector<8x512xf32>
    %536 = tpu.matmul %535, %432, %cst_200 {dimension_numbers = #tpu.dot_dimension_numbers<[1], [0], [0], [1], [0, 0, 1, 1], [], []>} : vector<8x128xbf16>, vector<128x512xbf16>, vector<8x512xf32> -> vector<8x512xf32>
    %537 = arith.addf %534, %536 : vector<8x512xf32>
    %538 = vector.extract_strided_slice %537 {offsets = [0, 0], sizes = [8, 384], strides = [1, 1]} : vector<8x512xf32> to vector<8x384xf32>
    %539 = arith.negf %538 : vector<8x384xf32>
    %540 = math.exp %539 : vector<8x384xf32>
    %cst_201 = arith.constant 1.000000e+00 : f32
    %541 = vector.broadcast %cst_201 : f32 to vector<8x384xf32>
    %542 = arith.addf %541, %540 : vector<8x384xf32>
    %543 = arith.divf %541, %542 : vector<8x384xf32>
    %544 = vector.extract_strided_slice %537 {offsets = [0, 384], sizes = [8, 128], strides = [1, 1]} : vector<8x512xf32> to vector<8x128xf32>
    %545 = math.tanh %544 : vector<8x128xf32>
    %546 = vector.extract_strided_slice %543 {offsets = [0, 0], sizes = [8, 128], strides = [1, 1]} : vector<8x384xf32> to vector<8x128xf32>
    %547 = vector.extract_strided_slice %543 {offsets = [0, 128], sizes = [8, 128], strides = [1, 1]} : vector<8x384xf32> to vector<8x128xf32>
    %548 = vector.extract_strided_slice %543 {offsets = [0, 256], sizes = [8, 128], strides = [1, 1]} : vector<8x384xf32> to vector<8x128xf32>
    %549 = arith.mulf %547, %527 : vector<8x128xf32>
    %550 = arith.mulf %546, %545 : vector<8x128xf32>
    %551 = arith.addf %549, %550 : vector<8x128xf32>
    %552 = math.tanh %551 : vector<8x128xf32>
    %553 = arith.mulf %548, %552 : vector<8x128xf32>
    %554 = arith.maximumf %530, %553 : vector<8x128xf32>
    %c5_i32_202 = arith.constant 5 : i32
    %c8_i32_203 = arith.constant 8 : i32
    %555 = arith.muli %c5_i32_202, %c8_i32_203 : i32
    %556 = tpu.assume_multiple %555, 8 : i32
    %557 = arith.index_cast %556 : i32 to index
    %c0_204 = arith.constant 0 : index
    %558 = vector.load %arg12[%557, %c0_204] : memref<64x512xf32, #tpu.memory_space<vmem>>, vector<8x512xf32>
    %559 = arith.truncf %553 : vector<8x128xf32> to vector<8x128xbf16>
    %cst_205 = arith.constant dense<0.000000e+00> : vector<8x512xf32>
    %560 = tpu.matmul %559, %432, %cst_205 {dimension_numbers = #tpu.dot_dimension_numbers<[1], [0], [0], [1], [0, 0, 1, 1], [], []>} : vector<8x128xbf16>, vector<128x512xbf16>, vector<8x512xf32> -> vector<8x512xf32>
    %561 = arith.addf %558, %560 : vector<8x512xf32>
    %562 = vector.extract_strided_slice %561 {offsets = [0, 0], sizes = [8, 384], strides = [1, 1]} : vector<8x512xf32> to vector<8x384xf32>
    %563 = arith.negf %562 : vector<8x384xf32>
    %564 = math.exp %563 : vector<8x384xf32>
    %cst_206 = arith.constant 1.000000e+00 : f32
    %565 = vector.broadcast %cst_206 : f32 to vector<8x384xf32>
    %566 = arith.addf %565, %564 : vector<8x384xf32>
    %567 = arith.divf %565, %566 : vector<8x384xf32>
    %568 = vector.extract_strided_slice %561 {offsets = [0, 384], sizes = [8, 128], strides = [1, 1]} : vector<8x512xf32> to vector<8x128xf32>
    %569 = math.tanh %568 : vector<8x128xf32>
    %570 = vector.extract_strided_slice %567 {offsets = [0, 0], sizes = [8, 128], strides = [1, 1]} : vector<8x384xf32> to vector<8x128xf32>
    %571 = vector.extract_strided_slice %567 {offsets = [0, 128], sizes = [8, 128], strides = [1, 1]} : vector<8x384xf32> to vector<8x128xf32>
    %572 = vector.extract_strided_slice %567 {offsets = [0, 256], sizes = [8, 128], strides = [1, 1]} : vector<8x384xf32> to vector<8x128xf32>
    %573 = arith.mulf %571, %551 : vector<8x128xf32>
    %574 = arith.mulf %570, %569 : vector<8x128xf32>
    %575 = arith.addf %573, %574 : vector<8x128xf32>
    %576 = math.tanh %575 : vector<8x128xf32>
    %577 = arith.mulf %572, %576 : vector<8x128xf32>
    %578 = arith.maximumf %554, %577 : vector<8x128xf32>
    %c6_i32_207 = arith.constant 6 : i32
    %c8_i32_208 = arith.constant 8 : i32
    %579 = arith.muli %c6_i32_207, %c8_i32_208 : i32
    %580 = tpu.assume_multiple %579, 8 : i32
    %581 = arith.index_cast %580 : i32 to index
    %c0_209 = arith.constant 0 : index
    %582 = vector.load %arg12[%581, %c0_209] : memref<64x512xf32, #tpu.memory_space<vmem>>, vector<8x512xf32>
    %583 = arith.truncf %577 : vector<8x128xf32> to vector<8x128xbf16>
    %cst_210 = arith.constant dense<0.000000e+00> : vector<8x512xf32>
    %584 = tpu.matmul %583, %432, %cst_210 {dimension_numbers = #tpu.dot_dimension_numbers<[1], [0], [0], [1], [0, 0, 1, 1], [], []>} : vector<8x128xbf16>, vector<128x512xbf16>, vector<8x512xf32> -> vector<8x512xf32>
    %585 = arith.addf %582, %584 : vector<8x512xf32>
    %586 = vector.extract_strided_slice %585 {offsets = [0, 0], sizes = [8, 384], strides = [1, 1]} : vector<8x512xf32> to vector<8x384xf32>
    %587 = arith.negf %586 : vector<8x384xf32>
    %588 = math.exp %587 : vector<8x384xf32>
    %cst_211 = arith.constant 1.000000e+00 : f32
    %589 = vector.broadcast %cst_211 : f32 to vector<8x384xf32>
    %590 = arith.addf %589, %588 : vector<8x384xf32>
    %591 = arith.divf %589, %590 : vector<8x384xf32>
    %592 = vector.extract_strided_slice %585 {offsets = [0, 384], sizes = [8, 128], strides = [1, 1]} : vector<8x512xf32> to vector<8x128xf32>
    %593 = math.tanh %592 : vector<8x128xf32>
    %594 = vector.extract_strided_slice %591 {offsets = [0, 0], sizes = [8, 128], strides = [1, 1]} : vector<8x384xf32> to vector<8x128xf32>
    %595 = vector.extract_strided_slice %591 {offsets = [0, 128], sizes = [8, 128], strides = [1, 1]} : vector<8x384xf32> to vector<8x128xf32>
    %596 = vector.extract_strided_slice %591 {offsets = [0, 256], sizes = [8, 128], strides = [1, 1]} : vector<8x384xf32> to vector<8x128xf32>
    %597 = arith.mulf %595, %575 : vector<8x128xf32>
    %598 = arith.mulf %594, %593 : vector<8x128xf32>
    %599 = arith.addf %597, %598 : vector<8x128xf32>
    %600 = math.tanh %599 : vector<8x128xf32>
    %601 = arith.mulf %596, %600 : vector<8x128xf32>
    %602 = arith.maximumf %578, %601 : vector<8x128xf32>
    %c7_i32_212 = arith.constant 7 : i32
    %c8_i32_213 = arith.constant 8 : i32
    %603 = arith.muli %c7_i32_212, %c8_i32_213 : i32
    %604 = tpu.assume_multiple %603, 8 : i32
    %605 = arith.index_cast %604 : i32 to index
    %c0_214 = arith.constant 0 : index
    %606 = vector.load %arg12[%605, %c0_214] : memref<64x512xf32, #tpu.memory_space<vmem>>, vector<8x512xf32>
    %607 = arith.truncf %601 : vector<8x128xf32> to vector<8x128xbf16>
    %cst_215 = arith.constant dense<0.000000e+00> : vector<8x512xf32>
    %608 = tpu.matmul %607, %432, %cst_215 {dimension_numbers = #tpu.dot_dimension_numbers<[1], [0], [0], [1], [0, 0, 1, 1], [], []>} : vector<8x128xbf16>, vector<128x512xbf16>, vector<8x512xf32> -> vector<8x512xf32>
    %609 = arith.addf %606, %608 : vector<8x512xf32>
    %610 = vector.extract_strided_slice %609 {offsets = [0, 0], sizes = [8, 384], strides = [1, 1]} : vector<8x512xf32> to vector<8x384xf32>
    %611 = arith.negf %610 : vector<8x384xf32>
    %612 = math.exp %611 : vector<8x384xf32>
    %cst_216 = arith.constant 1.000000e+00 : f32
    %613 = vector.broadcast %cst_216 : f32 to vector<8x384xf32>
    %614 = arith.addf %613, %612 : vector<8x384xf32>
    %615 = arith.divf %613, %614 : vector<8x384xf32>
    %616 = vector.extract_strided_slice %609 {offsets = [0, 384], sizes = [8, 128], strides = [1, 1]} : vector<8x512xf32> to vector<8x128xf32>
    %617 = math.tanh %616 : vector<8x128xf32>
    %618 = vector.extract_strided_slice %615 {offsets = [0, 0], sizes = [8, 128], strides = [1, 1]} : vector<8x384xf32> to vector<8x128xf32>
    %619 = vector.extract_strided_slice %615 {offsets = [0, 128], sizes = [8, 128], strides = [1, 1]} : vector<8x384xf32> to vector<8x128xf32>
    %620 = vector.extract_strided_slice %615 {offsets = [0, 256], sizes = [8, 128], strides = [1, 1]} : vector<8x384xf32> to vector<8x128xf32>
    %621 = arith.mulf %619, %599 : vector<8x128xf32>
    %622 = arith.mulf %618, %617 : vector<8x128xf32>
    %623 = arith.addf %621, %622 : vector<8x128xf32>
    %624 = math.tanh %623 : vector<8x128xf32>
    %625 = arith.mulf %620, %624 : vector<8x128xf32>
    %626 = arith.maximumf %602, %625 : vector<8x128xf32>
    %c8_i32_217 = arith.constant 8 : i32
    %c0_218 = arith.constant 0 : index
    %c0_219 = arith.constant 0 : index
    %627 = vector.load %arg8[%c0_218, %c0_219] : memref<1x128xf32, #tpu.memory_space<vmem>>, vector<1x128xf32>
    %628 = vector.broadcast %627 : vector<1x128xf32> to vector<8x128xf32>
    %629 = arith.mulf %626, %628 : vector<8x128xf32>
    %cst_220 = arith.constant dense<0.000000e+00> : vector<8xf32>
    %630 = vector.multi_reduction <add>, %629, %cst_220 [1] : vector<8x128xf32> to vector<8xf32>
    %631 = vector.shape_cast %630 : vector<8xf32> to vector<8x1xf32>
    %c0_221 = arith.constant 0 : index
    %c0_222 = arith.constant 0 : index
    %632 = vector.load %arg9[%c0_221, %c0_222] : memref<1x1xf32, #tpu.memory_space<vmem>>, vector<1x1xf32>
    %633 = vector.broadcast %632 : vector<1x1xf32> to vector<8x1xf32>
    %634 = arith.addf %631, %633 : vector<8x1xf32>
    %c0_223 = arith.constant 0 : index
    %c0_224 = arith.constant 0 : index
    %635 = vector.load %arg10[%c0_223, %c0_224] : memref<8x1xf32, #tpu.memory_space<vmem>>, vector<8x1xf32>
    tpu.vector_store %arg10[%c0_223, %c0_224], %634 {strides = array<i32>} : memref<8x1xf32, #tpu.memory_space<vmem>>, vector<8x1xf32>,
    return
  }
}

</mosaic_0001>

<bundles_post_ra>
// kernel: tpu_custom_call.1
= control target key start
LH: loop header
LB: loop body
LE: loop exit
PB: predicated region body
PF: predicated region fallthrough
CT: control target
= control target key end

     0   :  { %s7354_s0 = inlined_call_operand.vmem [shape: s32[64,1], index: 0, kind: input, shape index: {}]   ;;  %s7355_s1 = inlined_call_operand.hbm [shape: f32[128,384], index: 1, kind: input, shape index: {}]   ;;  %s7356_s2 = inlined_call_operand.hbm [shape: bf16[384,512], index: 2, kind: input, shape index: {}]   ;;  %s7357_s3 = inlined_call_operand.hbm [shape: bf16[128,512], index: 3, kind: input, shape index: {}]   ;;  %s7358_s4 = inlined_call_operand.vmem [shape: f32[1,512], index: 4, kind: input, shape index: {}]   ;;  %s7359_s5 = inlined_call_operand.hbm [shape: bf16[128,512], index: 5, kind: input, shape index: {}]   ;;  %s7360_s6 = inlined_call_operand.hbm [shape: bf16[128,512], index: 6, kind: input, shape index: {}]   ;;  %s7361_s7 = inlined_call_operand.vmem [shape: f32[1,512], index: 7, kind: input, shape index: {}]   ;;  %s7362_s8 = inlined_call_operand.vmem [shape: f32[1,128], index: 8, kind: input, shape index: {}]   ;;  %s7363_s9 = inlined_call_operand.<no memory space> [shape: f32[1,1], index: 9, kind: input, shape index: {}]   ;;  %s7364_s10 = inlined_call_operand.vmem [shape: f32[8,1], index: 10, kind: output, shape index: {}]  }
   0x1   :  { %v15_v0 = vstv %s7363_s9 }
   0x2   :  { %16 = vst [vmem:[#allocation5] sm:$0x1] %v15_v0 }
   0x3   :  { %17 = vsyncpa [#allocation7], 0 }
   0x4   :  { %18 = vsyncpa [#allocation9], 0 }
   0x5   :  { %19 = vsyncpa [#allocation12], 0  ;;  %s5425_s15 = smov [#allocation8]   ;;  %s5309_s19 = scalar_lea.hbm %s7356_s2, 12288 }
   0x6   :  { %s39_s16 = sshll.u32 %s5425_s15, 4  ;;  %p5310_p0 = scmp.ne.s32.totalorder %s7356_s2, %s5309_s19  ;;  %s40_s16 = int_to_ptr.vmem [resolvable:$true] %s39_s16 }
   0x7   :  { %p5313_p1 = scmp.lt.u32.totalorder %s5309_s19, %s7356_s2 }
   0x9   :  { %p5315_p2 = pnand %p5313_p1, %p5310_p0 }
   0xb   :  { %5318 = shalt.err (!%p5315_p2)
}
   0xc   :  { %s5319_s9 = scalar_lea.vmem %s40_s16, 12288  ;;  %p5324_p4 = scmp.lt.s32.totalorder %s40_s16, %s40_s16 }
   0xd   :  { %p5320_p3 = scmp.ne.s32.totalorder %s40_s16, %s5319_s9  ;;  %p5325_p5 = scmp.lt.s32.totalorder %s5319_s9, %s5319_s9 }
   0xf   :  { %p5326_p6 = por %p5325_p5, %p5324_p4 }
  0x11   :  { %p5327_p7 = pnand %p5326_p6, %p5320_p3 }
  0x13   :  { %5330 = shalt.err (!%p5327_p7)
}
  0x14   :  { %s5426_s24 = smov 256   ;;  %s5427_s25 = smov 16  }
  0x15   :  { %45 = dma.hbm_to_vmem [thread:$0]  %s7356_s2, 12288, %s40_s16, [#allocation9], %s5426_s24, %s5426_s24, %s5427_s25  }
  0x16   :  { %s5428_s28 = smov [#allocation11]   ;;  %s5429_s30 = smov [#allocation6]  }
  0x17   :  { %s65_s29 = sshll.u32 %s5428_s28, 4  ;;  %s27_s11 = sshll.u32 %s5429_s30, 4  ;;  %s66_s29 = int_to_ptr.vmem [resolvable:$true] %s65_s29  ;;  %s28_s11 = int_to_ptr.vmem [resolvable:$true] %s27_s11 }
  0x18   :  { %s5331_s14 = scalar_lea.hbm %s7359_s5, 4096 }
  0x19   :  { %p5332_p8 = scmp.ne.s32.totalorder %s7359_s5, %s5331_s14  ;;  %p5335_p9 = scmp.lt.u32.totalorder %s5331_s14, %s7359_s5 }
  0x1b   :  { %p5337_p10 = pnand %p5335_p9, %p5332_p8 }
  0x1d   :  { %5340 = shalt.err (!%p5337_p10)
}
  0x1e   :  { %s5341_s2 = scalar_lea.vmem %s66_s29, 4096  ;;  %p5346_p12 = scmp.lt.s32.totalorder %s66_s29, %s66_s29 }
  0x1f   :  { %p5342_p11 = scmp.ne.s32.totalorder %s66_s29, %s5341_s2  ;;  %p5347_p13 = scmp.lt.s32.totalorder %s5341_s2, %s5341_s2 }
  0x21   :  { %p5348_p0 = por %p5347_p13, %p5346_p12 }
  0x23   :  { %p5349_p1 = pnand %p5348_p0, %p5342_p11 }
  0x25   :  { %5352 = shalt.err (!%p5349_p1)
}
  0x26   :  { %71 = dma.hbm_to_vmem [thread:$0]  %s7359_s5, 4096, %s66_s29, [#allocation12], %s5426_s24, %s5426_s24, %s5427_s25  }
  0x27   :  { %s5353_s23 = scalar_lea.hbm %s7355_s1, 6144 }
  0x28   :  { %p5354_p2 = scmp.ne.s32.totalorder %s7355_s1, %s5353_s23  ;;  %p5357_p3 = scmp.lt.u32.totalorder %s5353_s23, %s7355_s1 }
  0x2a   :  { %p5359_p4 = pnand %p5357_p3, %p5354_p2 }
  0x2c   :  { %5362 = shalt.err (!%p5359_p4)
}
  0x2d   :  { %s5363_s30 = scalar_lea.vmem %s28_s11, 6144  ;;  %p5368_p6 = scmp.lt.s32.totalorder %s28_s11, %s28_s11 }
  0x2e   :  { %p5364_p5 = scmp.ne.s32.totalorder %s28_s11, %s5363_s30  ;;  %p5369_p7 = scmp.lt.s32.totalorder %s5363_s30, %s5363_s30 }
  0x30   :  { %p5370_p8 = por %p5369_p7, %p5368_p6 }
  0x32   :  { %p5371_p9 = pnand %p5370_p8, %p5364_p5 }
  0x34   :  { %5374 = shalt.err (!%p5371_p9)
}
  0x35   :  { %s5430_s5 = smov 384   ;;  %s5431_s29 = smov 24  }
  0x36   :  { %33 = dma.hbm_to_vmem [thread:$0]  %s7355_s1, 6144, %s28_s11, [#allocation7], %s5430_s5, %s5430_s5, %s5431_s29  }
  0x37   :  { %s5432_s14 = smov [#allocation10]   ;;  %s5433_s17 = smov [#allocation13]  }
  0x38   :  { %s51_s15 = sshll.u32 %s5432_s14, 4  ;;  %s77_s18 = sshll.u32 %s5433_s17, 4  ;;  %s52_s15 = int_to_ptr.vmem [resolvable:$true] %s51_s15  ;;  %s78_s18 = int_to_ptr.vmem [resolvable:$true] %s77_s18 }
  0x39   :  { %s5375_s16 = scalar_lea.hbm %s7357_s3, 4096 }
  0x3a   :  { %p5376_p10 = scmp.ne.s32.totalorder %s7357_s3, %s5375_s16  ;;  %p5379_p11 = scmp.lt.u32.totalorder %s5375_s16, %s7357_s3 }
  0x3c   :  { %p5381_p12 = pnand %p5379_p11, %p5376_p10 }
  0x3e   :  { %5384 = shalt.err (!%p5381_p12)
}
  0x3f   :  { %s5385_s1 = scalar_lea.vmem %s52_s15, 4096  ;;  %p5390_p0 = scmp.lt.s32.totalorder %s52_s15, %s52_s15 }
  0x40   :  { %p5386_p13 = scmp.ne.s32.totalorder %s52_s15, %s5385_s1  ;;  %p5391_p1 = scmp.lt.s32.totalorder %s5385_s1, %s5385_s1 }
  0x42   :  { %p5392_p2 = por %p5391_p1, %p5390_p0 }
  0x44   :  { %p5393_p3 = pnand %p5392_p2, %p5386_p13 }
  0x46   :  { %5396 = shalt.err (!%p5393_p3)
}
  0x47   :  { %57 = dma.hbm_to_vmem [thread:$0]  %s7357_s3, 4096, %s52_s15, [#allocation9], %s5426_s24, %s5426_s24, %s5427_s25  }
  0x48   :  { %s5397_s28 = scalar_lea.hbm %s7360_s6, 4096 }
  0x49   :  { %p5398_p4 = scmp.ne.s32.totalorder %s7360_s6, %s5397_s28  ;;  %p5401_p5 = scmp.lt.u32.totalorder %s5397_s28, %s7360_s6 }
  0x4b   :  { %p5403_p6 = pnand %p5401_p5, %p5398_p4 }
  0x4d   :  { %5406 = shalt.err (!%p5403_p6)
}
  0x4e   :  { %s5407_s13 = scalar_lea.vmem %s78_s18, 4096  ;;  %p5412_p8 = scmp.lt.s32.totalorder %s78_s18, %s78_s18 }
  0x4f   :  { %p5408_p7 = scmp.ne.s32.totalorder %s78_s18, %s5407_s13  ;;  %p5413_p9 = scmp.lt.s32.totalorder %s5407_s13, %s5407_s13 }
  0x51   :  { %p5414_p10 = por %p5413_p9, %p5412_p8 }
  0x53   :  { %p5415_p11 = pnand %p5414_p10, %p5408_p7 }
  0x55   :  { %5418 = shalt.err (!%p5415_p11)
}
  0x56   :  { %83 = dma.hbm_to_vmem [thread:$0]  %s7360_s6, 4096, %s78_s18, [#allocation12], %s5426_s24, %s5426_s24, %s5427_s25  }
  0x57   :  { %5419 = dma.done.wait [#allocation7], 6144  }
  0x58   :  { %5420 = vsyncadd [#allocation7], 4294961152 }
  0x59   :  { %5421 = dma.done.wait [#allocation9], 16384  }
  0x5a   :  { %5422 = vsyncadd [#allocation9], 4294950912 }
  0x5b   :  { %5423 = dma.done.wait [#allocation12], 8192  }
  0x5c   :  { %5424 = vsyncadd [#allocation12], 4294959104  ;;  %v7369_v1 = vmov 0   ;;  %v166_v2 = vld [vmem:[%s7354_s0 + $0x10] sm:$0xff]  ;;  %v164_v3 = vld [vmem:[%s7354_s0] sm:$0xff] }
  0x5d   :  { %4700 = vset.pattern.permute.xlu1 %v7369_v1  ;;  %4699 = vset.pattern.permute.xlu0 %v7369_v1  ;;  %v167_v4 = vld [vmem:[%s7354_s0 + $0x18] sm:$0xff]  ;;  %v165_v5 = vld [vmem:[%s7354_s0 + $0x8] sm:$0xff]  ;;  %v168_v11 = vld [vmem:[%s7354_s0 + $0x20] sm:$0xff] }
  0x5e   :  { %320 = vmatprep.mubr.bf16.mxu0 %v7369_v1  ;;  %179 = vperm.xlu1 %4700, %v166_v2   ;;  %v217_v6 = vld [vmem:[#allocation6 + $0x8] sm:$0xff]  ;;  %v220_v7 = vld [vmem:[#allocation6 + $0x20] sm:$0xff]  ;;  %v219_v9 = vld [vmem:[#allocation6 + $0x18] sm:$0xff] }
  0x5f   :  { %173 = vperm.xlu0 %4699, %v164_v3   ;;  %v216_v8 = vld [vmem:[#allocation6] sm:$0xff]  ;;  %v265_v12 = vpack.c.bf16 %v220_v7, %v217_v6  ;;  %v218_v14 = vld [vmem:[#allocation6 + $0x10] sm:$0xff]  ;;  %v221_v15 = vld [vmem:[#allocation6 + $0x28] sm:$0xff] }
  0x60   :  { %v169_v10 = vld [vmem:[%s7354_s0 + $0x28] sm:$0xff]  ;;  %v264_v13 = vpack.c.bf16 %v219_v9, %v216_v8  ;;  %v223_v16 = vld [vmem:[#allocation6 + $0x38] sm:$0xff]  ;;  %v266_v17 = vpack.c.bf16 %v221_v15, %v218_v14  ;;  %v226_v18 = vld [vmem:[#allocation6 + $0x50] sm:$0xff] }
  0x61   :  { %v222_v19 = vld [vmem:[#allocation6 + $0x30] sm:$0xff]  ;;  %v225_v20 = vld [vmem:[#allocation6 + $0x48] sm:$0xff]  ;;  %288 = vmatprep.subr.bf16.mxu0 %v265_v12  ;;  %v268_v21 = vpack.c.bf16 %v226_v18, %v223_v16  ;;  %v224_v22 = vld [vmem:[#allocation6 + $0x40] sm:$0xff] }
  0x62   :  { %182 = vperm.xlu1 %4700, %v167_v4   ;;  %v227_v23 = vld [vmem:[#allocation6 + $0x58] sm:$0xff]  ;;  %v229_v24 = vld [vmem:[#allocation6 + $0x68] sm:$0xff]  ;;  %289 = vmatpush1.bf16.msra.mxu0 %v264_v13  ;;  %v267_v25 = vpack.c.bf16 %v225_v20, %v222_v19  ;;  %v232_v27 = vld [vmem:[#allocation6 + $0x80] sm:$0xff] }
  0x63   :  { %176 = vperm.xlu0 %4699, %v165_v5   ;;  %4600 = vmatprep.subr.bf16.mxu1 %v266_v17  ;;  %v269_v26 = vpack.c.bf16 %v227_v23, %v224_v22  ;;  %v228_v28 = vld [vmem:[#allocation6 + $0x60] sm:$0xff]  ;;  %v271_v29 = vpack.c.bf16 %v232_v27, %v229_v24  ;;  %v231_v30 = vld [vmem:[#allocation6 + $0x78] sm:$0xff]  ;;  %v230_v31 = vld [vmem:[#allocation6 + $0x70] sm:$0xff] }
  0x64   :  { %4601 = vmatpush3.bf16.msra.mxu1 %v266_v17  ;;  %290 = vmatprep.subr.bf16.mxu0 %v268_v21  ;;  %v233_v32 = vld [vmem:[#allocation6 + $0x88] sm:$0xff]  ;;  %v171_v33 = vld [vmem:[%s7354_s0 + $0x38] sm:$0xff]  ;;  %v236_v38 = vld [vmem:[#allocation6 + $0xa0] sm:$0xff]  ;;  %v270_v40 = vpack.c.bf16 %v231_v30, %v228_v28  ;;  %v106_v21 = vlaneseq }
  0x65   :  { %v235_v34 = vld [vmem:[#allocation6 + $0x98] sm:$0xff]  ;;  %v238_v35 = vld [vmem:[#allocation6 + $0xb0] sm:$0xff]  ;;  %4602 = vmatprep.subr.bf16.mxu1 %v269_v26  ;;  %v272_v37 = vpack.c.bf16 %v233_v32, %v230_v31  ;;  %v237_v43 = vld [vmem:[#allocation6 + $0xa8] sm:$0xff]  ;;  %v5435_v31 = vmov 1.0|1.0  }
  0x66   :  { %188 = vperm.xlu1 %4700, %v169_v10   ;;  %v170_v36 = vld [vmem:[%s7354_s0 + $0x30] sm:$0xff]  ;;  %v239_v39 = vld [vmem:[#allocation6 + $0xb8] sm:$0xff]  ;;  %291 = vmatpush1.bf16.msra.mxu0 %v267_v25  ;;  %v274_v41 = vpack.c.bf16 %v238_v35, %v235_v34  ;;  %v244_v46 = vld [vmem:[#allocation6 + $0xe0] sm:$0xff]  ;;  %v5594_v24 = vand.u32 127, %v106_v21 }
  0x67   :  { %185 = vperm.xlu0 %4699, %v168_v11   ;;  %292 = vmatprep.subr.bf16.mxu0 %v271_v29  ;;  %v234_v42 = vld [vmem:[#allocation6 + $0x90] sm:$0xff]  ;;  %v275_v44 = vpack.c.bf16 %v239_v39, %v236_v38  ;;  %v241_v45 = vld [vmem:[#allocation6 + $0xc8] sm:$0xff]  ;;  %v240_v51 = vld [vmem:[#allocation6 + $0xc0] sm:$0xff] }
  0x68   :  { %4603 = vmatpush3.bf16.msra.mxu1 %v269_v26  ;;  %v242_v47 = vld [vmem:[#allocation6 + $0xd0] sm:$0xff]  ;;  %v245_v48 = vld [vmem:[#allocation6 + $0xe8] sm:$0xff]  ;;  %v273_v49 = vpack.c.bf16 %v237_v43, %v234_v42  ;;  %v277_v50 = vpack.c.bf16 %v244_v46, %v241_v45  ;;  %v243_v52 = vld [vmem:[#allocation6 + $0xd8] sm:$0xff]  ;;  %7468 = vst [vmem:[#allocation17_spill] sm:$0xff] %v5594_v24  ;;  %vm159_vm12 = vcmp.lt.s32.totalorder %v5594_v24, 64 }
  0x69   :  { %4604 = vmatprep.subr.bf16.mxu1 %v272_v37  ;;  %v278_v53 = vpack.c.bf16 %v245_v48, %v242_v47  ;;  %v247_v54 = vld [vmem:[#allocation6 + $0xf8] sm:$0xff]  ;;  %v250_v55 = vld [vmem:[#allocation6 + $0x110] sm:$0xff]  ;;  %v249_v57 = vld [vmem:[#allocation6 + $0x108] sm:$0xff]  ;;  %v276_v60 = vpack.c.bf16 %v243_v52, %v240_v51 }
  0x6a   :  { %194 = vperm.xlu1 %4700, %v171_v33   ;;  %293 = vmatpush1.bf16.msra.mxu0 %v270_v40  ;;  %v246_v56 = vld [vmem:[#allocation6 + $0xf0] sm:$0xff]  ;;  %v248_v58 = vld [vmem:[#allocation6 + $0x100] sm:$0xff]  ;;  %v251_v59 = vld [vmem:[#allocation6 + $0x118] sm:$0xff]  ;;  %v280_v63 = vpack.c.bf16 %v250_v55, %v247_v54 }
  0x6b   :  { %191 = vperm.xlu0 %4699, %v170_v36   ;;  %294 = vmatprep.subr.bf16.mxu0 %v274_v41  ;;  %v253_v61 = vld [vmem:[#allocation6 + $0x128] sm:$0xff]  ;;  %v256_v62 = vld [vmem:[#allocation6 + $0x140] sm:$0xff]  ;;  %v254_v0 = vld [vmem:[#allocation6 + $0x130] sm:$0xff]  ;;  %v281_v3 = vpack.c.bf16 %v251_v59, %v248_v58  ;;  %v279_v6 = vpack.c.bf16 %v249_v57, %v246_v56 }
  0x6c   :  { %4605 = vmatpush3.bf16.msra.mxu1 %v272_v37  ;;  %v257_v2 = vld [vmem:[#allocation6 + $0x148] sm:$0xff]  ;;  %v252_v4 = vld [vmem:[#allocation6 + $0x120] sm:$0xff]  ;;  %v255_v5 = vld [vmem:[#allocation6 + $0x138] sm:$0xff]  ;;  %v283_v9 = vpack.c.bf16 %v256_v62, %v253_v61 }
  0x6d   :  { %4606 = vmatprep.subr.bf16.mxu1 %v275_v44  ;;  %v259_v7 = vld [vmem:[#allocation6 + $0x158] sm:$0xff]  ;;  %v262_v8 = vld [vmem:[#allocation6 + $0x170] sm:$0xff]  ;;  %v260_v10 = vld [vmem:[#allocation6 + $0x160] sm:$0xff]  ;;  %v284_v12 = vpack.c.bf16 %v257_v2, %v254_v0  ;;  %v282_v15 = vpack.c.bf16 %v255_v5, %v252_v4 }
  0x6e   :  { %295 = vmatpush1.bf16.msra.mxu0 %v273_v49  ;;  %v263_v11 = vld [vmem:[#allocation6 + $0x178] sm:$0xff]  ;;  %v258_v13 = vld [vmem:[#allocation6 + $0x150] sm:$0xff]  ;;  %v261_v14 = vld [vmem:[#allocation6 + $0x168] sm:$0xff]  ;;  %v286_v16 = vpack.c.bf16 %v262_v8, %v259_v7 }
  0x6f   :  { %296 = vmatprep.subr.bf16.mxu0 %v277_v50  ;;  %v287_v17 = vpack.c.bf16 %v263_v11, %v260_v10  ;;  %v285_v18 = vpack.c.bf16 %v261_v14, %v258_v13  ;;  %v4703_v19 = vld [vmem:[#allocation8 + $0x4] ss:$16 sps:$4 sm:$0xff]   ;;  %v4706_v20 = vld [vmem:[#allocation8 + $0xc] ss:$16 sps:$4 sm:$0xff]   ;;  %v4701_v28 = vld [vmem:[#allocation8] ss:$16 sps:$4 sm:$0xff]  }
  0x70   :  { %4607 = vmatpush3.bf16.msra.mxu1 %v275_v44  ;;  %v4704_v29 = vld [vmem:[#allocation8 + $0x8] ss:$16 sps:$4 sm:$0xff]   ;;  %v4709_v30 = vld [vmem:[#allocation8 + $0x24] ss:$16 sps:$4 sm:$0xff]   ;;  %v4712_v34 = vld [vmem:[#allocation8 + $0x2c] ss:$16 sps:$4 sm:$0xff]  }
  0x71   :  { %4608 = vmatprep.subr.bf16.mxu1 %v278_v53  ;;  %v4707_v36 = vld [vmem:[#allocation8 + $0x20] ss:$16 sps:$4 sm:$0xff]   ;;  %v4710_v37 = vld [vmem:[#allocation8 + $0x28] ss:$16 sps:$4 sm:$0xff]   ;;  %v4715_v38 = vld [vmem:[#allocation8 + $0x44] ss:$16 sps:$4 sm:$0xff]  }
  0x72   :  { %297 = vmatpush1.bf16.msra.mxu0 %v276_v60  ;;  %v4718_v39 = vld [vmem:[#allocation8 + $0x4c] ss:$16 sps:$4 sm:$0xff]   ;;  %v4713_v43 = vld [vmem:[#allocation8 + $0x40] ss:$16 sps:$4 sm:$0xff]   ;;  %v4716_v44 = vld [vmem:[#allocation8 + $0x48] ss:$16 sps:$4 sm:$0xff]  }
  0x73   :  { %298 = vmatprep.subr.bf16.mxu0 %v280_v63  ;;  %v4721_v45 = vld [vmem:[#allocation8 + $0x64] ss:$16 sps:$4 sm:$0xff]   ;;  %v4724_v46 = vld [vmem:[#allocation8 + $0x6c] ss:$16 sps:$4 sm:$0xff]   ;;  %v4719_v47 = vld [vmem:[#allocation8 + $0x60] ss:$16 sps:$4 sm:$0xff]  }
  0x74   :  { %4609 = vmatpush3.bf16.msra.mxu1 %v278_v53  ;;  %v4722_v48 = vld [vmem:[#allocation8 + $0x68] ss:$16 sps:$4 sm:$0xff]   ;;  %v4727_v49 = vld [vmem:[#allocation8 + $0x84] ss:$16 sps:$4 sm:$0xff]   ;;  %v4730_v50 = vld [vmem:[#allocation8 + $0x8c] ss:$16 sps:$4 sm:$0xff]  }
  0x75   :  { %4610 = vmatprep.subr.bf16.mxu1 %v281_v3  ;;  %v4725_v51 = vld [vmem:[#allocation8 + $0x80] ss:$16 sps:$4 sm:$0xff]   ;;  %v4728_v52 = vld [vmem:[#allocation8 + $0x88] ss:$16 sps:$4 sm:$0xff]   ;;  %v4733_v53 = vld [vmem:[#allocation8 + $0xa4] ss:$16 sps:$4 sm:$0xff]  }
  0x76   :  { %299 = vmatpush1.bf16.msra.mxu0 %v279_v6  ;;  %v4736_v54 = vld [vmem:[#allocation8 + $0xac] ss:$16 sps:$4 sm:$0xff]   ;;  %v4731_v55 = vld [vmem:[#allocation8 + $0xa0] ss:$16 sps:$4 sm:$0xff]   ;;  %v4734_v56 = vld [vmem:[#allocation8 + $0xa8] ss:$16 sps:$4 sm:$0xff]  }
  0x77   :  { %300 = vmatprep.subr.bf16.mxu0 %v283_v9  ;;  %v4739_v57 = vld [vmem:[#allocation8 + $0xc4] ss:$16 sps:$4 sm:$0xff]   ;;  %v4742_v58 = vld [vmem:[#allocation8 + $0xcc] ss:$16 sps:$4 sm:$0xff]   ;;  %v4737_v59 = vld [vmem:[#allocation8 + $0xc0] ss:$16 sps:$4 sm:$0xff]  }
  0x78   :  { %4611 = vmatpush3.bf16.msra.mxu1 %v281_v3  ;;  %v4740_v60 = vld [vmem:[#allocation8 + $0xc8] ss:$16 sps:$4 sm:$0xff]   ;;  %v4745_v61 = vld [vmem:[#allocation8 + $0xe4] ss:$16 sps:$4 sm:$0xff]   ;;  %v4748_v62 = vld [vmem:[#allocation8 + $0xec] ss:$16 sps:$4 sm:$0xff]  }
  0x79   :  { %4612 = vmatprep.subr.bf16.mxu1 %v284_v12  ;;  %v4743_v63 = vld [vmem:[#allocation8 + $0xe0] ss:$16 sps:$4 sm:$0xff]   ;;  %v4746_v0 = vld [vmem:[#allocation8 + $0xe8] ss:$16 sps:$4 sm:$0xff]   ;;  %v4751_v2 = vld [vmem:[#allocation8 + $0x104] ss:$16 sps:$4 sm:$0xff]  }
  0x7a   :  { %301 = vmatpush1.bf16.msra.mxu0 %v282_v15  ;;  %v4754_v3 = vld [vmem:[#allocation8 + $0x10c] ss:$16 sps:$4 sm:$0xff]   ;;  %v4749_v4 = vld [vmem:[#allocation8 + $0x100] ss:$16 sps:$4 sm:$0xff]   ;;  %v4752_v5 = vld [vmem:[#allocation8 + $0x108] ss:$16 sps:$4 sm:$0xff]  }
  0x7b   :  { %302 = vmatprep.subr.bf16.mxu0 %v286_v16  ;;  %v4757_v6 = vld [vmem:[#allocation8 + $0x124] ss:$16 sps:$4 sm:$0xff]   ;;  %v4760_v7 = vld [vmem:[#allocation8 + $0x12c] ss:$16 sps:$4 sm:$0xff]   ;;  %v4755_v8 = vld [vmem:[#allocation8 + $0x120] ss:$16 sps:$4 sm:$0xff]  }
  0x7c   :  { %4613 = vmatpush3.bf16.msra.mxu1 %v284_v12  ;;  %v4758_v9 = vld [vmem:[#allocation8 + $0x128] ss:$16 sps:$4 sm:$0xff]   ;;  %v4763_v10 = vld [vmem:[#allocation8 + $0x144] ss:$16 sps:$4 sm:$0xff]   ;;  %v4766_v11 = vld [vmem:[#allocation8 + $0x14c] ss:$16 sps:$4 sm:$0xff]  }
  0x7d   :  { %4614 = vmatprep.subr.bf16.mxu1 %v287_v17  ;;  %v4761_v12 = vld [vmem:[#allocation8 + $0x140] ss:$16 sps:$4 sm:$0xff]   ;;  %v4764_v13 = vld [vmem:[#allocation8 + $0x148] ss:$16 sps:$4 sm:$0xff]   ;;  %v4769_v14 = vld [vmem:[#allocation8 + $0x164] ss:$16 sps:$4 sm:$0xff]  }
  0x7e   :  { %303 = vmatpush1.bf16.msra.mxu0 %v285_v18  ;;  %v4772_v15 = vld [vmem:[#allocation8 + $0x16c] ss:$16 sps:$4 sm:$0xff]   ;;  %v4767_v16 = vld [vmem:[#allocation8 + $0x160] ss:$16 sps:$4 sm:$0xff]   ;;  %v4775_v18 = vld [vmem:[#allocation8 + $0x184] ss:$16 sps:$4 sm:$0xff]  }
  0x7f   :  { %1084 = vmatprep.subr.bf16.mxu0 %v4703_v19  ;;  %v4778_v19 = vld [vmem:[#allocation8 + $0x18c] ss:$16 sps:$4 sm:$0xff]   ;;  %v4782_v27 = vld [vmem:[#allocation8 + $0x1a8] ss:$16 sps:$4 sm:$0xff]  }
  0x80   :  { %4615 = vmatpush3.bf16.msra.mxu1 %v287_v17  ;;  %v4770_v17 = vld [vmem:[#allocation8 + $0x168] ss:$16 sps:$4 sm:$0xff]  }
  0x81   :  { %1230 = vmatprep.subr.bf16.mxu1 %v4706_v20  ;;  %v4773_v20 = vld [vmem:[#allocation8 + $0x180] ss:$16 sps:$4 sm:$0xff]   ;;  %v4794_v35 = vld [vmem:[#allocation8 + $0x1e8] ss:$16 sps:$4 sm:$0xff]  }
  0xdd   :  { %v180_v22 = vpop.permute.xlu1 %179 }
  0xde   :  { %v174_v23 = vpop.permute.xlu0 %173  ;;  %vm198_vm0 = vcmp.eq.s32.totalorder %v180_v22, %v5594_v24  ;;  %v4776_v22 = vld [vmem:[#allocation8 + $0x188] ss:$16 sps:$4 sm:$0xff]  }
  0xdf   :  { %vm196_vm3 = vcmp.eq.s32.totalorder %v174_v23, %v5594_v24  ;;  %v4781_v23 = vld [vmem:[#allocation8 + $0x1a4] ss:$16 sps:$4 sm:$0xff]  }
  0xe1   :  { %v183_v25 = vpop.permute.xlu1 %182 }
  0xe2   :  { %v177_v26 = vpop.permute.xlu0 %176  ;;  %vm199_vm1 = vcmp.eq.s32.totalorder %v183_v25, %v5594_v24  ;;  %v4784_v25 = vld [vmem:[#allocation8 + $0x1ac] ss:$16 sps:$4 sm:$0xff]  }
  0xe3   :  { %vm197_vm2 = vcmp.eq.s32.totalorder %v177_v26, %v5594_v24  ;;  %vm5600_vm4 = vmpackc.low %vm199_vm1, %vm198_vm0  ;;  %v4779_v26 = vld [vmem:[#allocation8 + $0x1a0] ss:$16 sps:$4 sm:$0xff]   ;;  %vm4314_vm0 = vcmask 7168  }
  0xe4   :  { %vm4330_vm5 = vmpackc.low %vm197_vm2, %vm196_vm3 }
  0xe5   :  { %4331 = vmatmul.mubr.msk.bf16.vlgmr.msra.gmra.mrb[0].mxu0 %vm4330_vm5, %v5435_v31  ;;  %4616 = vmatprep.mubr.msk.bf16.mxu1 %vm4330_vm5, %v5435_v31  ;;  %v189_v32 = vpop.permute.xlu1 %188 }
  0xe6   :  { %v186_v33 = vpop.permute.xlu0 %185  ;;  %vm201_vm6 = vcmp.eq.s32.totalorder %v189_v32, %v5594_v24  ;;  %4617 = vmatmul.mubr.msk.bf16.vlgmr.msra.gmra.mrb[0].mxu1 %vm5600_vm4, %v5435_v31  ;;  %330 = vmatprep.mubr.bf16.mxu0 %v7369_v1  ;;  %v4793_v32 = vld [vmem:[#allocation8 + $0x1e4] ss:$16 sps:$4 sm:$0xff]  }
  0xe7   :  { %vm200_vm7 = vcmp.eq.s32.totalorder %v186_v33, %v5594_v24  ;;  %1085 = vmatpush1.bf16.msra.mxu0 %v4701_v28  ;;  %1231 = vmatpush1.bf16.msra.mxu1 %v4704_v29  ;;  %v4787_v28 = vld [vmem:[#allocation8 + $0x1c4] ss:$16 sps:$4 sm:$0xff]   ;;  %v4790_v29 = vld [vmem:[#allocation8 + $0x1cc] ss:$16 sps:$4 sm:$0xff]  }
  0xe8   :  { %vm5612_vm8 = vmpackc.low %vm201_vm6, %vm200_vm7  ;;  %1086 = vmatprep.subr.bf16.mxu0 %v4709_v30  ;;  %1232 = vmatprep.subr.bf16.mxu1 %v4712_v34  ;;  %v4785_v30 = vld [vmem:[#allocation8 + $0x1c0] ss:$16 sps:$4 sm:$0xff]   ;;  %v4796_v33 = vld [vmem:[#allocation8 + $0x1ec] ss:$16 sps:$4 sm:$0xff]  }
  0xe9   :  { %4620 = vmatprep.mubr.msk.bf16.mxu1 %vm5612_vm8, %v5435_v31  ;;  %v195_v40 = vpop.permute.xlu1 %194  ;;  %v4791_v34 = vld [vmem:[#allocation8 + $0x1e0] ss:$16 sps:$4 sm:$0xff]  }
  0xea   :  { %v192_v41 = vpop.permute.xlu0 %191  ;;  %vm203_vm9 = vcmp.eq.s32.totalorder %v195_v40, %v5594_v24 }
  0xeb   :  { %vm202_vm10 = vcmp.eq.s32.totalorder %v192_v41, %v5594_v24  ;;  %1087 = vmatpush1.bf16.msra.mxu0 %v4707_v36  ;;  %1233 = vmatpush1.bf16.msra.mxu1 %v4710_v37  ;;  %v4799_v36 = vld [vmem:[#allocation8 + $0x204] ss:$16 sps:$4 sm:$0xff]   ;;  %v4802_v37 = vld [vmem:[#allocation8 + $0x20c] ss:$16 sps:$4 sm:$0xff]  }
  0xec   :  { %vm5621_vm11 = vmpackc.low %vm203_vm9, %vm202_vm10  ;;  %1088 = vmatprep.subr.bf16.mxu0 %v4715_v38  ;;  %1234 = vmatprep.subr.bf16.mxu1 %v4718_v39 }
  0xed   :  { %4333 = vmatmul.mubr.msk.bf16.gmra.mrb[4].mxu0 %vm5600_vm4, %v5435_v31 }
  0xee   :  { %4621 = vmatmul.mubr.msk.bf16.gmra.mrb[4].mxu1 %vm5621_vm11, %v5435_v31  ;;  %340 = vmatprep.mubr.bf16.mxu0 %v7369_v1 }
  0xef   :  { %1089 = vmatpush1.bf16.msra.mxu0 %v4713_v43  ;;  %1235 = vmatpush1.bf16.msra.mxu1 %v4716_v44 }
  0xf0   :  { %1090 = vmatprep.subr.bf16.mxu0 %v4721_v45  ;;  %1236 = vmatprep.subr.bf16.mxu1 %v4724_v46 }
  0xf3   :  { %1091 = vmatpush1.bf16.msra.mxu0 %v4719_v47  ;;  %1237 = vmatpush1.bf16.msra.mxu1 %v4722_v48 }
  0xf4   :  { %1092 = vmatprep.subr.bf16.mxu0 %v4727_v49  ;;  %1238 = vmatprep.subr.bf16.mxu1 %v4730_v50  ;;  %v4797_v49 = vld [vmem:[#allocation8 + $0x200] ss:$16 sps:$4 sm:$0xff]   ;;  %v4800_v50 = vld [vmem:[#allocation8 + $0x208] ss:$16 sps:$4 sm:$0xff]  }
  0xf5   :  { %4335 = vmatmul.mubr.msk.bf16.gmra.mrb[8].mxu0 %vm5612_vm8, %v5435_v31 }
  0xf6   :  { %350 = vmatprep.mubr.bf16.mxu0 %v7369_v1 }
  0xf7   :  { %1093 = vmatpush1.bf16.msra.mxu0 %v4725_v51  ;;  %1239 = vmatpush1.bf16.msra.mxu1 %v4728_v52  ;;  %v4805_v52 = vld [vmem:[#allocation8 + $0x224] ss:$16 sps:$4 sm:$0xff]  }
  0xf8   :  { %1094 = vmatprep.subr.bf16.mxu0 %v4733_v53  ;;  %1240 = vmatprep.subr.bf16.mxu1 %v4736_v54  ;;  %v4808_v53 = vld [vmem:[#allocation8 + $0x22c] ss:$16 sps:$4 sm:$0xff]  }
  0xfb   :  { %1095 = vmatpush1.bf16.msra.mxu0 %v4731_v55  ;;  %1241 = vmatpush1.bf16.msra.mxu1 %v4734_v56  ;;  %v4803_v55 = vld [vmem:[#allocation8 + $0x220] ss:$16 sps:$4 sm:$0xff]   ;;  %v4806_v56 = vld [vmem:[#allocation8 + $0x228] ss:$16 sps:$4 sm:$0xff]  }
  0xfc   :  { %1096 = vmatprep.subr.bf16.mxu0 %v4739_v57  ;;  %1242 = vmatprep.subr.bf16.mxu1 %v4742_v58 }
  0xfd   :  { %4337 = vmatmul.mubr.msk.bf16.gmra.mrb[12].mxu0 %vm5621_vm11, %v5435_v31  ;;  %v4788_v31 = vld [vmem:[#allocation8 + $0x1c8] ss:$16 sps:$4 sm:$0xff]  }
  0xff   :  { %1097 = vmatpush1.bf16.msra.mxu0 %v4737_v59  ;;  %1243 = vmatpush1.bf16.msra.mxu1 %v4740_v60  ;;  %v4811_v59 = vld [vmem:[#allocation8 + $0x244] ss:$16 sps:$4 sm:$0xff]   ;;  %v4814_v60 = vld [vmem:[#allocation8 + $0x24c] ss:$16 sps:$4 sm:$0xff]  }
 0x100   :  { %1098 = vmatprep.subr.bf16.mxu0 %v4745_v61  ;;  %1244 = vmatprep.subr.bf16.mxu1 %v4748_v62 }
 0x103   :  { %1099 = vmatpush1.bf16.msra.mxu0 %v4743_v63  ;;  %1245 = vmatpush1.bf16.msra.mxu1 %v4746_v0 }
 0x104   :  { %1100 = vmatprep.subr.bf16.mxu0 %v4751_v2  ;;  %1246 = vmatprep.subr.bf16.mxu1 %v4754_v3 }
 0x107   :  { %1101 = vmatpush1.bf16.msra.mxu0 %v4749_v4  ;;  %1247 = vmatpush1.bf16.msra.mxu1 %v4752_v5 }
 0x108   :  { %1102 = vmatprep.subr.bf16.mxu0 %v4757_v6  ;;  %1248 = vmatprep.subr.bf16.mxu1 %v4760_v7  ;;  %v4809_v6 = vld [vmem:[#allocation8 + $0x240] ss:$16 sps:$4 sm:$0xff]   ;;  %v4812_v7 = vld [vmem:[#allocation8 + $0x248] ss:$16 sps:$4 sm:$0xff]  }
 0x10b   :  { %1103 = vmatpush1.bf16.msra.mxu0 %v4755_v8  ;;  %1249 = vmatpush1.bf16.msra.mxu1 %v4758_v9  ;;  %v4817_v9 = vld [vmem:[#allocation8 + $0x264] ss:$16 sps:$4 sm:$0xff]  }
 0x10c   :  { %1104 = vmatprep.subr.bf16.mxu0 %v4763_v10  ;;  %1250 = vmatprep.subr.bf16.mxu1 %v4766_v11  ;;  %v4820_v10 = vld [vmem:[#allocation8 + $0x26c] ss:$16 sps:$4 sm:$0xff]  }
 0x10f   :  { %1105 = vmatpush1.bf16.msra.mxu0 %v4761_v12  ;;  %1251 = vmatpush1.bf16.msra.mxu1 %v4764_v13  ;;  %v4815_v12 = vld [vmem:[#allocation8 + $0x260] ss:$16 sps:$4 sm:$0xff]   ;;  %v4818_v13 = vld [vmem:[#allocation8 + $0x268] ss:$16 sps:$4 sm:$0xff]  }
 0x110   :  { %1106 = vmatprep.subr.bf16.mxu0 %v4769_v14  ;;  %1252 = vmatprep.subr.bf16.mxu1 %v4772_v15  ;;  %v4823_v15 = vld [vmem:[#allocation8 + $0x284] ss:$16 sps:$4 sm:$0xff]  }
 0x113   :  { %1107 = vmatpush1.bf16.msra.mxu0 %v4767_v16  ;;  %1253 = vmatpush1.bf16.msra.mxu1 %v4770_v17  ;;  %v4826_v16 = vld [vmem:[#allocation8 + $0x28c] ss:$16 sps:$4 sm:$0xff]  }
 0x114   :  { %1108 = vmatprep.subr.bf16.mxu0 %v4775_v18  ;;  %1254 = vmatprep.subr.bf16.mxu1 %v4778_v19 }
 0x117   :  { %1109 = vmatpush1.bf16.msra.mxu0 %v4773_v20  ;;  %1255 = vmatpush1.bf16.msra.mxu1 %v4776_v22  ;;  %v4821_v22 = vld [vmem:[#allocation8 + $0x280] ss:$16 sps:$4 sm:$0xff]  }
 0x118   :  { %1110 = vmatprep.subr.bf16.mxu0 %v4781_v23  ;;  %1256 = vmatprep.subr.bf16.mxu1 %v4784_v25  ;;  %v4824_v23 = vld [vmem:[#allocation8 + $0x288] ss:$16 sps:$4 sm:$0xff]   ;;  %v4829_v25 = vld [vmem:[#allocation8 + $0x2a4] ss:$16 sps:$4 sm:$0xff]  }
 0x11b   :  { %1111 = vmatpush1.bf16.msra.mxu0 %v4779_v26  ;;  %1257 = vmatpush1.bf16.msra.mxu1 %v4782_v27  ;;  %v4832_v26 = vld [vmem:[#allocation8 + $0x2ac] ss:$16 sps:$4 sm:$0xff]  }
 0x11c   :  { %1112 = vmatprep.subr.bf16.mxu0 %v4787_v28  ;;  %1258 = vmatprep.subr.bf16.mxu1 %v4790_v29  ;;  %v4827_v28 = vld [vmem:[#allocation8 + $0x2a0] ss:$16 sps:$4 sm:$0xff]   ;;  %v4830_v29 = vld [vmem:[#allocation8 + $0x2a8] ss:$16 sps:$4 sm:$0xff]  }
 0x11f   :  { %1113 = vmatpush1.bf16.msra.mxu0 %v4785_v30  ;;  %1259 = vmatpush1.bf16.msra.mxu1 %v4788_v31  ;;  %v4835_v31 = vld [vmem:[#allocation8 + $0x2c4] ss:$16 sps:$4 sm:$0xff]  }
 0x120   :  { %1114 = vmatprep.subr.bf16.mxu0 %v4793_v32  ;;  %1260 = vmatprep.subr.bf16.mxu1 %v4796_v33  ;;  %v4838_v32 = vld [vmem:[#allocation8 + $0x2cc] ss:$16 sps:$4 sm:$0xff]  }
 0x123   :  { %1115 = vmatpush1.bf16.msra.mxu0 %v4791_v34  ;;  %1261 = vmatpush1.bf16.msra.mxu1 %v4794_v35 }
 0x124   :  { %1157 = vmatprep.subr.bf16.mxu0 %v4799_v36  ;;  %1303 = vmatprep.subr.bf16.mxu1 %v4802_v37  ;;  %v4833_v37 = vld [vmem:[#allocation8 + $0x2c0] ss:$16 sps:$4 sm:$0xff]  }
 0x1b8   :  { %v322_v38 = vpop.f32.mrb[0].mxu0 }
 0x1b9   :  { %v324_v39 = vpop.f32.mrb[1].mxu0  ;;  %v4618_v40 = vpop.f32.mrb[0].mxu1 }
 0x1ba   :  { %v326_v41 = vpop.f32.mrb[2].mxu0  ;;  %v395_v42 = vpop.f32.mrb[1].mxu1 }
 0x1bb   :  { %v474_v43 = vpack.c.bf16 %v326_v41, %v322_v38  ;;  %v328_v44 = vpop.f32.mrb[3].mxu0  ;;  %v4619_v45 = vpop.f32.mrb[2].mxu1  ;;  %v4836_v38 = vld [vmem:[#allocation8 + $0x2c8] ss:$16 sps:$4 sm:$0xff]   ;;  %v4839_v41 = vld [vmem:[#allocation8 + $0x2e0] ss:$16 sps:$4 sm:$0xff]  }
 0x1bc   :  { %v475_v46 = vpack.c.bf16 %v328_v44, %v324_v39  ;;  %v5639_v47 = vpack.c.bf16 %v4619_v45, %v4618_v40  ;;  %v398_v48 = vpop.f32.mrb[3].mxu1  ;;  %v4841_v39 = vld [vmem:[#allocation8 + $0x2e4] ss:$16 sps:$4 sm:$0xff]   ;;  %v4844_v40 = vld [vmem:[#allocation8 + $0x2ec] ss:$16 sps:$4 sm:$0xff]  }
 0x1bd   :  { %v5641_v51 = vpack.c.bf16 %v398_v48, %v395_v42  ;;  %v4842_v42 = vld [vmem:[#allocation8 + $0x2e8] ss:$16 sps:$4 sm:$0xff]   ;;  %v5649_v44 = vld [vmem:[#allocation10 + $0xc] ss:$16 sps:$4 sm:$0xff]   ;;  %v5653_v45 = vld [vmem:[#allocation10] ss:$16 sps:$4 sm:$0xff]  }
 0x1be   :  { %1116 = vmatprep.mubr.bf16.mxu0 %v475_v46  ;;  %1262 = vmatprep.mubr.bf16.mxu1 %v475_v46  ;;  %7476 = vst [vmem:[#allocation19_spill] sm:$0xff] %v5649_v44  ;;  %v5655_v46 = vld [vmem:[#allocation10 + $0x8] ss:$16 sps:$4 sm:$0xff]   ;;  %v5659_v48 = vld [vmem:[#allocation10 + $0x24] ss:$16 sps:$4 sm:$0xff]  }
 0x1bf   :  { %1117 = vmatmul.mubr.bf16.vlgmr.msra.gmra.mrb[16].mxu0 %v474_v43  ;;  %1263 = vmatmul.mubr.bf16.vlgmr.msra.gmra.mrb[8].mxu1 %v474_v43  ;;  %v5647_v43 = vld [vmem:[#allocation10 + $0x4] ss:$16 sps:$4 sm:$0xff]  }
 0x1c0   :  { %1158 = vmatpush1.bf16.msra.mxu0 %v4797_v49  ;;  %v332_v54 = vpop.f32.mrb[4].mxu0  ;;  %1304 = vmatpush1.bf16.msra.mxu1 %v4800_v50  ;;  %7475 = vst [vmem:[#allocation18_spill] sm:$0xff] %v5647_v43  ;;  %v5661_v49 = vld [vmem:[#allocation10 + $0x2c] ss:$16 sps:$4 sm:$0xff]   ;;  %v5667_v50 = vld [vmem:[#allocation10 + $0x20] ss:$16 sps:$4 sm:$0xff]  }
 0x1c1   :  { %v334_v57 = vpop.f32.mrb[5].mxu0  ;;  %v4622_v58 = vpop.f32.mrb[4].mxu1  ;;  %1159 = vmatprep.subr.bf16.mxu0 %v4805_v52  ;;  %1305 = vmatprep.subr.bf16.mxu1 %v4808_v53  ;;  %v5669_v52 = vld [vmem:[#allocation10 + $0x28] ss:$16 sps:$4 sm:$0xff]   ;;  %v5673_v53 = vld [vmem:[#allocation10 + $0x44] ss:$16 sps:$4 sm:$0xff]  }
 0x1c2   :  { %v336_v61 = vpop.f32.mrb[6].mxu0  ;;  %v411_v62 = vpop.f32.mrb[5].mxu1 }
 0x1c3   :  { %v477_v63 = vpack.c.bf16 %v336_v61, %v332_v54  ;;  %v338_v0 = vpop.f32.mrb[7].mxu0  ;;  %v4623_v2 = vpop.f32.mrb[6].mxu1  ;;  %v5675_v54 = vld [vmem:[#allocation10 + $0x4c] ss:$16 sps:$4 sm:$0xff]  }
 0x1c4   :  { %v478_v3 = vpack.c.bf16 %v338_v0, %v334_v57  ;;  %v5643_v4 = vpack.c.bf16 %v4623_v2, %v4622_v58  ;;  %1160 = vmatpush1.bf16.msra.mxu0 %v4803_v55  ;;  %v414_v5 = vpop.f32.mrb[7].mxu1  ;;  %1306 = vmatpush1.bf16.msra.mxu1 %v4806_v56  ;;  %v5683_v55 = vld [vmem:[#allocation10 + $0x48] ss:$16 sps:$4 sm:$0xff]   ;;  %v5687_v56 = vld [vmem:[#allocation10 + $0x64] ss:$16 sps:$4 sm:$0xff]  }
 0x1c5   :  { %v5645_v8 = vpack.c.bf16 %v414_v5, %v411_v62  ;;  %1161 = vmatprep.subr.bf16.mxu0 %v4811_v59  ;;  %1307 = vmatprep.subr.bf16.mxu1 %v4814_v60  ;;  %v5689_v57 = vld [vmem:[#allocation10 + $0x6c] ss:$16 sps:$4 sm:$0xff]   ;;  %v5695_v58 = vld [vmem:[#allocation10 + $0x60] ss:$16 sps:$4 sm:$0xff]   ;;  %v5697_v59 = vld [vmem:[#allocation10 + $0x68] ss:$16 sps:$4 sm:$0xff]  }
 0x1c6   :  { %1126 = vmatprep.mubr.bf16.mxu0 %v478_v3  ;;  %1272 = vmatprep.mubr.bf16.mxu1 %v478_v3  ;;  %v5701_v60 = vld [vmem:[#allocation10 + $0x84] ss:$16 sps:$4 sm:$0xff]   ;;  %v5703_v61 = vld [vmem:[#allocation10 + $0x8c] ss:$16 sps:$4 sm:$0xff]   ;;  %v5711_v62 = vld [vmem:[#allocation10 + $0x88] ss:$16 sps:$4 sm:$0xff]  }
 0x1c7   :  { %1127 = vmatmul.mubr.bf16.gmra.mrb[20].mxu0 %v477_v63  ;;  %1273 = vmatmul.mubr.bf16.gmra.mrb[12].mxu1 %v477_v63  ;;  %v5715_v63 = vld [vmem:[#allocation10 + $0xa4] ss:$16 sps:$4 sm:$0xff]   ;;  %v5717_v0 = vld [vmem:[#allocation10 + $0xac] ss:$16 sps:$4 sm:$0xff]   ;;  %v5723_v2 = vld [vmem:[#allocation10 + $0xa0] ss:$16 sps:$4 sm:$0xff]  }
 0x1c8   :  { %1162 = vmatpush1.bf16.msra.mxu0 %v4809_v6  ;;  %v342_v11 = vpop.f32.mrb[8].mxu0  ;;  %1308 = vmatpush1.bf16.msra.mxu1 %v4812_v7  ;;  %v5725_v3 = vld [vmem:[#allocation10 + $0xa8] ss:$16 sps:$4 sm:$0xff]   ;;  %v5729_v5 = vld [vmem:[#allocation10 + $0xc4] ss:$16 sps:$4 sm:$0xff]  }
 0x1c9   :  { %v344_v14 = vpop.f32.mrb[9].mxu0  ;;  %1163 = vmatprep.subr.bf16.mxu0 %v4817_v9  ;;  %1309 = vmatprep.subr.bf16.mxu1 %v4820_v10  ;;  %v5731_v6 = vld [vmem:[#allocation10 + $0xcc] ss:$16 sps:$4 sm:$0xff]   ;;  %v5737_v7 = vld [vmem:[#allocation10 + $0xc0] ss:$16 sps:$4 sm:$0xff]  }
 0x1ca   :  { %v346_v17 = vpop.f32.mrb[10].mxu0  ;;  %v5743_v9 = vld [vmem:[#allocation10 + $0xe4] ss:$16 sps:$4 sm:$0xff]   ;;  %v5745_v10 = vld [vmem:[#allocation10 + $0xec] ss:$16 sps:$4 sm:$0xff]  }
 0x1cb   :  { %v480_v18 = vpack.c.bf16 %v346_v17, %v342_v11  ;;  %v348_v19 = vpop.f32.mrb[11].mxu0  ;;  %7477 = vst [vmem:[#allocation20_spill] sm:$0xff] %v5743_v9  ;;  %7478 = vst [vmem:[#allocation21_spill] sm:$0xff] %v5745_v10  ;;  %v5751_v11 = vld [vmem:[#allocation10 + $0xe0] ss:$16 sps:$4 sm:$0xff]  }
 0x1cc   :  { %v481_v20 = vpack.c.bf16 %v348_v19, %v344_v14  ;;  %1164 = vmatpush1.bf16.msra.mxu0 %v4815_v12  ;;  %1310 = vmatpush1.bf16.msra.mxu1 %v4818_v13  ;;  %7479 = vst [vmem:[#allocation22_spill] sm:$0xff] %v5751_v11  ;;  %v5753_v12 = vld [vmem:[#allocation10 + $0xe8] ss:$16 sps:$4 sm:$0xff]  }
 0x1cd   :  { %1165 = vmatprep.subr.bf16.mxu0 %v4823_v15  ;;  %1311 = vmatprep.subr.bf16.mxu1 %v4826_v16  ;;  %7480 = vst [vmem:[#allocation23_spill] sm:$0xff] %v5753_v12  ;;  %v582_v15 = vld [vmem:[%s7358_s4] sm:$0xf] }
 0x1ce   :  { %1136 = vmatprep.mubr.bf16.mxu0 %v481_v20  ;;  %1282 = vmatprep.mubr.bf16.mxu1 %v481_v20 }
 0x1cf   :  { %1137 = vmatmul.mubr.bf16.gmra.mrb[24].mxu0 %v480_v18  ;;  %1283 = vmatmul.mubr.bf16.gmra.mrb[16].mxu1 %v480_v18 }
 0x1d0   :  { %1166 = vmatpush1.bf16.msra.mxu0 %v4821_v22  ;;  %v352_v27 = vpop.f32.mrb[12].mxu0  ;;  %1312 = vmatpush1.bf16.msra.mxu1 %v4824_v23 }
 0x1d1   :  { %v354_v30 = vpop.f32.mrb[13].mxu0  ;;  %1167 = vmatprep.subr.bf16.mxu0 %v4829_v25  ;;  %1313 = vmatprep.subr.bf16.mxu1 %v4832_v26 }
 0x1d2   :  { %v356_v33 = vpop.f32.mrb[14].mxu0 }
 0x1d3   :  { %v483_v34 = vpack.c.bf16 %v356_v33, %v352_v27  ;;  %v358_v35 = vpop.f32.mrb[15].mxu0 }
 0x1d4   :  { %v484_v36 = vpack.c.bf16 %v358_v35, %v354_v30  ;;  %1168 = vmatpush1.bf16.msra.mxu0 %v4827_v28  ;;  %1314 = vmatpush1.bf16.msra.mxu1 %v4830_v29 }
 0x1d5   :  { %1169 = vmatprep.subr.bf16.mxu0 %v4835_v31  ;;  %1315 = vmatprep.subr.bf16.mxu1 %v4838_v32 }
 0x1d6   :  { %1146 = vmatprep.mubr.bf16.mxu0 %v484_v36  ;;  %1292 = vmatprep.mubr.bf16.mxu1 %v484_v36 }
 0x1d7   :  { %1147 = vmatmul.mubr.bf16.gmra.mrb[28].mxu0 %v483_v34  ;;  %1293 = vmatmul.mubr.bf16.gmra.mrb[20].mxu1 %v483_v34 }
 0x1d8   :  { %1170 = vmatpush1.bf16.msra.mxu0 %v4833_v37  ;;  %1316 = vmatpush1.bf16.msra.mxu1 %v4836_v38  ;;  %v109_v37 = vadd.s32 256, %v5594_v24 }
 0x1d9   :  { %1171 = vmatprep.subr.bf16.mxu0 %v4841_v39  ;;  %1317 = vmatprep.subr.bf16.mxu1 %v4844_v40 }
 0x1da   :  { %1189 = vmatprep.mubr.bf16.mxu0 %v7369_v1  ;;  %1335 = vmatprep.mubr.bf16.mxu1 %v7369_v1 }
 0x1dc   :  { %1172 = vmatpush1.bf16.msra.mxu0 %v4839_v41  ;;  %1318 = vmatpush1.bf16.msra.mxu1 %v4842_v42  ;;  %v108_v42 = vadd.s32 128, %v5594_v24 }
 0x1dd   :  { %1724 = vmatprep.subr.bf16.mxu0 %v5647_v43  ;;  %1765 = vmatprep.subr.bf16.mxu1 %v5649_v44 }
 0x1df   :  { %1190 = vmatmul.mubr.bf16.vlgmr.msra.gmra.mrb[16].mxu0 %v5641_v51  ;;  %1336 = vmatmul.mubr.bf16.vlgmr.msra.gmra.mrb[8].mxu1 %v5641_v51  ;;  %v5681_v51 = vld [vmem:[#allocation10 + $0x40] ss:$16 sps:$4 sm:$0xff]  }
 0x1e0   :  { %1725 = vmatpush1.bf16.msra.mxu0 %v5653_v45  ;;  %1766 = vmatpush1.bf16.msra.mxu1 %v5655_v46 }
 0x1e1   :  { %1726 = vmatprep.subr.bf16.mxu0 %v5659_v48  ;;  %1767 = vmatprep.subr.bf16.mxu1 %v5661_v49 }
 0x1e2   :  { %1199 = vmatprep.mubr.bf16.mxu0 %v7369_v1  ;;  %1345 = vmatprep.mubr.bf16.mxu1 %v7369_v1 }
 0x1e4   :  { %1727 = vmatpush1.bf16.msra.mxu0 %v5667_v50  ;;  %1768 = vmatpush1.bf16.msra.mxu1 %v5669_v52 }
 0x1e5   :  { %1728 = vmatprep.subr.bf16.mxu0 %v5673_v53  ;;  %1769 = vmatprep.subr.bf16.mxu1 %v5675_v54 }
 0x1e7   :  { %1200 = vmatmul.mubr.bf16.gmra.mrb[20].mxu0 %v5639_v47  ;;  %1346 = vmatmul.mubr.bf16.gmra.mrb[12].mxu1 %v5639_v47  ;;  %v5709_v47 = vld [vmem:[#allocation10 + $0x80] ss:$16 sps:$4 sm:$0xff]  }
 0x1e8   :  { %1729 = vmatpush1.bf16.msra.mxu0 %v5681_v51  ;;  %1770 = vmatpush1.bf16.msra.mxu1 %v5683_v55 }
 0x1e9   :  { %1730 = vmatprep.subr.bf16.mxu0 %v5687_v56  ;;  %1771 = vmatprep.subr.bf16.mxu1 %v5689_v57 }
 0x1ea   :  { %1209 = vmatprep.mubr.bf16.mxu0 %v7369_v1  ;;  %1355 = vmatprep.mubr.bf16.mxu1 %v7369_v1 }
 0x1ec   :  { %1731 = vmatpush1.bf16.msra.mxu0 %v5695_v58  ;;  %1772 = vmatpush1.bf16.msra.mxu1 %v5697_v59 }
 0x1ed   :  { %1732 = vmatprep.subr.bf16.mxu0 %v5701_v60  ;;  %1773 = vmatprep.subr.bf16.mxu1 %v5703_v61 }
 0x1ef   :  { %1210 = vmatmul.mubr.bf16.gmra.mrb[24].mxu0 %v5645_v8  ;;  %1356 = vmatmul.mubr.bf16.gmra.mrb[16].mxu1 %v5645_v8  ;;  %v5739_v8 = vld [vmem:[#allocation10 + $0xc8] ss:$16 sps:$4 sm:$0xff]  }
 0x1f0   :  { %1733 = vmatpush1.bf16.msra.mxu0 %v5709_v47  ;;  %1774 = vmatpush1.bf16.msra.mxu1 %v5711_v62 }
 0x1f1   :  { %1734 = vmatprep.subr.bf16.mxu0 %v5715_v63  ;;  %1775 = vmatprep.subr.bf16.mxu1 %v5717_v0 }
 0x1f2   :  { %1219 = vmatprep.mubr.bf16.mxu0 %v7369_v1  ;;  %1365 = vmatprep.mubr.bf16.mxu1 %v7369_v1 }
 0x1f4   :  { %1735 = vmatpush1.bf16.msra.mxu0 %v5723_v2  ;;  %1776 = vmatpush1.bf16.msra.mxu1 %v5725_v3 }
 0x1f5   :  { %1736 = vmatprep.subr.bf16.mxu0 %v5729_v5  ;;  %1777 = vmatprep.subr.bf16.mxu1 %v5731_v6 }
 0x1f7   :  { %1220 = vmatmul.mubr.bf16.gmra.mrb[28].mxu0 %v5643_v4  ;;  %1366 = vmatmul.mubr.bf16.gmra.mrb[20].mxu1 %v5643_v4  ;;  %v5800_v4 = vshrl.u32 %v106_v21, 7 }
 0x1f8   :  { %1737 = vmatpush1.bf16.msra.mxu0 %v5737_v7  ;;  %1778 = vmatpush1.bf16.msra.mxu1 %v5739_v8 }
 0x1f9   :  { %1738 = vmatprep.subr.bf16.mxu0 %v5743_v9  ;;  %1779 = vmatprep.subr.bf16.mxu1 %v5745_v10  ;;  %7481 = vst [vmem:[#allocation24_spill] sm:$0xff] %v5800_v4  ;;  %v7368_v13 = vsub.s32 0, %v5800_v4  ;;  %v7367_v14 = vsub.s32 2, %v5800_v4  ;;  %v7366_v16 = vsub.s32 1, %v5800_v4  ;;  %v7365_v17 = vsub.s32 3, %v5800_v4 }
 0x1fa   :  { %1756 = vmatprep.mubr.bf16.mxu0 %v7369_v1  ;;  %1797 = vmatprep.mubr.bf16.mxu1 %v7369_v1 }
 0x1fb   :  { %v5815_v21 = vrot.slane %v582_v15, %v7368_v13  ;;  %v5819_v20 = vrot.slane %v582_v15, %v7367_v14  ;;  %v5827_v25 = vrot.slane %v582_v15, %v7366_v16  ;;  %v5831_v26 = vrot.slane %v582_v15, %v7365_v17 }
 0x1fc   :  { %1739 = vmatpush1.bf16.msra.mxu0 %v5751_v11  ;;  %1780 = vmatpush1.bf16.msra.mxu1 %v5753_v12  ;;  %v110_v15 = vadd.s32 384, %v5594_v24 }
 0x1fd   :  { %1840 = vmatprep.subr.bf16.mxu0 %v5647_v43  ;;  %1881 = vmatprep.subr.bf16.mxu1 %v5649_v44 }
 0x1fe   :  { %v136_v4 = vand.u32 127, %v110_v15 }
 0x1ff   :  { %1757 = vmatmul.mubr.bf16.vlgmr.msra.gmra.mrb[32].mxu0 %v7369_v1  ;;  %1798 = vmatmul.mubr.bf16.vlgmr.msra.gmra.mrb[24].mxu1 %v7369_v1 }
 0x200   :  { %1841 = vmatpush1.bf16.msra.mxu0 %v5653_v45  ;;  %1882 = vmatpush1.bf16.msra.mxu1 %v5655_v46  ;;  %vm5881_vm15 = vcmp.lt.s32.totalorder %v136_v4, 64 }
 0x201   :  { %1842 = vmatprep.subr.bf16.mxu0 %v5659_v48  ;;  %1883 = vmatprep.subr.bf16.mxu1 %v5661_v49 }
 0x202   :  { %1872 = vmatprep.mubr.bf16.mxu0 %v7369_v1  ;;  %1913 = vmatprep.mubr.bf16.mxu1 %v7369_v1  ;;  %v122_v1 = vand.u32 127, %v108_v42 }
 0x204   :  { %1843 = vmatpush1.bf16.msra.mxu0 %v5667_v50  ;;  %1884 = vmatpush1.bf16.msra.mxu1 %v5669_v52  ;;  %vm5877_vm14 = vcmp.lt.s32.totalorder %v122_v1, 64 }
 0x205   :  { %1844 = vmatprep.subr.bf16.mxu0 %v5673_v53  ;;  %1885 = vmatprep.subr.bf16.mxu1 %v5675_v54 }
 0x208   :  { %1845 = vmatpush1.bf16.msra.mxu0 %v5681_v51  ;;  %1886 = vmatpush1.bf16.msra.mxu1 %v5683_v55 }
 0x209   :  { %1846 = vmatprep.subr.bf16.mxu0 %v5687_v56  ;;  %1887 = vmatprep.subr.bf16.mxu1 %v5689_v57 }
 0x20c   :  { %1847 = vmatpush1.bf16.msra.mxu0 %v5695_v58  ;;  %1888 = vmatpush1.bf16.msra.mxu1 %v5697_v59 }
 0x20d   :  { %1848 = vmatprep.subr.bf16.mxu0 %v5701_v60  ;;  %1889 = vmatprep.subr.bf16.mxu1 %v5703_v61 }
 0x210   :  { %1849 = vmatpush1.bf16.msra.mxu0 %v5709_v47  ;;  %1890 = vmatpush1.bf16.msra.mxu1 %v5711_v62 }
 0x211   :  { %1850 = vmatprep.subr.bf16.mxu0 %v5715_v63  ;;  %1891 = vmatprep.subr.bf16.mxu1 %v5717_v0 }
 0x214   :  { %1851 = vmatpush1.bf16.msra.mxu0 %v5723_v2  ;;  %1892 = vmatpush1.bf16.msra.mxu1 %v5725_v3 }
 0x215   :  { %1852 = vmatprep.subr.bf16.mxu0 %v5729_v5  ;;  %1893 = vmatprep.subr.bf16.mxu1 %v5731_v6 }
 0x218   :  { %1853 = vmatpush1.bf16.msra.mxu0 %v5737_v7  ;;  %1894 = vmatpush1.bf16.msra.mxu1 %v5739_v8 }
 0x219   :  { %1854 = vmatprep.subr.bf16.mxu0 %v5743_v9  ;;  %1895 = vmatprep.subr.bf16.mxu1 %v5745_v10 }
 0x21c   :  { %1855 = vmatpush1.bf16.msra.mxu0 %v5751_v11  ;;  %1896 = vmatpush1.bf16.msra.mxu1 %v5753_v12 }
 0x21d   :  { %1957 = vmatprep.subr.bf16.mxu0 %v5647_v43  ;;  %1998 = vmatprep.subr.bf16.mxu1 %v5649_v44 }
 0x2b2   :  { %v5809_v18 = vpop.f32.mrb[16].mxu0  ;;  %v5811_v19 = vpop.f32.mrb[8].mxu1 }
 0x2b3   :  { %v5821_v22 = vpop.f32.mrb[17].mxu0  ;;  %v5823_v23 = vpop.f32.mrb[9].mxu1 }
 0x2b4   :  { %v1195_v27 = vpop.f32.mrb[18].mxu0  ;;  %v1341_v28 = vpop.f32.mrb[10].mxu1 }
 0x2b5   :  { %v5834_v29 = vadd.f32 %v1195_v27, %v5815_v21  ;;  %v5837_v30 = vadd.f32 %v1341_v28, %v5819_v20  ;;  %v1197_v31 = vpop.f32.mrb[19].mxu0  ;;  %v1343_v32 = vpop.f32.mrb[11].mxu1 }
 0x2b6   :  { %v5840_v33 = vadd.f32 %v1197_v31, %v5827_v25  ;;  %v5843_v34 = vadd.f32 %v1343_v32, %v5831_v26 }
 0x2b7   :  { %7482 = vst [vmem:[#allocation25_spill] sm:$0xff] %v5837_v30 }
 0x2b8   :  { %7483 = vst [vmem:[#allocation26_spill] sm:$0xff] %v5840_v33  ;;  %7484 = vst [vmem:[#allocation27_spill] sm:$0xff] %v5843_v34 }
 0x2ba   :  { %v1201_v35 = vpop.f32.mrb[20].mxu0  ;;  %v1347_v36 = vpop.f32.mrb[12].mxu1 }
 0x2bb   :  { %v4628_v38 = vadd.f32 %v1201_v35, %v5815_v21  ;;  %v5848_v39 = vadd.f32 %v1347_v36, %v5819_v20  ;;  %v1203_v40 = vpop.f32.mrb[21].mxu0  ;;  %v1349_v41 = vpop.f32.mrb[13].mxu1 }
 0x2bc   :  { %v5853_v27 = vadd.f32 %v1203_v40, %v5827_v25  ;;  %v5856_v28 = vadd.f32 %v1349_v41, %v5831_v26  ;;  %v1205_v31 = vpop.f32.mrb[22].mxu0  ;;  %v1351_v32 = vpop.f32.mrb[14].mxu1  ;;  %v129_v40 = vand.u32 127, %v109_v37 }
 0x2bd   :  { %v4630_v17 = vadd.f32 %v1205_v31, %v5815_v21  ;;  %v5860_v35 = vadd.f32 %v1351_v32, %v5819_v20  ;;  %v1207_v36 = vpop.f32.mrb[23].mxu0  ;;  %v1353_v16 = vpop.f32.mrb[15].mxu1 }
 0x2be   :  { %7485 = vst [vmem:[#allocation28_spill] sm:$0xff] %v5856_v28  ;;  %v5863_v14 = vadd.f32 %v1207_v36, %v5827_v25  ;;  %v5866_v13 = vadd.f32 %v1353_v16, %v5831_v26  ;;  %vm5869_vm13 = vcmp.lt.s32.totalorder %v129_v40, 64 }
 0x2bf   :  { %7486 = vst [vmem:[#allocation29_spill] sm:$0xff] %v5860_v35 }
 0x2c0   :  { %7487 = vst [vmem:[#allocation30_spill] sm:$0xff] %v5863_v14  ;;  %7488 = vst [vmem:[#allocation31_spill] sm:$0xff] %v5866_v13 }
 0x2c2   :  { %v1211_v41 = vpop.f32.mrb[24].mxu0  ;;  %v1357_v44 = vpop.f32.mrb[16].mxu1 }
 0x2c3   :  { %v4632_v32 = vadd.f32 %v1211_v41, %v5815_v21  ;;  %v5875_v43 = vadd.f32 %v1357_v44, %v5819_v20  ;;  %v1213_v36 = vpop.f32.mrb[25].mxu0  ;;  %v1359_v12 = vpop.f32.mrb[17].mxu1 }
 0x2c4   :  { %v5886_v42 = vadd.f32 %v1213_v36, %v5827_v25  ;;  %v5889_v15 = vadd.f32 %v1359_v12, %v5831_v26  ;;  %v1215_v40 = vpop.f32.mrb[26].mxu0  ;;  %v1361_v41 = vpop.f32.mrb[18].mxu1 }
 0x2c5   :  { %7491 = vst [vmem:[#allocation32_spill] sm:$0xff] %v5875_v43  ;;  %v4634_v44 = vadd.f32 %v1215_v40, %v5815_v21  ;;  %v5893_v11 = vadd.f32 %v1361_v41, %v5819_v20  ;;  %v1217_v1 = vpop.f32.mrb[27].mxu0  ;;  %v1363_v10 = vpop.f32.mrb[19].mxu1  ;;  %v5897_v4 = vsel %vm159_vm12, %v4630_v17, %v4632_v32 }
 0x2c6   :  { %7496 = vst [vmem:[#allocation33_spill] sm:$0xff] %v5886_v42  ;;  %7497 = vst [vmem:[#allocation34_spill] sm:$0xff] %v5889_v15  ;;  %v5904_v12 = vadd.f32 %v1217_v1, %v5827_v25  ;;  %v5907_v9 = vadd.f32 %v1363_v10, %v5831_v26  ;;  %v5927_v1 = vsel %vm159_vm12, %v4632_v32, %v4630_v17 }
 0x2c7   :  { %7498 = vst [vmem:[#allocation35_spill] sm:$0xff] %v5897_v4  ;;  %v5919_v4 = vsel %vm159_vm12, %v4628_v38, %v4634_v44  ;;  %7501 = vst [vmem:[#allocation38_spill] sm:$0xff] %v5927_v1  ;;  %v5951_v40 = vsel %vm159_vm12, %v4634_v44, %v4628_v38  ;;  %v4624_v38 = vadd.f32 %v5809_v18, %v5815_v21 }
 0x2c8   :  { %7499 = vst [vmem:[#allocation36_spill] sm:$0xff] %v5904_v12  ;;  %7500 = vst [vmem:[#allocation37_spill] sm:$0xff] %v5907_v9  ;;  %v5969_v44 = vadd.f32 %v5811_v19, %v5819_v20  ;;  %v5977_v15 = vadd.f32 %v5821_v22, %v5827_v25  ;;  %v5981_v17 = vadd.f32 %v5823_v23, %v5831_v26 }
 0x2c9   :  { %7502 = vst [vmem:[#allocation39_spill] sm:$0xff] %v5951_v40 }
 0x2ca   :  { %v1221_v32 = vpop.f32.mrb[28].mxu0  ;;  %v1367_v10 = vpop.f32.mrb[20].mxu1  ;;  %7503 = vst [vmem:[#allocation40_spill] sm:$0xff] %v5969_v44  ;;  %7505 = vst [vmem:[#allocation42_spill] sm:$0xff] %v5977_v15 }
 0x2cb   :  { %v4636_v41 = vadd.f32 %v1221_v32, %v5815_v21  ;;  %v5973_v40 = vadd.f32 %v1367_v10, %v5819_v20  ;;  %v1223_v36 = vpop.f32.mrb[29].mxu0  ;;  %v1369_v1 = vpop.f32.mrb[21].mxu1  ;;  %7506 = vst [vmem:[#allocation43_spill] sm:$0xff] %v5981_v17 }
 0x2cc   :  { %v5984_v18 = vadd.f32 %v1223_v36, %v5827_v25  ;;  %v5987_v19 = vadd.f32 %v1369_v1, %v5831_v26  ;;  %v1225_v32 = vpop.f32.mrb[30].mxu0  ;;  %v1371_v13 = vpop.f32.mrb[22].mxu1 }
 0x2cd   :  { %7504 = vst [vmem:[#allocation41_spill] sm:$0xff] %v5973_v40  ;;  %v4638_v10 = vadd.f32 %v1225_v32, %v5815_v21  ;;  %v5991_v42 = vadd.f32 %v1371_v13, %v5819_v20  ;;  %v1227_v14 = vpop.f32.mrb[31].mxu0  ;;  %v1373_v22 = vpop.f32.mrb[23].mxu1  ;;  %v5996_v23 = vsel %vm159_vm12, %v5834_v29, %v4636_v41 }
 0x2ce   :  { %7507 = vst [vmem:[#allocation44_spill] sm:$0xff] %v5984_v18  ;;  %7508 = vst [vmem:[#allocation45_spill] sm:$0xff] %v5987_v19  ;;  %v6003_v1 = vadd.f32 %v1227_v14, %v5827_v25  ;;  %v6006_v21 = vadd.f32 %v1373_v22, %v5831_v26  ;;  %v6025_v25 = vsel %vm159_vm12, %v4636_v41, %v5834_v29 }
 0x2cf   :  { %7509 = vst [vmem:[#allocation46_spill] sm:$0xff] %v5991_v42  ;;  %v1422_v32 = vsel %vm159_vm12, %v4624_v38, %v4638_v10  ;;  %v1424_v14 = vsel %vm5869_vm13, %v5969_v44, %v5991_v42  ;;  %7512 = vst [vmem:[#allocation49_spill] sm:$0xff] %v6025_v25  ;;  %v6049_v26 = vsel %vm159_vm12, %v4638_v10, %v4624_v38 }
 0x2d0   :  { %7510 = vst [vmem:[#allocation47_spill] sm:$0xff] %v6003_v1  ;;  %7511 = vst [vmem:[#allocation48_spill] sm:$0xff] %v6006_v21  ;;  %v1423_v22 = vsel %vm5877_vm14, %v5977_v15, %v6003_v1  ;;  %v1425_v20 = vsel %vm5881_vm15, %v5981_v17, %v6006_v21 }
 0x2d1   :  { %7513 = vst [vmem:[#allocation50_spill] sm:$0xff] %v6049_v26 }
 0x2d2   :  { %v1758_v41 = vpop.f32.mrb[32].mxu0  ;;  %v1799_v25 = vpop.f32.mrb[24].mxu1 }
 0x2d3   :  { %v1806_v24 = vadd.f32 %v1758_v41, %v1422_v32  ;;  %v1808_v38 = vadd.f32 %v1799_v25, %v1424_v14  ;;  %v1760_v10 = vpop.f32.mrb[33].mxu0  ;;  %v1801_v26 = vpop.f32.mrb[25].mxu1  ;;  %v7521_v41 = vld [vmem:[#allocation19_spill] sm:$0xff] }
 0x2d4   :  { %v1807_v43 = vadd.f32 %v1760_v10, %v1423_v22  ;;  %v1809_v35 = vadd.f32 %v1801_v26, %v1425_v20  ;;  %v1762_v9 = vpop.f32.mrb[34].mxu0  ;;  %v1803_v13 = vpop.f32.mrb[26].mxu1  ;;  %v7518_v26 = vld [vmem:[#allocation22_spill] sm:$0xff]  ;;  %v7519_v22 = vld [vmem:[#allocation23_spill] sm:$0xff] }
 0x2d5   :  { %v4474_v44 = vmul.f32 -1.442695, %v1806_v24  ;;  %v1763_v42 = vpop.f32.mrb[35].mxu0  ;;  %v1804_v28 = vpop.f32.mrb[27].mxu1  ;;  %v4476_v36 = vmul.f32 -1.442695, %v1808_v38 }
 0x2d6   :  { %v4475_v12 = vmul.f32 -1.442695, %v1807_v43 }
 0x2d7   :  { %4989 = vpow2.f32 %v4474_v44  ;;  %v7515_v44 = vmov 0  }
 0x2d8   :  { %4991 = vpow2.f32 %v4475_v12 }
 0x2d9   :  { %4993 = vtanh.f32 %v1809_v35 }
 0x2da   :  { %4995 = vpow2.f32 %v4476_v36  ;;  %v7516_v36 = vld [vmem:[#allocation20_spill] sm:$0xff] }
 0x2e1   :  { %v4990_v15 = vpop.eup %4989 }
 0x2e2   :  { %v1819_v1 = vadd.f32 1.0, %v4990_v15  ;;  %v4992_v29 = vpop.eup %4991 }
 0x2e3   :  { %v1820_v32 = vadd.f32 1.0, %v4992_v29  ;;  %v4994_v14 = vpop.eup %4993  ;;  %v7520_v29 = vld [vmem:[#allocation18_spill] sm:$0xff] }
 0x2e4   :  { %4997 = vrcp.f32 %v1819_v1  ;;  %v4996_v25 = vpop.eup %4995  ;;  %v7517_v1 = vld [vmem:[#allocation21_spill] sm:$0xff] }
 0x2e5   :  { %4999 = vrcp.f32 %v1820_v32  ;;  %v1821_v24 = vadd.f32 1.0, %v4996_v25 }
 0x2e7   :  { %5001 = vrcp.f32 %v1821_v24 }
 0x2ee   :  { %v4998_v20 = vpop.eup %4997 }
 0x2ef   :  { %v1830_v9 = vmul.f32 %v4998_v20, %v4994_v14  ;;  %v5000_v13 = vpop.eup %4999  ;;  %v7522_v14 = vsel %vm5869_vm13, %v5837_v30, %v5973_v40 }
 0x2f0   :  { %v1829_v42 = vmul.f32 0.0, %v5000_v13  ;;  %v7523_v13 = vsel %vm5877_vm14, %v5840_v33, %v5984_v18 }
 0x2f1   :  { %v5002_v43 = vpop.eup %5001 }
 0x2f2   :  { %v6063_v28 = vadd.f32 %v1830_v9, %v1829_v42  ;;  %v7524_v42 = vsel %vm5881_vm15, %v5843_v34, %v5987_v19 }
 0x2f4   :  { %5003 = vtanh.f32 %v6063_v28 }
 0x2fe   :  { %v5004_v15 = vpop.eup %5003 }
 0x2ff   :  { %v6066_v35 = vmul.f32 %v5004_v15, %v5002_v43 }
 0x301   :  { %7514 = vst [vmem:[#allocation51_spill] sm:$0xff] %v6066_v35  ;;  %v1839_v12 = vpack.c.bf16 %v6066_v35, %v6066_v35 }
 0x303   :  { %1873 = vmatmul.mubr.bf16.vlgmr.msra.gmra.mrb[36].mxu0 %v1839_v12  ;;  %1914 = vmatmul.mubr.bf16.vlgmr.msra.gmra.mrb[28].mxu1 %v1839_v12 }
 0x304   :  { %1958 = vmatpush1.bf16.msra.mxu0 %v5653_v45  ;;  %1999 = vmatpush1.bf16.msra.mxu1 %v5655_v46 }
 0x305   :  { %1959 = vmatprep.subr.bf16.mxu0 %v5659_v48  ;;  %2000 = vmatprep.subr.bf16.mxu1 %v5661_v49 }
 0x306   :  { %1989 = vmatprep.mubr.bf16.mxu0 %v7515_v44  ;;  %2030 = vmatprep.mubr.bf16.mxu1 %v7515_v44 }
 0x308   :  { %1960 = vmatpush1.bf16.msra.mxu0 %v5667_v50  ;;  %2001 = vmatpush1.bf16.msra.mxu1 %v5669_v52 }
 0x309   :  { %1961 = vmatprep.subr.bf16.mxu0 %v5673_v53  ;;  %2002 = vmatprep.subr.bf16.mxu1 %v5675_v54 }
 0x30c   :  { %1962 = vmatpush1.bf16.msra.mxu0 %v5681_v51  ;;  %2003 = vmatpush1.bf16.msra.mxu1 %v5683_v55 }
 0x30d   :  { %1963 = vmatprep.subr.bf16.mxu0 %v5687_v56  ;;  %2004 = vmatprep.subr.bf16.mxu1 %v5689_v57 }
 0x310   :  { %1964 = vmatpush1.bf16.msra.mxu0 %v5695_v58  ;;  %2005 = vmatpush1.bf16.msra.mxu1 %v5697_v59 }
 0x311   :  { %1965 = vmatprep.subr.bf16.mxu0 %v5701_v60  ;;  %2006 = vmatprep.subr.bf16.mxu1 %v5703_v61 }
 0x314   :  { %1966 = vmatpush1.bf16.msra.mxu0 %v5709_v47  ;;  %2007 = vmatpush1.bf16.msra.mxu1 %v5711_v62 }
 0x315   :  { %1967 = vmatprep.subr.bf16.mxu0 %v5715_v63  ;;  %2008 = vmatprep.subr.bf16.mxu1 %v5717_v0 }
 0x318   :  { %1968 = vmatpush1.bf16.msra.mxu0 %v5723_v2  ;;  %2009 = vmatpush1.bf16.msra.mxu1 %v5725_v3 }
 0x319   :  { %1969 = vmatprep.subr.bf16.mxu0 %v5729_v5  ;;  %2010 = vmatprep.subr.bf16.mxu1 %v5731_v6 }
 0x31c   :  { %1970 = vmatpush1.bf16.msra.mxu0 %v5737_v7  ;;  %2011 = vmatpush1.bf16.msra.mxu1 %v5739_v8 }
 0x31d   :  { %1971 = vmatprep.subr.bf16.mxu0 %v7516_v36  ;;  %2012 = vmatprep.subr.bf16.mxu1 %v7517_v1 }
 0x320   :  { %1972 = vmatpush1.bf16.msra.mxu0 %v7518_v26  ;;  %2013 = vmatpush1.bf16.msra.mxu1 %v7519_v22 }
 0x321   :  { %2074 = vmatprep.subr.bf16.mxu0 %v7520_v29  ;;  %2115 = vmatprep.subr.bf16.mxu1 %v7521_v41 }
 0x3d6   :  { %v1874_v38 = vpop.f32.mrb[36].mxu0  ;;  %v1915_v10 = vpop.f32.mrb[28].mxu1 }
 0x3d7   :  { %v1922_v32 = vadd.f32 %v1874_v38, %v5996_v23  ;;  %v1924_v25 = vadd.f32 %v1915_v10, %v7522_v14  ;;  %v1876_v20 = vpop.f32.mrb[37].mxu0  ;;  %v1917_v9 = vpop.f32.mrb[29].mxu1 }
 0x3d8   :  { %v1923_v24 = vadd.f32 %v1876_v20, %v7523_v13  ;;  %v1925_v23 = vadd.f32 %v1917_v9, %v7524_v42  ;;  %v1878_v43 = vpop.f32.mrb[38].mxu0  ;;  %v1919_v15 = vpop.f32.mrb[30].mxu1 }
 0x3d9   :  { %v4477_v12 = vmul.f32 -1.442695, %v1922_v32  ;;  %v1879_v38 = vpop.f32.mrb[39].mxu0  ;;  %v1920_v35 = vpop.f32.mrb[31].mxu1  ;;  %v4479_v14 = vmul.f32 -1.442695, %v1924_v25  ;;  %v7526_v15 = vsel %vm5869_vm13, %v5848_v39, %v5893_v11 }
 0x3da   :  { %v4478_v10 = vmul.f32 -1.442695, %v1923_v24 }
 0x3db   :  { %5005 = vpow2.f32 %v4477_v12 }
 0x3dc   :  { %5007 = vpow2.f32 %v4478_v10 }
 0x3dd   :  { %5009 = vtanh.f32 %v1925_v23 }
 0x3de   :  { %5011 = vpow2.f32 %v4479_v14  ;;  %v7527_v14 = vld [vmem:[#allocation36_spill] sm:$0xff] }
 0x3e5   :  { %v5006_v17 = vpop.eup %5005 }
 0x3e6   :  { %v1935_v21 = vadd.f32 1.0, %v5006_v17  ;;  %v5008_v33 = vpop.eup %5007 }
 0x3e7   :  { %v1936_v20 = vadd.f32 1.0, %v5008_v33  ;;  %v5010_v13 = vpop.eup %5009 }
 0x3e8   :  { %5013 = vrcp.f32 %v1935_v21  ;;  %v5012_v34 = vpop.eup %5011 }
 0x3e9   :  { %5015 = vrcp.f32 %v1936_v20  ;;  %v1937_v32 = vadd.f32 1.0, %v5012_v34  ;;  %v7528_v20 = vsel %vm5877_vm14, %v5853_v27, %v7527_v14 }
 0x3eb   :  { %5017 = vrcp.f32 %v1937_v32 }
 0x3f2   :  { %v5014_v9 = vpop.eup %5013 }
 0x3f3   :  { %v1946_v42 = vmul.f32 %v5014_v9, %v5010_v13  ;;  %v5016_v43 = vpop.eup %5015  ;;  %v7529_v9 = vld [vmem:[#allocation28_spill] sm:$0xff] }
 0x3f4   :  { %v1945_v35 = vmul.f32 %v5016_v43, %v6063_v28 }
 0x3f5   :  { %v5018_v17 = vpop.eup %5017 }
 0x3f6   :  { %v6121_v24 = vadd.f32 %v1946_v42, %v1945_v35  ;;  %v7530_v42 = vld [vmem:[#allocation37_spill] sm:$0xff] }
 0x3f7   :  { %v7531_v43 = vsel %vm5881_vm15, %v7529_v9, %v7530_v42 }
 0x3f8   :  { %5019 = vtanh.f32 %v6121_v24 }
 0x402   :  { %v5020_v25 = vpop.eup %5019 }
 0x403   :  { %v6124_v23 = vmul.f32 %v5020_v25, %v5018_v17 }
 0x405   :  { %7525 = vst [vmem:[#allocation20_spill] sm:$0xff] %v6124_v23  ;;  %v1956_v33 = vpack.c.bf16 %v6124_v23, %v6124_v23 }
 0x407   :  { %1990 = vmatmul.mubr.bf16.vlgmr.msra.gmra.mrb[40].mxu0 %v1956_v33  ;;  %2031 = vmatmul.mubr.bf16.vlgmr.msra.gmra.mrb[32].mxu1 %v1956_v33 }
 0x408   :  { %2075 = vmatpush1.bf16.msra.mxu0 %v5653_v45  ;;  %2116 = vmatpush1.bf16.msra.mxu1 %v5655_v46 }
 0x409   :  { %2076 = vmatprep.subr.bf16.mxu0 %v5659_v48  ;;  %2117 = vmatprep.subr.bf16.mxu1 %v5661_v49 }
 0x40a   :  { %2106 = vmatprep.mubr.bf16.mxu0 %v7515_v44  ;;  %2147 = vmatprep.mubr.bf16.mxu1 %v7515_v44 }
 0x40c   :  { %2077 = vmatpush1.bf16.msra.mxu0 %v5667_v50  ;;  %2118 = vmatpush1.bf16.msra.mxu1 %v5669_v52 }
 0x40d   :  { %2078 = vmatprep.subr.bf16.mxu0 %v5673_v53  ;;  %2119 = vmatprep.subr.bf16.mxu1 %v5675_v54 }
 0x410   :  { %2079 = vmatpush1.bf16.msra.mxu0 %v5681_v51  ;;  %2120 = vmatpush1.bf16.msra.mxu1 %v5683_v55 }
 0x411   :  { %2080 = vmatprep.subr.bf16.mxu0 %v5687_v56  ;;  %2121 = vmatprep.subr.bf16.mxu1 %v5689_v57 }
 0x414   :  { %2081 = vmatpush1.bf16.msra.mxu0 %v5695_v58  ;;  %2122 = vmatpush1.bf16.msra.mxu1 %v5697_v59 }
 0x415   :  { %2082 = vmatprep.subr.bf16.mxu0 %v5701_v60  ;;  %2123 = vmatprep.subr.bf16.mxu1 %v5703_v61 }
 0x418   :  { %2083 = vmatpush1.bf16.msra.mxu0 %v5709_v47  ;;  %2124 = vmatpush1.bf16.msra.mxu1 %v5711_v62 }
 0x419   :  { %2084 = vmatprep.subr.bf16.mxu0 %v5715_v63  ;;  %2125 = vmatprep.subr.bf16.mxu1 %v5717_v0 }
 0x41c   :  { %2085 = vmatpush1.bf16.msra.mxu0 %v5723_v2  ;;  %2126 = vmatpush1.bf16.msra.mxu1 %v5725_v3 }
 0x41d   :  { %2086 = vmatprep.subr.bf16.mxu0 %v5729_v5  ;;  %2127 = vmatprep.subr.bf16.mxu1 %v5731_v6 }
 0x420   :  { %2087 = vmatpush1.bf16.msra.mxu0 %v5737_v7  ;;  %2128 = vmatpush1.bf16.msra.mxu1 %v5739_v8 }
 0x421   :  { %2088 = vmatprep.subr.bf16.mxu0 %v7516_v36  ;;  %2129 = vmatprep.subr.bf16.mxu1 %v7517_v1 }
 0x424   :  { %2089 = vmatpush1.bf16.msra.mxu0 %v7518_v26  ;;  %2130 = vmatpush1.bf16.msra.mxu1 %v7519_v22 }
 0x425   :  { %2191 = vmatprep.subr.bf16.mxu0 %v7520_v29  ;;  %2232 = vmatprep.subr.bf16.mxu1 %v7521_v41 }
 0x4da   :  { %v1991_v34 = vpop.f32.mrb[40].mxu0  ;;  %v2032_v21 = vpop.f32.mrb[32].mxu1 }
 0x4db   :  { %v2039_v28 = vadd.f32 %v1991_v34, %v5919_v4  ;;  %v2041_v12 = vadd.f32 %v2032_v21, %v7526_v15  ;;  %v1993_v38 = vpop.f32.mrb[41].mxu0  ;;  %v2034_v10 = vpop.f32.mrb[33].mxu1 }
 0x4dc   :  { %v2040_v13 = vadd.f32 %v1993_v38, %v7528_v20  ;;  %v2042_v4 = vadd.f32 %v2034_v10, %v7531_v43  ;;  %v1995_v32 = vpop.f32.mrb[42].mxu0  ;;  %v2036_v35 = vpop.f32.mrb[34].mxu1 }
 0x4dd   :  { %v4480_v17 = vmul.f32 -1.442695, %v2039_v28  ;;  %v1996_v25 = vpop.f32.mrb[43].mxu0  ;;  %v2037_v33 = vpop.f32.mrb[35].mxu1  ;;  %v4482_v21 = vmul.f32 -1.442695, %v2041_v12 }
 0x4de   :  { %v4481_v34 = vmul.f32 -1.442695, %v2040_v13  ;;  %v7534_v33 = vld [vmem:[#allocation29_spill] sm:$0xff] }
 0x4df   :  { %5021 = vpow2.f32 %v4480_v17 }
 0x4e0   :  { %5023 = vpow2.f32 %v4481_v34  ;;  %v7535_v34 = vld [vmem:[#allocation32_spill] sm:$0xff] }
 0x4e1   :  { %5025 = vtanh.f32 %v2042_v4 }
 0x4e2   :  { %5027 = vpow2.f32 %v4482_v21  ;;  %v7536_v21 = vsel %vm5869_vm13, %v7534_v33, %v7535_v34 }
 0x4e9   :  { %v5022_v15 = vpop.eup %5021 }
 0x4ea   :  { %v2052_v23 = vadd.f32 1.0, %v5022_v15  ;;  %v5024_v19 = vpop.eup %5023 }
 0x4eb   :  { %v2053_v38 = vadd.f32 1.0, %v5024_v19  ;;  %v5026_v20 = vpop.eup %5025 }
 0x4ec   :  { %5029 = vrcp.f32 %v2052_v23  ;;  %v5028_v18 = vpop.eup %5027  ;;  %v7533_v23 = vld [vmem:[#allocation35_spill] sm:$0xff] }
 0x4ed   :  { %5031 = vrcp.f32 %v2053_v38  ;;  %v2054_v28 = vadd.f32 1.0, %v5028_v18 }
 0x4ef   :  { %5033 = vrcp.f32 %v2054_v28  ;;  %v7541_v28 = vld [vmem:[#allocation34_spill] sm:$0xff] }
 0x4f6   :  { %v5030_v10 = vpop.eup %5029 }
 0x4f7   :  { %v2063_v43 = vmul.f32 %v5030_v10, %v5026_v20  ;;  %v5032_v32 = vpop.eup %5031  ;;  %v7537_v10 = vld [vmem:[#allocation30_spill] sm:$0xff] }
 0x4f8   :  { %v2062_v35 = vmul.f32 %v5032_v32, %v6121_v24 }
 0x4f9   :  { %v5034_v12 = vpop.eup %5033 }
 0x4fa   :  { %v6179_v13 = vadd.f32 %v2063_v43, %v2062_v35  ;;  %v7538_v43 = vld [vmem:[#allocation33_spill] sm:$0xff] }
 0x4fb   :  { %v7539_v32 = vsel %vm5877_vm14, %v7537_v10, %v7538_v43 }
 0x4fc   :  { %5035 = vtanh.f32 %v6179_v13 }
 0x506   :  { %v5036_v4 = vpop.eup %5035 }
 0x507   :  { %v6182_v17 = vmul.f32 %v5036_v4, %v5034_v12 }
 0x509   :  { %7532 = vst [vmem:[#allocation21_spill] sm:$0xff] %v6182_v17  ;;  %v2073_v19 = vpack.c.bf16 %v6182_v17, %v6182_v17 }
 0x50b   :  { %2107 = vmatmul.mubr.bf16.vlgmr.msra.gmra.mrb[44].mxu0 %v2073_v19  ;;  %2148 = vmatmul.mubr.bf16.vlgmr.msra.gmra.mrb[36].mxu1 %v2073_v19 }
 0x50c   :  { %2192 = vmatpush1.bf16.msra.mxu0 %v5653_v45  ;;  %2233 = vmatpush1.bf16.msra.mxu1 %v5655_v46 }
 0x50d   :  { %2193 = vmatprep.subr.bf16.mxu0 %v5659_v48  ;;  %2234 = vmatprep.subr.bf16.mxu1 %v5661_v49 }
 0x50e   :  { %2223 = vmatprep.mubr.bf16.mxu0 %v7515_v44  ;;  %2264 = vmatprep.mubr.bf16.mxu1 %v7515_v44 }
 0x510   :  { %2194 = vmatpush1.bf16.msra.mxu0 %v5667_v50  ;;  %2235 = vmatpush1.bf16.msra.mxu1 %v5669_v52 }
 0x511   :  { %2195 = vmatprep.subr.bf16.mxu0 %v5673_v53  ;;  %2236 = vmatprep.subr.bf16.mxu1 %v5675_v54 }
 0x514   :  { %2196 = vmatpush1.bf16.msra.mxu0 %v5681_v51  ;;  %2237 = vmatpush1.bf16.msra.mxu1 %v5683_v55 }
 0x515   :  { %2197 = vmatprep.subr.bf16.mxu0 %v5687_v56  ;;  %2238 = vmatprep.subr.bf16.mxu1 %v5689_v57 }
 0x518   :  { %2198 = vmatpush1.bf16.msra.mxu0 %v5695_v58  ;;  %2239 = vmatpush1.bf16.msra.mxu1 %v5697_v59 }
 0x519   :  { %2199 = vmatprep.subr.bf16.mxu0 %v5701_v60  ;;  %2240 = vmatprep.subr.bf16.mxu1 %v5703_v61 }
 0x51c   :  { %2200 = vmatpush1.bf16.msra.mxu0 %v5709_v47  ;;  %2241 = vmatpush1.bf16.msra.mxu1 %v5711_v62 }
 0x51d   :  { %2201 = vmatprep.subr.bf16.mxu0 %v5715_v63  ;;  %2242 = vmatprep.subr.bf16.mxu1 %v5717_v0 }
 0x520   :  { %2202 = vmatpush1.bf16.msra.mxu0 %v5723_v2  ;;  %2243 = vmatpush1.bf16.msra.mxu1 %v5725_v3 }
 0x521   :  { %2203 = vmatprep.subr.bf16.mxu0 %v5729_v5  ;;  %2244 = vmatprep.subr.bf16.mxu1 %v5731_v6 }
 0x524   :  { %2204 = vmatpush1.bf16.msra.mxu0 %v5737_v7  ;;  %2245 = vmatpush1.bf16.msra.mxu1 %v5739_v8 }
 0x525   :  { %2205 = vmatprep.subr.bf16.mxu0 %v7516_v36  ;;  %2246 = vmatprep.subr.bf16.mxu1 %v7517_v1 }
 0x528   :  { %2206 = vmatpush1.bf16.msra.mxu0 %v7518_v26  ;;  %2247 = vmatpush1.bf16.msra.mxu1 %v7519_v22 }
 0x529   :  { %2308 = vmatprep.subr.bf16.mxu0 %v7520_v29  ;;  %2349 = vmatprep.subr.bf16.mxu1 %v7521_v41  ;;  %v7540_v41 = vld [vmem:[#allocation31_spill] sm:$0xff] }
 0x52a   :  { %v7542_v35 = vsel %vm5881_vm15, %v7540_v41, %v7541_v28 }
 0x5de   :  { %v2108_v18 = vpop.f32.mrb[44].mxu0  ;;  %v2149_v24 = vpop.f32.mrb[36].mxu1 }
 0x5df   :  { %v2156_v25 = vadd.f32 %v2108_v18, %v7533_v23  ;;  %v2158_v15 = vadd.f32 %v2149_v24, %v7536_v21  ;;  %v2110_v38 = vpop.f32.mrb[45].mxu0  ;;  %v2151_v20 = vpop.f32.mrb[37].mxu1 }
 0x5e0   :  { %v2157_v29 = vadd.f32 %v2110_v38, %v7539_v32  ;;  %v2159_v12 = vadd.f32 %v2151_v20, %v7542_v35  ;;  %v2112_v4 = vpop.f32.mrb[46].mxu0  ;;  %v2153_v19 = vpop.f32.mrb[38].mxu1 }
 0x5e1   :  { %v4483_v18 = vmul.f32 -1.442695, %v2156_v25  ;;  %v2113_v23 = vpop.f32.mrb[47].mxu0  ;;  %v2154_v30 = vpop.f32.mrb[39].mxu1  ;;  %v4485_v21 = vmul.f32 -1.442695, %v2158_v15 }
 0x5e2   :  { %v4484_v24 = vmul.f32 -1.442695, %v2157_v29  ;;  %v6312_v19 = vld [vmem:[#allocation10 + $0x24] ss:$16 sps:$4 sm:$0xff]   ;;  %v6320_v23 = vld [vmem:[#allocation10 + $0x20] ss:$16 sps:$4 sm:$0xff]  }
 0x5e3   :  { %5037 = vpow2.f32 %v4483_v18  ;;  %v6315_v18 = vld [vmem:[#allocation10 + $0x2c] ss:$16 sps:$4 sm:$0xff]  }
 0x5e4   :  { %5039 = vpow2.f32 %v4484_v24  ;;  %v6323_v24 = vld [vmem:[#allocation10 + $0x28] ss:$16 sps:$4 sm:$0xff]  }
 0x5e5   :  { %5041 = vtanh.f32 %v2159_v12 }
 0x5e6   :  { %5043 = vpow2.f32 %v4485_v21  ;;  %v6326_v21 = vld [vmem:[#allocation10 + $0x44] ss:$16 sps:$4 sm:$0xff]  }
 0x5ed   :  { %v5038_v40 = vpop.eup %5037 }
 0x5ee   :  { %v2169_v17 = vadd.f32 1.0, %v5038_v40  ;;  %v5040_v9 = vpop.eup %5039 }
 0x5ef   :  { %v2170_v38 = vadd.f32 1.0, %v5040_v9  ;;  %v5042_v32 = vpop.eup %5041 }
 0x5f0   :  { %5045 = vrcp.f32 %v2169_v17  ;;  %v5044_v42 = vpop.eup %5043 }
 0x5f1   :  { %5047 = vrcp.f32 %v2170_v38  ;;  %v2171_v25 = vadd.f32 1.0, %v5044_v42  ;;  %v6329_v38 = vld [vmem:[#allocation10 + $0x4c] ss:$16 sps:$4 sm:$0xff]  }
 0x5f3   :  { %5049 = vrcp.f32 %v2171_v25  ;;  %v6344_v25 = vld [vmem:[#allocation10 + $0x60] ss:$16 sps:$4 sm:$0xff]  }
 0x5fa   :  { %v5046_v20 = vpop.eup %5045 }
 0x5fb   :  { %v2180_v35 = vmul.f32 %v5046_v20, %v5042_v32  ;;  %v5048_v4 = vpop.eup %5047  ;;  %v6332_v32 = vld [vmem:[#allocation10 + $0x40] ss:$16 sps:$4 sm:$0xff]   ;;  %v6335_v20 = vld [vmem:[#allocation10 + $0x48] ss:$16 sps:$4 sm:$0xff]  }
 0x5fc   :  { %v2179_v30 = vmul.f32 %v5048_v4, %v6179_v13  ;;  %v6341_v4 = vld [vmem:[#allocation10 + $0x6c] ss:$16 sps:$4 sm:$0xff]  }
 0x5fd   :  { %v5050_v40 = vpop.eup %5049 }
 0x5fe   :  { %v6237_v29 = vadd.f32 %v2180_v35, %v2179_v30  ;;  %v6338_v35 = vld [vmem:[#allocation10 + $0x64] ss:$16 sps:$4 sm:$0xff]   ;;  %v6347_v30 = vld [vmem:[#allocation10 + $0x68] ss:$16 sps:$4 sm:$0xff]  }
 0x600   :  { %5051 = vtanh.f32 %v6237_v29 }
 0x60a   :  { %v5052_v15 = vpop.eup %5051 }
 0x60b   :  { %v6240_v12 = vmul.f32 %v5052_v15, %v5050_v40  ;;  %v6353_v40 = vld [vmem:[#allocation10 + $0x8c] ss:$16 sps:$4 sm:$0xff]   ;;  %v6356_v15 = vld [vmem:[#allocation10 + $0x80] ss:$16 sps:$4 sm:$0xff]  }
 0x60d   :  { %v2190_v9 = vpack.c.bf16 %v6240_v12, %v6240_v12 }
 0x60f   :  { %2224 = vmatmul.mubr.bf16.vlgmr.msra.gmra.mrb[48].mxu0 %v2190_v9  ;;  %2265 = vmatmul.mubr.bf16.vlgmr.msra.gmra.mrb[40].mxu1 %v2190_v9  ;;  %v6359_v9 = vld [vmem:[#allocation10 + $0x88] ss:$16 sps:$4 sm:$0xff]  }
 0x610   :  { %2309 = vmatpush1.bf16.msra.mxu0 %v5653_v45  ;;  %2350 = vmatpush1.bf16.msra.mxu1 %v5655_v46  ;;  %v6276_v45 = vld [vmem:[#allocation10 + $0x4] ss:$16 sps:$4 sm:$0xff]   ;;  %v6279_v46 = vld [vmem:[#allocation10 + $0xc] ss:$16 sps:$4 sm:$0xff]  }
 0x611   :  { %2310 = vmatprep.subr.bf16.mxu0 %v5659_v48  ;;  %2351 = vmatprep.subr.bf16.mxu1 %v5661_v49 }
 0x612   :  { %2340 = vmatprep.mubr.bf16.mxu0 %v7515_v44  ;;  %2381 = vmatprep.mubr.bf16.mxu1 %v7515_v44 }
 0x614   :  { %2311 = vmatpush1.bf16.msra.mxu0 %v5667_v50  ;;  %2352 = vmatpush1.bf16.msra.mxu1 %v5669_v52  ;;  %v7543_v50 = vld [vmem:[#allocation38_spill] sm:$0xff] }
 0x615   :  { %2312 = vmatprep.subr.bf16.mxu0 %v5673_v53  ;;  %2353 = vmatprep.subr.bf16.mxu1 %v5675_v54  ;;  %v7544_v53 = vsel %vm5869_vm13, %v7535_v34, %v7534_v33 }
 0x618   :  { %2313 = vmatpush1.bf16.msra.mxu0 %v5681_v51  ;;  %2354 = vmatpush1.bf16.msra.mxu1 %v5683_v55 }
 0x619   :  { %2314 = vmatprep.subr.bf16.mxu0 %v5687_v56  ;;  %2355 = vmatprep.subr.bf16.mxu1 %v5689_v57  ;;  %v7545_v56 = vsel %vm5877_vm14, %v7538_v43, %v7537_v10 }
 0x61c   :  { %2315 = vmatpush1.bf16.msra.mxu0 %v5695_v58  ;;  %2356 = vmatpush1.bf16.msra.mxu1 %v5697_v59  ;;  %v7546_v58 = vsel %vm5881_vm15, %v7541_v28, %v7540_v41  ;;  %v6306_v41 = vld [vmem:[#allocation10] ss:$16 sps:$4 sm:$0xff]   ;;  %v6309_v28 = vld [vmem:[#allocation10 + $0x8] ss:$16 sps:$4 sm:$0xff]  }
 0x61d   :  { %2316 = vmatprep.subr.bf16.mxu0 %v5701_v60  ;;  %2357 = vmatprep.subr.bf16.mxu1 %v5703_v61 }
 0x620   :  { %2317 = vmatpush1.bf16.msra.mxu0 %v5709_v47  ;;  %2358 = vmatpush1.bf16.msra.mxu1 %v5711_v62 }
 0x621   :  { %2318 = vmatprep.subr.bf16.mxu0 %v5715_v63  ;;  %2359 = vmatprep.subr.bf16.mxu1 %v5717_v0 }
 0x624   :  { %2319 = vmatpush1.bf16.msra.mxu0 %v5723_v2  ;;  %2360 = vmatpush1.bf16.msra.mxu1 %v5725_v3 }
 0x625   :  { %2320 = vmatprep.subr.bf16.mxu0 %v5729_v5  ;;  %2361 = vmatprep.subr.bf16.mxu1 %v5731_v6 }
 0x628   :  { %2321 = vmatpush1.bf16.msra.mxu0 %v5737_v7  ;;  %2362 = vmatpush1.bf16.msra.mxu1 %v5739_v8 }
 0x629   :  { %2322 = vmatprep.subr.bf16.mxu0 %v7516_v36  ;;  %2363 = vmatprep.subr.bf16.mxu1 %v7517_v1 }
 0x62c   :  { %2323 = vmatpush1.bf16.msra.mxu0 %v7518_v26  ;;  %2364 = vmatpush1.bf16.msra.mxu1 %v7519_v22 }
 0x62d   :  { %2425 = vmatprep.subr.bf16.mxu0 %v6276_v45  ;;  %2466 = vmatprep.subr.bf16.mxu1 %v6279_v46 }
 0x6e2   :  { %v2225_v48 = vpop.f32.mrb[48].mxu0  ;;  %v2266_v49 = vpop.f32.mrb[40].mxu1 }
 0x6e3   :  { %v2273_v52 = vadd.f32 %v2225_v48, %v7543_v50  ;;  %v2275_v54 = vadd.f32 %v2266_v49, %v7544_v53  ;;  %v2227_v51 = vpop.f32.mrb[49].mxu0  ;;  %v2268_v55 = vpop.f32.mrb[41].mxu1  ;;  %v6362_v48 = vld [vmem:[#allocation10 + $0xa4] ss:$16 sps:$4 sm:$0xff]   ;;  %v6365_v49 = vld [vmem:[#allocation10 + $0xac] ss:$16 sps:$4 sm:$0xff]  }
 0x6e4   :  { %v2274_v57 = vadd.f32 %v2227_v51, %v7545_v56  ;;  %v2276_v59 = vadd.f32 %v2268_v55, %v7546_v58  ;;  %v2229_v60 = vpop.f32.mrb[50].mxu0  ;;  %v2270_v61 = vpop.f32.mrb[42].mxu1  ;;  %v6368_v50 = vld [vmem:[#allocation10 + $0xa0] ss:$16 sps:$4 sm:$0xff]   ;;  %v6374_v53 = vld [vmem:[#allocation10 + $0xc4] ss:$16 sps:$4 sm:$0xff]  }
 0x6e5   :  { %v4486_v47 = vmul.f32 -1.442695, %v2273_v52  ;;  %v2230_v62 = vpop.f32.mrb[51].mxu0  ;;  %v2271_v63 = vpop.f32.mrb[43].mxu1  ;;  %v4488_v2 = vmul.f32 -1.442695, %v2275_v54 }
 0x6e6   :  { %v4487_v0 = vmul.f32 -1.442695, %v2274_v57  ;;  %v6371_v52 = vld [vmem:[#allocation10 + $0xa8] ss:$16 sps:$4 sm:$0xff]   ;;  %v6377_v54 = vld [vmem:[#allocation10 + $0xcc] ss:$16 sps:$4 sm:$0xff]   ;;  %v7548_v63 = vsel %vm5869_vm13, %v5893_v11, %v5848_v39 }
 0x6e7   :  { %5053 = vpow2.f32 %v4486_v47  ;;  %v6380_v51 = vld [vmem:[#allocation10 + $0xc0] ss:$16 sps:$4 sm:$0xff]   ;;  %v6383_v55 = vld [vmem:[#allocation10 + $0xc8] ss:$16 sps:$4 sm:$0xff]   ;;  %v6386_v56 = vld [vmem:[#allocation10 + $0xe4] ss:$16 sps:$4 sm:$0xff]  }
 0x6e8   :  { %5055 = vpow2.f32 %v4487_v0  ;;  %v6389_v57 = vld [vmem:[#allocation10 + $0xec] ss:$16 sps:$4 sm:$0xff]   ;;  %v6392_v58 = vld [vmem:[#allocation10 + $0xe0] ss:$16 sps:$4 sm:$0xff]  }
 0x6e9   :  { %5057 = vtanh.f32 %v2276_v59  ;;  %v6395_v59 = vld [vmem:[#allocation10 + $0xe8] ss:$16 sps:$4 sm:$0xff]   ;;  %v7547_v47 = vld [vmem:[#allocation39_spill] sm:$0xff] }
 0x6ea   :  { %5059 = vpow2.f32 %v4488_v2 }
 0x6f1   :  { %v5054_v3 = vpop.eup %5053 }
 0x6f2   :  { %v2286_v5 = vadd.f32 1.0, %v5054_v3  ;;  %v5056_v6 = vpop.eup %5055 }
 0x6f3   :  { %v2287_v7 = vadd.f32 1.0, %v5056_v6  ;;  %v5058_v8 = vpop.eup %5057  ;;  %v7551_v6 = vld [vmem:[#allocation28_spill] sm:$0xff] }
 0x6f4   :  { %5061 = vrcp.f32 %v2286_v5  ;;  %v5060_v36 = vpop.eup %5059  ;;  %v7549_v5 = vsel %vm5877_vm14, %v7527_v14, %v5853_v27 }
 0x6f5   :  { %5063 = vrcp.f32 %v2287_v7  ;;  %v2288_v42 = vadd.f32 1.0, %v5060_v36 }
 0x6f7   :  { %5065 = vrcp.f32 %v2288_v42 }
 0x6fe   :  { %v5062_v1 = vpop.eup %5061 }
 0x6ff   :  { %v2297_v26 = vmul.f32 %v5062_v1, %v5058_v8  ;;  %v5064_v22 = vpop.eup %5063 }
 0x700   :  { %v2296_v13 = vmul.f32 %v5064_v22, %v6237_v29  ;;  %v6350_v29 = vld [vmem:[#allocation10 + $0x84] ss:$16 sps:$4 sm:$0xff]  }
 0x701   :  { %v5066_v33 = vpop.eup %5065 }
 0x702   :  { %v6299_v17 = vadd.f32 %v2297_v26, %v2296_v13 }
 0x704   :  { %5067 = vtanh.f32 %v6299_v17 }
 0x70e   :  { %v5068_v34 = vpop.eup %5067 }
 0x70f   :  { %v6302_v10 = vmul.f32 %v5068_v34, %v5066_v33 }
 0x711   :  { %v2307_v43 = vpack.c.bf16 %v6302_v10, %v6302_v10 }
 0x713   :  { %2341 = vmatmul.mubr.bf16.vlgmr.msra.gmra.mrb[52].mxu0 %v2307_v43  ;;  %2382 = vmatmul.mubr.bf16.vlgmr.msra.gmra.mrb[44].mxu1 %v2307_v43 }
 0x714   :  { %2426 = vmatpush1.bf16.msra.mxu0 %v6306_v41  ;;  %2467 = vmatpush1.bf16.msra.mxu1 %v6309_v28 }
 0x715   :  { %2427 = vmatprep.subr.bf16.mxu0 %v6312_v19  ;;  %2468 = vmatprep.subr.bf16.mxu1 %v6315_v18 }
 0x716   :  { %2457 = vmatprep.mubr.bf16.mxu0 %v7515_v44  ;;  %2498 = vmatprep.mubr.bf16.mxu1 %v7515_v44 }
 0x718   :  { %2428 = vmatpush1.bf16.msra.mxu0 %v6320_v23  ;;  %2469 = vmatpush1.bf16.msra.mxu1 %v6323_v24 }
 0x719   :  { %2429 = vmatprep.subr.bf16.mxu0 %v6326_v21  ;;  %2470 = vmatprep.subr.bf16.mxu1 %v6329_v38 }
 0x71c   :  { %2430 = vmatpush1.bf16.msra.mxu0 %v6332_v32  ;;  %2471 = vmatpush1.bf16.msra.mxu1 %v6335_v20 }
 0x71d   :  { %2431 = vmatprep.subr.bf16.mxu0 %v6338_v35  ;;  %2472 = vmatprep.subr.bf16.mxu1 %v6341_v4 }
 0x720   :  { %2432 = vmatpush1.bf16.msra.mxu0 %v6344_v25  ;;  %2473 = vmatpush1.bf16.msra.mxu1 %v6347_v30 }
 0x721   :  { %2433 = vmatprep.subr.bf16.mxu0 %v6350_v29  ;;  %2474 = vmatprep.subr.bf16.mxu1 %v6353_v40 }
 0x724   :  { %2434 = vmatpush1.bf16.msra.mxu0 %v6356_v15  ;;  %2475 = vmatpush1.bf16.msra.mxu1 %v6359_v9 }
 0x725   :  { %2435 = vmatprep.subr.bf16.mxu0 %v6362_v48  ;;  %2476 = vmatprep.subr.bf16.mxu1 %v6365_v49 }
 0x728   :  { %2436 = vmatpush1.bf16.msra.mxu0 %v6368_v50  ;;  %2477 = vmatpush1.bf16.msra.mxu1 %v6371_v52 }
 0x729   :  { %2437 = vmatprep.subr.bf16.mxu0 %v6374_v53  ;;  %2478 = vmatprep.subr.bf16.mxu1 %v6377_v54 }
 0x72c   :  { %2438 = vmatpush1.bf16.msra.mxu0 %v6380_v51  ;;  %2479 = vmatpush1.bf16.msra.mxu1 %v6383_v55 }
 0x72d   :  { %2439 = vmatprep.subr.bf16.mxu0 %v6386_v56  ;;  %2480 = vmatprep.subr.bf16.mxu1 %v6389_v57 }
 0x730   :  { %2440 = vmatpush1.bf16.msra.mxu0 %v6392_v58  ;;  %2481 = vmatpush1.bf16.msra.mxu1 %v6395_v59 }
 0x731   :  { %2542 = vmatprep.subr.bf16.mxu0 %v6276_v45  ;;  %2583 = vmatprep.subr.bf16.mxu1 %v6279_v46  ;;  %v7550_v46 = vld [vmem:[#allocation37_spill] sm:$0xff] }
 0x732   :  { %v7552_v7 = vsel %vm5881_vm15, %v7550_v46, %v7551_v6  ;;  %v2674_v46 = vsel %vm159_vm12, %v6240_v12, %v6302_v10 }
 0x7e6   :  { %v2342_v60 = vpop.f32.mrb[52].mxu0  ;;  %v2383_v61 = vpop.f32.mrb[44].mxu1 }
 0x7e7   :  { %v2390_v62 = vadd.f32 %v2342_v60, %v7547_v47  ;;  %v2392_v0 = vadd.f32 %v2383_v61, %v7548_v63  ;;  %v2344_v2 = vpop.f32.mrb[53].mxu0  ;;  %v2385_v3 = vpop.f32.mrb[45].mxu1 }
 0x7e8   :  { %v2391_v45 = vadd.f32 %v2344_v2, %v7549_v5  ;;  %v2393_v8 = vadd.f32 %v2385_v3, %v7552_v7  ;;  %v2346_v36 = vpop.f32.mrb[54].mxu0  ;;  %v2387_v1 = vpop.f32.mrb[46].mxu1  ;;  %v7554_v7 = vld [vmem:[#allocation21_spill] sm:$0xff] }
 0x7e9   :  { %v4489_v26 = vmul.f32 -1.442695, %v2390_v62  ;;  %v2347_v22 = vpop.f32.mrb[55].mxu0  ;;  %v2388_v11 = vpop.f32.mrb[47].mxu1  ;;  %v4491_v42 = vmul.f32 -1.442695, %v2392_v0  ;;  %v2676_v36 = vsel %vm159_vm12, %v6302_v10, %v6240_v12 }
 0x7ea   :  { %v4490_v39 = vmul.f32 -1.442695, %v2391_v45 }
 0x7eb   :  { %5069 = vpow2.f32 %v4489_v26 }
 0x7ec   :  { %5071 = vpow2.f32 %v4490_v39 }
 0x7ed   :  { %5073 = vtanh.f32 %v2393_v8 }
 0x7ee   :  { %5075 = vpow2.f32 %v4491_v42 }
 0x7f5   :  { %v5070_v13 = vpop.eup %5069 }
 0x7f6   :  { %v2403_v33 = vadd.f32 1.0, %v5070_v13  ;;  %v5072_v27 = vpop.eup %5071 }
 0x7f7   :  { %v2404_v14 = vadd.f32 1.0, %v5072_v27  ;;  %v5074_v34 = vpop.eup %5073 }
 0x7f8   :  { %5077 = vrcp.f32 %v2403_v33  ;;  %v5076_v43 = vpop.eup %5075 }
 0x7f9   :  { %5079 = vrcp.f32 %v2404_v14  ;;  %v2405_v62 = vadd.f32 1.0, %v5076_v43  ;;  %v4895_v43 = vld [vmem:[#allocation11 + $0x4] ss:$16 sps:$4 sm:$0xff]  }
 0x7fb   :  { %5081 = vrcp.f32 %v2405_v62  ;;  %v4901_v62 = vld [vmem:[#allocation11 + $0x24] ss:$16 sps:$4 sm:$0xff]  }
 0x802   :  { %v5078_v60 = vpop.eup %5077 }
 0x803   :  { %v2414_v61 = vmul.f32 %v5078_v60, %v5074_v34  ;;  %v5080_v47 = vpop.eup %5079  ;;  %v4898_v60 = vld [vmem:[#allocation11 + $0xc] ss:$16 sps:$4 sm:$0xff]  }
 0x804   :  { %v2413_v63 = vmul.f32 %v5080_v47, %v6299_v17  ;;  %v4896_v47 = vld [vmem:[#allocation11 + $0x8] ss:$16 sps:$4 sm:$0xff]  }
 0x805   :  { %v5082_v0 = vpop.eup %5081 }
 0x806   :  { %v6417_v2 = vadd.f32 %v2414_v61, %v2413_v63  ;;  %v4893_v61 = vld [vmem:[#allocation11] ss:$16 sps:$4 sm:$0xff]   ;;  %v4904_v63 = vld [vmem:[#allocation11 + $0x2c] ss:$16 sps:$4 sm:$0xff]  }
 0x808   :  { %5083 = vtanh.f32 %v6417_v2 }
 0x812   :  { %v5084_v3 = vpop.eup %5083 }
 0x813   :  { %v2417_v5 = vmul.f32 %v5084_v3, %v5082_v0  ;;  %v4902_v0 = vld [vmem:[#allocation11 + $0x28] ss:$16 sps:$4 sm:$0xff]   ;;  %v4907_v3 = vld [vmem:[#allocation11 + $0x44] ss:$16 sps:$4 sm:$0xff]  }
 0x815   :  { %v2424_v6 = vpack.c.bf16 %v2417_v5, %v2417_v5  ;;  %v2668_v8 = vsel %vm159_vm12, %v7554_v7, %v2417_v5  ;;  %v2670_v17 = vsel %vm159_vm12, %v2417_v5, %v7554_v7  ;;  %v4910_v5 = vld [vmem:[#allocation11 + $0x4c] ss:$16 sps:$4 sm:$0xff]   ;;  %v4913_v7 = vld [vmem:[#allocation11 + $0x64] ss:$16 sps:$4 sm:$0xff]  }
 0x816   :  { %v6434_v1 = vpack.c.bf16 %v2674_v46, %v2668_v8  ;;  %v6436_v26 = vpack.c.bf16 %v2670_v17, %v2676_v36  ;;  %v4905_v46 = vld [vmem:[#allocation11 + $0x40] ss:$16 sps:$4 sm:$0xff]   ;;  %v4916_v8 = vld [vmem:[#allocation11 + $0x6c] ss:$16 sps:$4 sm:$0xff]   ;;  %v4914_v36 = vld [vmem:[#allocation11 + $0x68] ss:$16 sps:$4 sm:$0xff]  }
 0x817   :  { %2458 = vmatmul.mubr.bf16.vlgmr.msra.gmra.mrb[56].mxu0 %v2424_v6  ;;  %2499 = vmatmul.mubr.bf16.vlgmr.msra.gmra.mrb[48].mxu1 %v2424_v6  ;;  %v4908_v6 = vld [vmem:[#allocation11 + $0x48] ss:$16 sps:$4 sm:$0xff]   ;;  %v4911_v17 = vld [vmem:[#allocation11 + $0x60] ss:$16 sps:$4 sm:$0xff]  }
 0x818   :  { %2543 = vmatpush1.bf16.msra.mxu0 %v6306_v41  ;;  %2584 = vmatpush1.bf16.msra.mxu1 %v6309_v28  ;;  %v7555_v41 = vld [vmem:[#allocation49_spill] sm:$0xff] }
 0x819   :  { %2544 = vmatprep.subr.bf16.mxu0 %v6312_v19  ;;  %2585 = vmatprep.subr.bf16.mxu1 %v6315_v18  ;;  %v7556_v19 = vld [vmem:[#allocation41_spill] sm:$0xff] }
 0x81a   :  { %2574 = vmatprep.mubr.bf16.mxu0 %v7515_v44  ;;  %2615 = vmatprep.mubr.bf16.mxu1 %v7515_v44  ;;  %v7557_v18 = vld [vmem:[#allocation25_spill] sm:$0xff] }
 0x81c   :  { %2545 = vmatpush1.bf16.msra.mxu0 %v6320_v23  ;;  %2586 = vmatpush1.bf16.msra.mxu1 %v6323_v24  ;;  %v7558_v23 = vsel %vm5869_vm13, %v7556_v19, %v7557_v18  ;;  %v4925_v19 = vld [vmem:[#allocation11 + $0xa4] ss:$16 sps:$4 sm:$0xff]   ;;  %v4923_v18 = vld [vmem:[#allocation11 + $0xa0] ss:$16 sps:$4 sm:$0xff]  }
 0x81d   :  { %2546 = vmatprep.subr.bf16.mxu0 %v6326_v21  ;;  %2587 = vmatprep.subr.bf16.mxu1 %v6329_v38 }
 0x820   :  { %2547 = vmatpush1.bf16.msra.mxu0 %v6332_v32  ;;  %2588 = vmatpush1.bf16.msra.mxu1 %v6335_v20  ;;  %v7559_v32 = vld [vmem:[#allocation44_spill] sm:$0xff]  ;;  %v7560_v20 = vld [vmem:[#allocation26_spill] sm:$0xff] }
 0x821   :  { %2548 = vmatprep.subr.bf16.mxu0 %v6338_v35  ;;  %2589 = vmatprep.subr.bf16.mxu1 %v6341_v4  ;;  %v7561_v35 = vsel %vm5877_vm14, %v7559_v32, %v7560_v20  ;;  %v4929_v32 = vld [vmem:[#allocation11 + $0xc0] ss:$16 sps:$4 sm:$0xff]   ;;  %v4932_v20 = vld [vmem:[#allocation11 + $0xc8] ss:$16 sps:$4 sm:$0xff]  }
 0x824   :  { %2549 = vmatpush1.bf16.msra.mxu0 %v6344_v25  ;;  %2590 = vmatpush1.bf16.msra.mxu1 %v6347_v30  ;;  %v7562_v25 = vld [vmem:[#allocation45_spill] sm:$0xff]  ;;  %v7563_v30 = vld [vmem:[#allocation27_spill] sm:$0xff] }
 0x825   :  { %2550 = vmatprep.subr.bf16.mxu0 %v6350_v29  ;;  %2591 = vmatprep.subr.bf16.mxu1 %v6353_v40  ;;  %v7564_v29 = vsel %vm5881_vm15, %v7562_v25, %v7563_v30  ;;  %v4935_v25 = vld [vmem:[#allocation11 + $0xe0] ss:$16 sps:$4 sm:$0xff]   ;;  %v4938_v30 = vld [vmem:[#allocation11 + $0xe8] ss:$16 sps:$4 sm:$0xff]  }
 0x828   :  { %2551 = vmatpush1.bf16.msra.mxu0 %v6356_v15  ;;  %2592 = vmatpush1.bf16.msra.mxu1 %v6359_v9 }
 0x829   :  { %2552 = vmatprep.subr.bf16.mxu0 %v6362_v48  ;;  %2593 = vmatprep.subr.bf16.mxu1 %v6365_v49 }
 0x82c   :  { %2553 = vmatpush1.bf16.msra.mxu0 %v6368_v50  ;;  %2594 = vmatpush1.bf16.msra.mxu1 %v6371_v52 }
 0x82d   :  { %2554 = vmatprep.subr.bf16.mxu0 %v6374_v53  ;;  %2595 = vmatprep.subr.bf16.mxu1 %v6377_v54 }
 0x830   :  { %2555 = vmatpush1.bf16.msra.mxu0 %v6380_v51  ;;  %2596 = vmatpush1.bf16.msra.mxu1 %v6383_v55 }
 0x831   :  { %2556 = vmatprep.subr.bf16.mxu0 %v6386_v56  ;;  %2597 = vmatprep.subr.bf16.mxu1 %v6389_v57 }
 0x834   :  { %2557 = vmatpush1.bf16.msra.mxu0 %v6392_v58  ;;  %2598 = vmatpush1.bf16.msra.mxu1 %v6395_v59 }
 0x835   :  { %2904 = vmatprep.subr.bf16.mxu0 %v4895_v43  ;;  %2977 = vmatprep.subr.bf16.mxu1 %v4898_v60 }
 0x8ea   :  { %v2459_v12 = vpop.f32.mrb[56].mxu0  ;;  %v2500_v10 = vpop.f32.mrb[48].mxu1 }
 0x8eb   :  { %v2507_v28 = vadd.f32 %v2459_v12, %v7555_v41  ;;  %v2509_v24 = vadd.f32 %v2500_v10, %v7558_v23  ;;  %v2461_v21 = vpop.f32.mrb[57].mxu0  ;;  %v2502_v38 = vpop.f32.mrb[49].mxu1  ;;  %v4919_v12 = vld [vmem:[#allocation11 + $0x84] ss:$16 sps:$4 sm:$0xff]   ;;  %v4922_v10 = vld [vmem:[#allocation11 + $0x8c] ss:$16 sps:$4 sm:$0xff]  }
 0x8ec   :  { %v2508_v4 = vadd.f32 %v2461_v21, %v7561_v35  ;;  %v2510_v40 = vadd.f32 %v2502_v38, %v7564_v29  ;;  %v2463_v15 = vpop.f32.mrb[58].mxu0  ;;  %v2504_v9 = vpop.f32.mrb[50].mxu1  ;;  %v4917_v41 = vld [vmem:[#allocation11 + $0x80] ss:$16 sps:$4 sm:$0xff]   ;;  %v4926_v23 = vld [vmem:[#allocation11 + $0xa8] ss:$16 sps:$4 sm:$0xff]  }
 0x8ed   :  { %v4492_v48 = vmul.f32 -1.442695, %v2507_v28  ;;  %v2464_v49 = vpop.f32.mrb[59].mxu0  ;;  %v2505_v50 = vpop.f32.mrb[51].mxu1  ;;  %v4494_v53 = vmul.f32 -1.442695, %v2509_v24 }
 0x8ee   :  { %v4493_v52 = vmul.f32 -1.442695, %v2508_v4  ;;  %v4920_v28 = vld [vmem:[#allocation11 + $0x88] ss:$16 sps:$4 sm:$0xff]   ;;  %v4928_v24 = vld [vmem:[#allocation11 + $0xac] ss:$16 sps:$4 sm:$0xff]  }
 0x8ef   :  { %5085 = vpow2.f32 %v4492_v48  ;;  %v4931_v21 = vld [vmem:[#allocation11 + $0xc4] ss:$16 sps:$4 sm:$0xff]   ;;  %v4934_v38 = vld [vmem:[#allocation11 + $0xcc] ss:$16 sps:$4 sm:$0xff]  }
 0x8f0   :  { %5087 = vpow2.f32 %v4493_v52  ;;  %v4937_v35 = vld [vmem:[#allocation11 + $0xe4] ss:$16 sps:$4 sm:$0xff]   ;;  %v4940_v4 = vld [vmem:[#allocation11 + $0xec] ss:$16 sps:$4 sm:$0xff]  }
 0x8f1   :  { %5089 = vtanh.f32 %v2510_v40  ;;  %v6496_v29 = vld [vmem:[#allocation13 + $0x4] ss:$16 sps:$4 sm:$0xff]   ;;  %v6499_v40 = vld [vmem:[#allocation13 + $0xc] ss:$16 sps:$4 sm:$0xff]  }
 0x8f2   :  { %5091 = vpow2.f32 %v4494_v53  ;;  %7565 = vst [vmem:[#allocation22_spill] sm:$0xff] %v6496_v29  ;;  %7566 = vst [vmem:[#allocation23_spill] sm:$0xff] %v6499_v40  ;;  %v7567_v48 = vld [vmem:[#allocation50_spill] sm:$0xff]  ;;  %v7569_v52 = vld [vmem:[#allocation40_spill] sm:$0xff] }
 0x8f3   :  { %v7568_v50 = vld [vmem:[#allocation46_spill] sm:$0xff] }
 0x8f4   :  { %v7570_v53 = vsel %vm5869_vm13, %v7568_v50, %v7569_v52  ;;  %v6565_v50 = vld [vmem:[#allocation13 + $0x6c] ss:$16 sps:$4 sm:$0xff]   ;;  %v6571_v52 = vld [vmem:[#allocation13 + $0x60] ss:$16 sps:$4 sm:$0xff]  }
 0x8f9   :  { %v5086_v54 = vpop.eup %5085 }
 0x8fa   :  { %v2520_v51 = vadd.f32 1.0, %v5086_v54  ;;  %v5088_v55 = vpop.eup %5087 }
 0x8fb   :  { %v2521_v56 = vadd.f32 1.0, %v5088_v55  ;;  %v5090_v57 = vpop.eup %5089 }
 0x8fc   :  { %5093 = vrcp.f32 %v2520_v51  ;;  %v5092_v58 = vpop.eup %5091 }
 0x8fd   :  { %5095 = vrcp.f32 %v2521_v56  ;;  %v2522_v39 = vadd.f32 1.0, %v5092_v58  ;;  %v7571_v56 = vld [vmem:[#allocation47_spill] sm:$0xff] }
 0x8ff   :  { %5097 = vrcp.f32 %v2522_v39 }
 0x906   :  { %v5094_v59 = vpop.eup %5093 }
 0x907   :  { %v2531_v22 = vmul.f32 %v5094_v59, %v5090_v57  ;;  %v5096_v11 = vpop.eup %5095  ;;  %v7572_v57 = vld [vmem:[#allocation42_spill] sm:$0xff] }
 0x908   :  { %v2530_v42 = vmul.f32 %v5096_v11, %v6417_v2  ;;  %v4899_v2 = vld [vmem:[#allocation11 + $0x20] ss:$16 sps:$4 sm:$0xff]   ;;  %v7573_v58 = vsel %vm5877_vm14, %v7571_v56, %v7572_v57  ;;  %v6591_v56 = vld [vmem:[#allocation13 + $0xa4] ss:$16 sps:$4 sm:$0xff]   ;;  %v6593_v57 = vld [vmem:[#allocation13 + $0xac] ss:$16 sps:$4 sm:$0xff]  }
 0x909   :  { %v5098_v33 = vpop.eup %5097  ;;  %v7575_v11 = vld [vmem:[#allocation43_spill] sm:$0xff] }
 0x90a   :  { %v6487_v13 = vadd.f32 %v2531_v22, %v2530_v42  ;;  %v7574_v22 = vld [vmem:[#allocation48_spill] sm:$0xff] }
 0x90b   :  { %v7576_v39 = vsel %vm5881_vm15, %v7574_v22, %v7575_v11  ;;  %v6605_v22 = vld [vmem:[#allocation13 + $0xc4] ss:$16 sps:$4 sm:$0xff]   ;;  %v6607_v11 = vld [vmem:[#allocation13 + $0xcc] ss:$16 sps:$4 sm:$0xff]  }
 0x90c   :  { %5099 = vtanh.f32 %v6487_v13 }
 0x916   :  { %v5100_v27 = vpop.eup %5099 }
 0x917   :  { %v6490_v14 = vmul.f32 %v5100_v27, %v5098_v33 }
 0x919   :  { %v2541_v34 = vpack.c.bf16 %v6490_v14, %v6490_v14 }
 0x91b   :  { %2575 = vmatmul.mubr.bf16.vlgmr.msra.gmra.mrb[60].mxu0 %v2541_v34  ;;  %2616 = vmatmul.mubr.bf16.vlgmr.msra.gmra.mrb[52].mxu1 %v2541_v34 }
 0x91c   :  { %2936 = vmatprep.mubr.bf16.mxu0 %v7515_v44  ;;  %3009 = vmatprep.mubr.bf16.mxu1 %v7515_v44 }
 0x91d   :  { %2905 = vmatpush1.bf16.msra.mxu0 %v4893_v61  ;;  %2978 = vmatpush1.bf16.msra.mxu1 %v4896_v47 }
 0x91e   :  { %2906 = vmatprep.subr.bf16.mxu0 %v4901_v62  ;;  %2979 = vmatprep.subr.bf16.mxu1 %v4904_v63 }
 0x921   :  { %2907 = vmatpush1.bf16.msra.mxu0 %v4899_v2  ;;  %2980 = vmatpush1.bf16.msra.mxu1 %v4902_v0 }
 0x922   :  { %2908 = vmatprep.subr.bf16.mxu0 %v4907_v3  ;;  %2981 = vmatprep.subr.bf16.mxu1 %v4910_v5 }
 0x925   :  { %2909 = vmatpush1.bf16.msra.mxu0 %v4905_v46  ;;  %2982 = vmatpush1.bf16.msra.mxu1 %v4908_v6 }
 0x926   :  { %2910 = vmatprep.subr.bf16.mxu0 %v4913_v7  ;;  %2983 = vmatprep.subr.bf16.mxu1 %v4916_v8 }
 0x929   :  { %2911 = vmatpush1.bf16.msra.mxu0 %v4911_v17  ;;  %2984 = vmatpush1.bf16.msra.mxu1 %v4914_v36 }
 0x92a   :  { %2912 = vmatprep.subr.bf16.mxu0 %v4919_v12  ;;  %2985 = vmatprep.subr.bf16.mxu1 %v4922_v10 }
 0x92d   :  { %2913 = vmatpush1.bf16.msra.mxu0 %v4917_v41  ;;  %2986 = vmatpush1.bf16.msra.mxu1 %v4920_v28  ;;  %v7577_v28 = vld [vmem:[#allocation51_spill] sm:$0xff] }
 0x92e   :  { %2914 = vmatprep.subr.bf16.mxu0 %v4925_v19  ;;  %2987 = vmatprep.subr.bf16.mxu1 %v4928_v24  ;;  %v6526_v24 = vld [vmem:[#allocation13] ss:$16 sps:$4 sm:$0xff]  }
 0x931   :  { %2915 = vmatpush1.bf16.msra.mxu0 %v4923_v18  ;;  %2988 = vmatpush1.bf16.msra.mxu1 %v4926_v23  ;;  %v7578_v18 = vld [vmem:[#allocation20_spill] sm:$0xff] }
 0x932   :  { %2916 = vmatprep.subr.bf16.mxu0 %v4931_v21  ;;  %2989 = vmatprep.subr.bf16.mxu1 %v4934_v38  ;;  %v2662_v23 = vsel %vm159_vm12, %v7578_v18, %v6490_v14  ;;  %v6528_v21 = vld [vmem:[#allocation13 + $0x8] ss:$16 sps:$4 sm:$0xff]   ;;  %v2664_v38 = vsel %vm159_vm12, %v6490_v14, %v7578_v18  ;;  %v6549_v14 = vld [vmem:[#allocation13 + $0x44] ss:$16 sps:$4 sm:$0xff]  }
 0x935   :  { %2917 = vmatpush1.bf16.msra.mxu0 %v4929_v32  ;;  %2990 = vmatpush1.bf16.msra.mxu1 %v4932_v20  ;;  %v6537_v20 = vld [vmem:[#allocation13 + $0x24] ss:$16 sps:$4 sm:$0xff]  }
 0x936   :  { %2918 = vmatprep.subr.bf16.mxu0 %v4937_v35  ;;  %2991 = vmatprep.subr.bf16.mxu1 %v4940_v4  ;;  %v6539_v35 = vld [vmem:[#allocation13 + $0x2c] ss:$16 sps:$4 sm:$0xff]  }
 0x939   :  { %2919 = vmatpush1.bf16.msra.mxu0 %v4935_v25  ;;  %2992 = vmatpush1.bf16.msra.mxu1 %v4938_v30  ;;  %v6543_v25 = vld [vmem:[#allocation13 + $0x20] ss:$16 sps:$4 sm:$0xff]   ;;  %v6545_v30 = vld [vmem:[#allocation13 + $0x28] ss:$16 sps:$4 sm:$0xff]  }
 0x93a   :  { %3374 = vmatprep.subr.bf16.mxu0 %v6496_v29  ;;  %3415 = vmatprep.subr.bf16.mxu1 %v6499_v40 }
 0x9ee   :  { %v2576_v15 = vpop.f32.mrb[60].mxu0  ;;  %v2617_v9 = vpop.f32.mrb[52].mxu1 }
 0x9ef   :  { %v2624_v49 = vadd.f32 %v2576_v15, %v7567_v48  ;;  %v2626_v54 = vadd.f32 %v2617_v9, %v7570_v53  ;;  %v2578_v51 = vpop.f32.mrb[61].mxu0  ;;  %v2619_v55 = vpop.f32.mrb[53].mxu1  ;;  %v6551_v15 = vld [vmem:[#allocation13 + $0x4c] ss:$16 sps:$4 sm:$0xff]   ;;  %v6557_v9 = vld [vmem:[#allocation13 + $0x40] ss:$16 sps:$4 sm:$0xff]  }
 0x9f0   :  { %v2625_v59 = vadd.f32 %v2578_v51, %v7573_v58  ;;  %v2627_v42 = vadd.f32 %v2619_v55, %v7576_v39  ;;  %v2580_v33 = vpop.f32.mrb[62].mxu0  ;;  %v2621_v27 = vpop.f32.mrb[54].mxu1  ;;  %v6559_v48 = vld [vmem:[#allocation13 + $0x48] ss:$16 sps:$4 sm:$0xff]   ;;  %v6579_v51 = vld [vmem:[#allocation13 + $0x8c] ss:$16 sps:$4 sm:$0xff]  }
 0x9f1   :  { %v4495_v34 = vmul.f32 -1.442695, %v2624_v49  ;;  %v2581_v43 = vpop.f32.mrb[63].mxu0  ;;  %v2622_v60 = vpop.f32.mrb[55].mxu1  ;;  %v4497_v47 = vmul.f32 -1.442695, %v2626_v54 }
 0x9f2   :  { %v4496_v61 = vmul.f32 -1.442695, %v2625_v59  ;;  %v6563_v49 = vld [vmem:[#allocation13 + $0x64] ss:$16 sps:$4 sm:$0xff]   ;;  %v6573_v53 = vld [vmem:[#allocation13 + $0x68] ss:$16 sps:$4 sm:$0xff]  }
 0x9f3   :  { %5101 = vpow2.f32 %v4495_v34  ;;  %v6577_v54 = vld [vmem:[#allocation13 + $0x84] ss:$16 sps:$4 sm:$0xff]   ;;  %v6587_v55 = vld [vmem:[#allocation13 + $0x88] ss:$16 sps:$4 sm:$0xff]   ;;  %v6599_v58 = vld [vmem:[#allocation13 + $0xa0] ss:$16 sps:$4 sm:$0xff]  }
 0x9f4   :  { %5103 = vpow2.f32 %v4496_v61  ;;  %v6601_v59 = vld [vmem:[#allocation13 + $0xa8] ss:$16 sps:$4 sm:$0xff]   ;;  %v6621_v33 = vld [vmem:[#allocation13 + $0xec] ss:$16 sps:$4 sm:$0xff]   ;;  %v6625_v27 = vld [vmem:[#allocation13 + $0xe0] ss:$16 sps:$4 sm:$0xff]  }
 0x9f5   :  { %5105 = vtanh.f32 %v2627_v42  ;;  %v6615_v39 = vld [vmem:[#allocation13 + $0xc8] ss:$16 sps:$4 sm:$0xff]   ;;  %v6619_v42 = vld [vmem:[#allocation13 + $0xe4] ss:$16 sps:$4 sm:$0xff]   ;;  %7581 = vst [vmem:[#allocation36_spill] sm:$0xff] %v6621_v33  ;;  %7582 = vst [vmem:[#allocation35_spill] sm:$0xff] %v6625_v27 }
 0x9f6   :  { %5107 = vpow2.f32 %v4497_v47  ;;  %7579 = vst [vmem:[#allocation18_spill] sm:$0xff] %v6615_v39  ;;  %7580 = vst [vmem:[#allocation19_spill] sm:$0xff] %v6619_v42  ;;  %v6627_v34 = vld [vmem:[#allocation13 + $0xe8] ss:$16 sps:$4 sm:$0xff]   ;;  %v2722_v43 = vld [vmem:[%s7361_s7] sm:$0xf] }
 0x9f7   :  { %7583 = vst [vmem:[#allocation29_spill] sm:$0xff] %v6627_v34  ;;  %v7584_v47 = vld [vmem:[#allocation24_spill] sm:$0xff] }
 0x9fd   :  { %v5102_v62 = vpop.eup %5101 }
 0x9fe   :  { %v2637_v63 = vadd.f32 1.0, %v5102_v62  ;;  %v5104_v2 = vpop.eup %5103  ;;  %v7585_v62 = vsub.s32 0, %v7584_v47 }
 0x9ff   :  { %v2638_v0 = vadd.f32 1.0, %v5104_v2  ;;  %v5106_v3 = vpop.eup %5105  ;;  %v7586_v2 = vsub.s32 2, %v7584_v47 }
 0xa00   :  { %5109 = vrcp.f32 %v2637_v63  ;;  %v5108_v5 = vpop.eup %5107  ;;  %v6682_v63 = vrot.slane %v2722_v43, %v7585_v62 }
 0xa01   :  { %5111 = vrcp.f32 %v2638_v0  ;;  %v2639_v8 = vadd.f32 1.0, %v5108_v5  ;;  %v6686_v0 = vrot.slane %v2722_v43, %v7586_v2 }
 0xa03   :  { %5113 = vrcp.f32 %v2639_v8 }
 0xa0a   :  { %v5110_v46 = vpop.eup %5109 }
 0xa0b   :  { %v2648_v6 = vmul.f32 %v5110_v46, %v5106_v3  ;;  %v5112_v7 = vpop.eup %5111  ;;  %v7587_v46 = vsub.s32 1, %v7584_v47 }
 0xa0c   :  { %v2647_v17 = vmul.f32 %v5112_v7, %v6487_v13  ;;  %v7588_v7 = vsub.s32 3, %v7584_v47 }
 0xa0d   :  { %v5114_v12 = vpop.eup %5113 }
 0xa0e   :  { %v2649_v36 = vadd.f32 %v2648_v6, %v2647_v17  ;;  %v6694_v6 = vrot.slane %v2722_v43, %v7587_v46  ;;  %v6698_v8 = vrot.slane %v2722_v43, %v7588_v7 }
 0xa10   :  { %5115 = vtanh.f32 %v2649_v36 }
 0xa1a   :  { %v5116_v10 = vpop.eup %5115 }
 0xa1b   :  { %v2651_v41 = vmul.f32 %v5116_v10, %v5114_v12 }
 0xa1d   :  { %v2656_v19 = vsel %vm159_vm12, %v7577_v28, %v2651_v41  ;;  %v2658_v13 = vsel %vm159_vm12, %v2651_v41, %v7577_v28 }
 0xa1e   :  { %v2686_v32 = vpack.c.bf16 %v2662_v23, %v2656_v19  ;;  %v2689_v4 = vpack.c.bf16 %v2658_v13, %v2664_v38 }
 0xa20   :  { %2937 = vmatmul.mubr.bf16.vlgmr.msra.gmra.mrb[64].mxu0 %v2686_v32  ;;  %3010 = vmatmul.mubr.bf16.vlgmr.msra.gmra.mrb[56].mxu1 %v2686_v32 }
 0xa21   :  { %3375 = vmatpush1.bf16.msra.mxu0 %v6526_v24  ;;  %3416 = vmatpush1.bf16.msra.mxu1 %v6528_v21 }
 0xa22   :  { %3376 = vmatprep.subr.bf16.mxu0 %v6537_v20  ;;  %3417 = vmatprep.subr.bf16.mxu1 %v6539_v35 }
 0xa23   :  { %2946 = vmatprep.mubr.bf16.mxu0 %v7515_v44  ;;  %3019 = vmatprep.mubr.bf16.mxu1 %v7515_v44 }
 0xa25   :  { %3377 = vmatpush1.bf16.msra.mxu0 %v6543_v25  ;;  %3418 = vmatpush1.bf16.msra.mxu1 %v6545_v30 }
 0xa26   :  { %3378 = vmatprep.subr.bf16.mxu0 %v6549_v14  ;;  %3419 = vmatprep.subr.bf16.mxu1 %v6551_v15 }
 0xa28   :  { %2947 = vmatmul.mubr.bf16.gmra.mrb[68].mxu0 %v6434_v1  ;;  %3020 = vmatmul.mubr.bf16.gmra.mrb[60].mxu1 %v6434_v1  ;;  %v6585_v1 = vld [vmem:[#allocation13 + $0x80] ss:$16 sps:$4 sm:$0xff]  }
 0xa29   :  { %3379 = vmatpush1.bf16.msra.mxu0 %v6557_v9  ;;  %3420 = vmatpush1.bf16.msra.mxu1 %v6559_v48 }
 0xa2a   :  { %3380 = vmatprep.subr.bf16.mxu0 %v6563_v49  ;;  %3421 = vmatprep.subr.bf16.mxu1 %v6565_v50 }
 0xa2b   :  { %2956 = vmatprep.mubr.bf16.mxu0 %v7515_v44  ;;  %3029 = vmatprep.mubr.bf16.mxu1 %v7515_v44 }
 0xa2d   :  { %3381 = vmatpush1.bf16.msra.mxu0 %v6571_v52  ;;  %3422 = vmatpush1.bf16.msra.mxu1 %v6573_v53 }
 0xa2e   :  { %3382 = vmatprep.subr.bf16.mxu0 %v6577_v54  ;;  %3423 = vmatprep.subr.bf16.mxu1 %v6579_v51 }
 0xa30   :  { %2957 = vmatmul.mubr.bf16.gmra.mrb[72].mxu0 %v6436_v26  ;;  %3030 = vmatmul.mubr.bf16.gmra.mrb[64].mxu1 %v6436_v26  ;;  %v6613_v26 = vld [vmem:[#allocation13 + $0xc0] ss:$16 sps:$4 sm:$0xff]  }
 0xa31   :  { %3383 = vmatpush1.bf16.msra.mxu0 %v6585_v1  ;;  %3424 = vmatpush1.bf16.msra.mxu1 %v6587_v55 }
 0xa32   :  { %3384 = vmatprep.subr.bf16.mxu0 %v6591_v56  ;;  %3425 = vmatprep.subr.bf16.mxu1 %v6593_v57 }
 0xa33   :  { %2966 = vmatprep.mubr.bf16.mxu0 %v7515_v44  ;;  %3039 = vmatprep.mubr.bf16.mxu1 %v7515_v44 }
 0xa35   :  { %3385 = vmatpush1.bf16.msra.mxu0 %v6599_v58  ;;  %3426 = vmatpush1.bf16.msra.mxu1 %v6601_v59 }
 0xa36   :  { %3386 = vmatprep.subr.bf16.mxu0 %v6605_v22  ;;  %3427 = vmatprep.subr.bf16.mxu1 %v6607_v11 }
 0xa38   :  { %2967 = vmatmul.mubr.bf16.gmra.mrb[76].mxu0 %v2689_v4  ;;  %3040 = vmatmul.mubr.bf16.gmra.mrb[68].mxu1 %v2689_v4 }
 0xa39   :  { %3387 = vmatpush1.bf16.msra.mxu0 %v6613_v26  ;;  %3428 = vmatpush1.bf16.msra.mxu1 %v6615_v39 }
 0xa3a   :  { %3388 = vmatprep.subr.bf16.mxu0 %v6619_v42  ;;  %3429 = vmatprep.subr.bf16.mxu1 %v6621_v33 }
 0xa3b   :  { %3406 = vmatprep.mubr.bf16.mxu0 %v7515_v44  ;;  %3447 = vmatprep.mubr.bf16.mxu1 %v7515_v44 }
 0xa3d   :  { %3389 = vmatpush1.bf16.msra.mxu0 %v6625_v27  ;;  %3430 = vmatpush1.bf16.msra.mxu1 %v6627_v34 }
 0xa3e   :  { %3489 = vmatprep.subr.bf16.mxu0 %v6496_v29  ;;  %3530 = vmatprep.subr.bf16.mxu1 %v6499_v40 }
 0xa40   :  { %3407 = vmatmul.mubr.bf16.vlgmr.msra.gmra.mrb[80].mxu0 %v7515_v44  ;;  %3448 = vmatmul.mubr.bf16.vlgmr.msra.gmra.mrb[72].mxu1 %v7515_v44 }
 0xa41   :  { %3490 = vmatpush1.bf16.msra.mxu0 %v6526_v24  ;;  %3531 = vmatpush1.bf16.msra.mxu1 %v6528_v21 }
 0xa42   :  { %3491 = vmatprep.subr.bf16.mxu0 %v6537_v20  ;;  %3532 = vmatprep.subr.bf16.mxu1 %v6539_v35 }
 0xa43   :  { %3521 = vmatprep.mubr.bf16.mxu0 %v7515_v44  ;;  %3562 = vmatprep.mubr.bf16.mxu1 %v7515_v44 }
 0xa45   :  { %3492 = vmatpush1.bf16.msra.mxu0 %v6543_v25  ;;  %3533 = vmatpush1.bf16.msra.mxu1 %v6545_v30 }
 0xa46   :  { %3493 = vmatprep.subr.bf16.mxu0 %v6549_v14  ;;  %3534 = vmatprep.subr.bf16.mxu1 %v6551_v15 }
 0xa49   :  { %3494 = vmatpush1.bf16.msra.mxu0 %v6557_v9  ;;  %3535 = vmatpush1.bf16.msra.mxu1 %v6559_v48 }
 0xa4a   :  { %3495 = vmatprep.subr.bf16.mxu0 %v6563_v49  ;;  %3536 = vmatprep.subr.bf16.mxu1 %v6565_v50 }
 0xa4d   :  { %3496 = vmatpush1.bf16.msra.mxu0 %v6571_v52  ;;  %3537 = vmatpush1.bf16.msra.mxu1 %v6573_v53 }
 0xa4e   :  { %3497 = vmatprep.subr.bf16.mxu0 %v6577_v54  ;;  %3538 = vmatprep.subr.bf16.mxu1 %v6579_v51 }
 0xa51   :  { %3498 = vmatpush1.bf16.msra.mxu0 %v6585_v1  ;;  %3539 = vmatpush1.bf16.msra.mxu1 %v6587_v55 }
 0xa52   :  { %3499 = vmatprep.subr.bf16.mxu0 %v6591_v56  ;;  %3540 = vmatprep.subr.bf16.mxu1 %v6593_v57 }
 0xa55   :  { %3500 = vmatpush1.bf16.msra.mxu0 %v6599_v58  ;;  %3541 = vmatpush1.bf16.msra.mxu1 %v6601_v59 }
 0xa56   :  { %3501 = vmatprep.subr.bf16.mxu0 %v6605_v22  ;;  %3542 = vmatprep.subr.bf16.mxu1 %v6607_v11 }
 0xa59   :  { %3502 = vmatpush1.bf16.msra.mxu0 %v6613_v26  ;;  %3543 = vmatpush1.bf16.msra.mxu1 %v6615_v39 }
 0xa5a   :  { %3503 = vmatprep.subr.bf16.mxu0 %v6619_v42  ;;  %3544 = vmatprep.subr.bf16.mxu1 %v6621_v33 }
 0xa5d   :  { %3504 = vmatpush1.bf16.msra.mxu0 %v6625_v27  ;;  %3545 = vmatpush1.bf16.msra.mxu1 %v6627_v34 }
 0xa5e   :  { %3605 = vmatprep.subr.bf16.mxu0 %v6496_v29  ;;  %3646 = vmatprep.subr.bf16.mxu1 %v6499_v40 }
 0xaf3   :  { %v6676_v60 = vpop.f32.mrb[64].mxu0  ;;  %v6678_v61 = vpop.f32.mrb[56].mxu1 }
 0xaf4   :  { %v6688_v3 = vpop.f32.mrb[65].mxu0  ;;  %v6690_v5 = vpop.f32.mrb[57].mxu1 }
 0xaf5   :  { %v2942_v17 = vpop.f32.mrb[66].mxu0  ;;  %v3015_v36 = vpop.f32.mrb[58].mxu1 }
 0xaf6   :  { %v6701_v12 = vadd.f32 %v2942_v17, %v6682_v63  ;;  %v6704_v10 = vadd.f32 %v3015_v36, %v6686_v0  ;;  %v2944_v41 = vpop.f32.mrb[67].mxu0  ;;  %v3017_v28 = vpop.f32.mrb[59].mxu1 }
 0xaf7   :  { %v6707_v19 = vadd.f32 %v2944_v41, %v6694_v6  ;;  %v6710_v18 = vadd.f32 %v3017_v28, %v6698_v8 }
 0xaf8   :  { %7589 = vst [vmem:[#allocation32_spill] sm:$0xff] %v6704_v10 }
 0xaf9   :  { %7590 = vst [vmem:[#allocation30_spill] sm:$0xff] %v6707_v19  ;;  %7591 = vst [vmem:[#allocation33_spill] sm:$0xff] %v6710_v18 }
 0xafb   :  { %v2948_v23 = vpop.f32.mrb[68].mxu0  ;;  %v3021_v13 = vpop.f32.mrb[60].mxu1 }
 0xafc   :  { %v2949_v38 = vadd.f32 %v2948_v23, %v6682_v63  ;;  %v6714_v32 = vadd.f32 %v3021_v13, %v6686_v0  ;;  %v2950_v4 = vpop.f32.mrb[69].mxu0  ;;  %v3023_v43 = vpop.f32.mrb[61].mxu1 }
 0xafd   :  { %v6717_v47 = vadd.f32 %v2950_v4, %v6694_v6  ;;  %v6720_v62 = vadd.f32 %v3023_v43, %v6698_v8  ;;  %v2952_v2 = vpop.f32.mrb[70].mxu0  ;;  %v3025_v46 = vpop.f32.mrb[62].mxu1 }
 0xafe   :  { %v2953_v7 = vadd.f32 %v2952_v2, %v6682_v63  ;;  %v6724_v17 = vadd.f32 %v3025_v46, %v6686_v0  ;;  %v2954_v36 = vpop.f32.mrb[71].mxu0  ;;  %v3027_v41 = vpop.f32.mrb[63].mxu1 }
 0xaff   :  { %7592 = vst [vmem:[#allocation31_spill] sm:$0xff] %v6717_v47  ;;  %7593 = vst [vmem:[#allocation34_spill] sm:$0xff] %v6720_v62  ;;  %v6727_v28 = vadd.f32 %v2954_v36, %v6694_v6  ;;  %v6730_v23 = vadd.f32 %v3027_v41, %v6698_v8 }
 0xb00   :  { %7594 = vst [vmem:[#allocation38_spill] sm:$0xff] %v6724_v17 }
 0xb01   :  { %7595 = vst [vmem:[#allocation39_spill] sm:$0xff] %v6727_v28  ;;  %7596 = vst [vmem:[#allocation37_spill] sm:$0xff] %v6730_v23 }
 0xb03   :  { %v2958_v13 = vpop.f32.mrb[72].mxu0  ;;  %v3031_v4 = vpop.f32.mrb[64].mxu1 }
 0xb04   :  { %v2959_v43 = vadd.f32 %v2958_v13, %v6682_v63  ;;  %v6734_v40 = vadd.f32 %v3031_v4, %v6686_v0  ;;  %v2960_v29 = vpop.f32.mrb[73].mxu0  ;;  %v3033_v2 = vpop.f32.mrb[65].mxu1 }
 0xb05   :  { %v6737_v46 = vadd.f32 %v2960_v29, %v6694_v6  ;;  %v6740_v34 = vadd.f32 %v3033_v2, %v6698_v8  ;;  %v2962_v36 = vpop.f32.mrb[74].mxu0  ;;  %v3035_v27 = vpop.f32.mrb[66].mxu1 }
 0xb06   :  { %7597 = vst [vmem:[#allocation28_spill] sm:$0xff] %v6734_v40  ;;  %v2963_v41 = vadd.f32 %v2962_v36, %v6682_v63  ;;  %v6744_v33 = vadd.f32 %v3035_v27, %v6686_v0  ;;  %v2964_v42 = vpop.f32.mrb[75].mxu0  ;;  %v3037_v13 = vpop.f32.mrb[67].mxu1  ;;  %v6748_v4 = vsel %vm159_vm12, %v2953_v7, %v2959_v43 }
 0xb07   :  { %7598 = vst [vmem:[#allocation17_spill] sm:$0xff] %v6737_v46  ;;  %7599 = vst [vmem:[#allocation21_spill] sm:$0xff] %v6740_v34  ;;  %v6755_v2 = vadd.f32 %v2964_v42, %v6694_v6  ;;  %v6758_v39 = vadd.f32 %v3037_v13, %v6698_v8  ;;  %v6778_v13 = vsel %vm159_vm12, %v2959_v43, %v2953_v7 }
 0xb08   :  { %7600 = vst [vmem:[#allocation49_spill] sm:$0xff] %v6748_v4  ;;  %v6770_v4 = vsel %vm159_vm12, %v2949_v38, %v2963_v41  ;;  %7603 = vst [vmem:[#allocation44_spill] sm:$0xff] %v6778_v13  ;;  %v6802_v27 = vsel %vm159_vm12, %v2963_v41, %v2949_v38  ;;  %v2939_v38 = vadd.f32 %v6676_v60, %v6682_v63 }
 0xb09   :  { %7601 = vst [vmem:[#allocation41_spill] sm:$0xff] %v6755_v2  ;;  %7602 = vst [vmem:[#allocation25_spill] sm:$0xff] %v6758_v39  ;;  %v6820_v41 = vadd.f32 %v6678_v61, %v6686_v0  ;;  %v6828_v34 = vadd.f32 %v6688_v3, %v6694_v6  ;;  %v6832_v7 = vadd.f32 %v6690_v5, %v6698_v8 }
 0xb0a   :  { %7604 = vst [vmem:[#allocation26_spill] sm:$0xff] %v6802_v27 }
 0xb0b   :  { %v2968_v43 = vpop.f32.mrb[76].mxu0  ;;  %v3041_v42 = vpop.f32.mrb[68].mxu1  ;;  %7605 = vst [vmem:[#allocation45_spill] sm:$0xff] %v6820_v41  ;;  %7607 = vst [vmem:[#allocation50_spill] sm:$0xff] %v6828_v34 }
 0xb0c   :  { %v2969_v36 = vadd.f32 %v2968_v43, %v6682_v63  ;;  %v6824_v27 = vadd.f32 %v3041_v42, %v6686_v0  ;;  %v2970_v29 = vpop.f32.mrb[77].mxu0  ;;  %v3043_v13 = vpop.f32.mrb[69].mxu1  ;;  %7608 = vst [vmem:[#allocation46_spill] sm:$0xff] %v6832_v7 }
 0xb0d   :  { %v6835_v60 = vadd.f32 %v2970_v29, %v6694_v6  ;;  %v6838_v61 = vadd.f32 %v3043_v13, %v6698_v8  ;;  %v2972_v43 = vpop.f32.mrb[78].mxu0  ;;  %v3045_v23 = vpop.f32.mrb[70].mxu1 }
 0xb0e   :  { %7606 = vst [vmem:[#allocation27_spill] sm:$0xff] %v6824_v27  ;;  %v2973_v42 = vadd.f32 %v2972_v43, %v6682_v63  ;;  %v6842_v46 = vadd.f32 %v3045_v23, %v6686_v0  ;;  %v2974_v28 = vpop.f32.mrb[79].mxu0  ;;  %v3047_v3 = vpop.f32.mrb[71].mxu1  ;;  %v6847_v5 = vsel %vm159_vm12, %v6701_v12, %v2969_v36 }
 0xb0f   :  { %7609 = vst [vmem:[#allocation40_spill] sm:$0xff] %v6835_v60  ;;  %7610 = vst [vmem:[#allocation47_spill] sm:$0xff] %v6838_v61  ;;  %v6854_v13 = vadd.f32 %v2974_v28, %v6694_v6  ;;  %v6857_v63 = vadd.f32 %v3047_v3, %v6698_v8  ;;  %v6876_v8 = vsel %vm159_vm12, %v2969_v36, %v6701_v12 }
 0xb10   :  { %7611 = vst [vmem:[#allocation42_spill] sm:$0xff] %v6842_v46  ;;  %v3090_v43 = vsel %vm159_vm12, %v2939_v38, %v2973_v42  ;;  %v3092_v6 = vsel %vm5869_vm13, %v6820_v41, %v6842_v46  ;;  %7614 = vst [vmem:[#allocation51_spill] sm:$0xff] %v6876_v8  ;;  %v6900_v28 = vsel %vm159_vm12, %v2973_v42, %v2939_v38 }
 0xb11   :  { %7612 = vst [vmem:[#allocation48_spill] sm:$0xff] %v6854_v13  ;;  %7613 = vst [vmem:[#allocation43_spill] sm:$0xff] %v6857_v63  ;;  %v3091_v3 = vsel %vm5877_vm14, %v6828_v34, %v6854_v13  ;;  %v3093_v23 = vsel %vm5881_vm15, %v6832_v7, %v6857_v63 }
 0xb12   :  { %7615 = vst [vmem:[#allocation20_spill] sm:$0xff] %v6900_v28 }
 0xb13   :  { %v3408_v36 = vpop.f32.mrb[80].mxu0  ;;  %v3449_v8 = vpop.f32.mrb[72].mxu1 }
 0xb14   :  { %v3456_v45 = vadd.f32 %v3408_v36, %v3090_v43  ;;  %v3458_v38 = vadd.f32 %v3449_v8, %v3092_v6  ;;  %v3410_v42 = vpop.f32.mrb[81].mxu0  ;;  %v3451_v28 = vpop.f32.mrb[73].mxu1  ;;  %v7621_v36 = vld [vmem:[#allocation22_spill] sm:$0xff] }
 0xb15   :  { %v3457_v40 = vadd.f32 %v3410_v42, %v3091_v3  ;;  %v3459_v17 = vadd.f32 %v3451_v28, %v3093_v23  ;;  %v3412_v39 = vpop.f32.mrb[82].mxu0  ;;  %v3453_v0 = vpop.f32.mrb[74].mxu1  ;;  %v7619_v3 = vld [vmem:[#allocation35_spill] sm:$0xff] }
 0xb16   :  { %v4562_v41 = vmul.f32 -1.442695, %v3456_v45  ;;  %v3413_v46 = vpop.f32.mrb[83].mxu0  ;;  %v3454_v62 = vpop.f32.mrb[75].mxu1  ;;  %v4564_v29 = vmul.f32 -1.442695, %v3458_v38 }
 0xb17   :  { %v4563_v2 = vmul.f32 -1.442695, %v3457_v40  ;;  %v7622_v45 = vld [vmem:[#allocation23_spill] sm:$0xff] }
 0xb18   :  { %5117 = vpow2.f32 %v4562_v41  ;;  %v7616_v41 = vld [vmem:[#allocation18_spill] sm:$0xff] }
 0xb19   :  { %5119 = vpow2.f32 %v4563_v2 }
 0xb1a   :  { %5121 = vtanh.f32 %v3459_v17 }
 0xb1b   :  { %5123 = vpow2.f32 %v4564_v29  ;;  %v7617_v29 = vld [vmem:[#allocation19_spill] sm:$0xff] }
 0xb22   :  { %v5118_v34 = vpop.eup %5117 }
 0xb23   :  { %v3469_v13 = vadd.f32 1.0, %v5118_v34  ;;  %v5120_v12 = vpop.eup %5119 }
 0xb24   :  { %v3470_v43 = vadd.f32 1.0, %v5120_v12  ;;  %v5122_v6 = vpop.eup %5121  ;;  %v7620_v12 = vld [vmem:[#allocation29_spill] sm:$0xff] }
 0xb25   :  { %5125 = vrcp.f32 %v3469_v13  ;;  %v5124_v8 = vpop.eup %5123  ;;  %v7618_v13 = vld [vmem:[#allocation36_spill] sm:$0xff] }
 0xb26   :  { %5127 = vrcp.f32 %v3470_v43  ;;  %v3471_v28 = vadd.f32 1.0, %v5124_v8 }
 0xb28   :  { %5129 = vrcp.f32 %v3471_v28 }
 0xb2f   :  { %v5126_v23 = vpop.eup %5125 }
 0xb30   :  { %v3480_v39 = vmul.f32 %v5126_v23, %v5122_v6  ;;  %v5128_v0 = vpop.eup %5127  ;;  %v7623_v6 = vsel %vm5869_vm13, %v6704_v10, %v6824_v27 }
 0xb31   :  { %v3479_v46 = vmul.f32 0.0, %v5128_v0  ;;  %v7624_v0 = vsel %vm5877_vm14, %v6707_v19, %v6835_v60 }
 0xb32   :  { %v5130_v40 = vpop.eup %5129 }
 0xb33   :  { %v6914_v62 = vadd.f32 %v3480_v39, %v3479_v46  ;;  %v7625_v46 = vsel %vm5881_vm15, %v6710_v18, %v6838_v61 }
 0xb35   :  { %5131 = vtanh.f32 %v6914_v62 }
 0xb3f   :  { %v5132_v34 = vpop.eup %5131 }
 0xb40   :  { %v6917_v17 = vmul.f32 %v5132_v34, %v5130_v40 }
 0xb42   :  { %v3488_v2 = vpack.c.bf16 %v6917_v17, %v6917_v17 }
 0xb44   :  { %3522 = vmatmul.mubr.bf16.vlgmr.msra.gmra.mrb[84].mxu0 %v3488_v2  ;;  %3563 = vmatmul.mubr.bf16.vlgmr.msra.gmra.mrb[76].mxu1 %v3488_v2 }
 0xb45   :  { %3606 = vmatpush1.bf16.msra.mxu0 %v6526_v24  ;;  %3647 = vmatpush1.bf16.msra.mxu1 %v6528_v21 }
 0xb46   :  { %3607 = vmatprep.subr.bf16.mxu0 %v6537_v20  ;;  %3648 = vmatprep.subr.bf16.mxu1 %v6539_v35 }
 0xb47   :  { %3637 = vmatprep.mubr.bf16.mxu0 %v7515_v44  ;;  %3678 = vmatprep.mubr.bf16.mxu1 %v7515_v44 }
 0xb49   :  { %3608 = vmatpush1.bf16.msra.mxu0 %v6543_v25  ;;  %3649 = vmatpush1.bf16.msra.mxu1 %v6545_v30 }
 0xb4a   :  { %3609 = vmatprep.subr.bf16.mxu0 %v6549_v14  ;;  %3650 = vmatprep.subr.bf16.mxu1 %v6551_v15 }
 0xb4d   :  { %3610 = vmatpush1.bf16.msra.mxu0 %v6557_v9  ;;  %3651 = vmatpush1.bf16.msra.mxu1 %v6559_v48 }
 0xb4e   :  { %3611 = vmatprep.subr.bf16.mxu0 %v6563_v49  ;;  %3652 = vmatprep.subr.bf16.mxu1 %v6565_v50 }
 0xb51   :  { %3612 = vmatpush1.bf16.msra.mxu0 %v6571_v52  ;;  %3653 = vmatpush1.bf16.msra.mxu1 %v6573_v53 }
 0xb52   :  { %3613 = vmatprep.subr.bf16.mxu0 %v6577_v54  ;;  %3654 = vmatprep.subr.bf16.mxu1 %v6579_v51 }
 0xb55   :  { %3614 = vmatpush1.bf16.msra.mxu0 %v6585_v1  ;;  %3655 = vmatpush1.bf16.msra.mxu1 %v6587_v55 }
 0xb56   :  { %3615 = vmatprep.subr.bf16.mxu0 %v6591_v56  ;;  %3656 = vmatprep.subr.bf16.mxu1 %v6593_v57 }
 0xb59   :  { %3616 = vmatpush1.bf16.msra.mxu0 %v6599_v58  ;;  %3657 = vmatpush1.bf16.msra.mxu1 %v6601_v59 }
 0xb5a   :  { %3617 = vmatprep.subr.bf16.mxu0 %v6605_v22  ;;  %3658 = vmatprep.subr.bf16.mxu1 %v6607_v11 }
 0xb5d   :  { %3618 = vmatpush1.bf16.msra.mxu0 %v6613_v26  ;;  %3659 = vmatpush1.bf16.msra.mxu1 %v7616_v41 }
 0xb5e   :  { %3619 = vmatprep.subr.bf16.mxu0 %v7617_v29  ;;  %3660 = vmatprep.subr.bf16.mxu1 %v7618_v13 }
 0xb61   :  { %3620 = vmatpush1.bf16.msra.mxu0 %v7619_v3  ;;  %3661 = vmatpush1.bf16.msra.mxu1 %v7620_v12 }
 0xb62   :  { %3721 = vmatprep.subr.bf16.mxu0 %v7621_v36  ;;  %3762 = vmatprep.subr.bf16.mxu1 %v7622_v45 }
 0xc17   :  { %v3523_v38 = vpop.f32.mrb[84].mxu0  ;;  %v3564_v42 = vpop.f32.mrb[76].mxu1 }
 0xc18   :  { %v3571_v43 = vadd.f32 %v3523_v38, %v6847_v5  ;;  %v3573_v8 = vadd.f32 %v3564_v42, %v7623_v6  ;;  %v3525_v23 = vpop.f32.mrb[85].mxu0  ;;  %v3566_v39 = vpop.f32.mrb[77].mxu1 }
 0xc19   :  { %v3572_v28 = vadd.f32 %v3525_v23, %v7624_v0  ;;  %v3574_v5 = vadd.f32 %v3566_v39, %v7625_v46  ;;  %v3527_v40 = vpop.f32.mrb[86].mxu0  ;;  %v3568_v34 = vpop.f32.mrb[78].mxu1 }
 0xc1a   :  { %v4565_v2 = vmul.f32 -1.442695, %v3571_v43  ;;  %v3528_v38 = vpop.f32.mrb[87].mxu0  ;;  %v3569_v7 = vpop.f32.mrb[79].mxu1  ;;  %v4567_v6 = vmul.f32 -1.442695, %v3573_v8  ;;  %v7626_v34 = vsel %vm5869_vm13, %v6714_v32, %v6744_v33 }
 0xc1b   :  { %v4566_v42 = vmul.f32 -1.442695, %v3572_v28 }
 0xc1c   :  { %5133 = vpow2.f32 %v4565_v2 }
 0xc1d   :  { %5135 = vpow2.f32 %v4566_v42 }
 0xc1e   :  { %5137 = vtanh.f32 %v3574_v5 }
 0xc1f   :  { %5139 = vpow2.f32 %v4567_v6  ;;  %v7627_v6 = vld [vmem:[#allocation41_spill] sm:$0xff] }
 0xc26   :  { %v5134_v63 = vpop.eup %5133 }
 0xc27   :  { %v3584_v10 = vadd.f32 1.0, %v5134_v63  ;;  %v5136_v19 = vpop.eup %5135 }
 0xc28   :  { %v3585_v23 = vadd.f32 1.0, %v5136_v19  ;;  %v5138_v0 = vpop.eup %5137 }
 0xc29   :  { %5141 = vrcp.f32 %v3584_v10  ;;  %v5140_v18 = vpop.eup %5139 }
 0xc2a   :  { %5143 = vrcp.f32 %v3585_v23  ;;  %v3586_v43 = vadd.f32 1.0, %v5140_v18  ;;  %v7628_v23 = vsel %vm5877_vm14, %v6717_v47, %v7627_v6 }
 0xc2c   :  { %5145 = vrcp.f32 %v3586_v43 }
 0xc33   :  { %v5142_v39 = vpop.eup %5141 }
 0xc34   :  { %v3595_v46 = vmul.f32 %v5142_v39, %v5138_v0  ;;  %v5144_v40 = vpop.eup %5143  ;;  %v7629_v39 = vld [vmem:[#allocation34_spill] sm:$0xff] }
 0xc35   :  { %v3594_v7 = vmul.f32 %v5144_v40, %v6914_v62 }
 0xc36   :  { %v5146_v63 = vpop.eup %5145 }
 0xc37   :  { %v6972_v28 = vadd.f32 %v3595_v46, %v3594_v7  ;;  %v7630_v46 = vld [vmem:[#allocation25_spill] sm:$0xff] }
 0xc38   :  { %v7631_v40 = vsel %vm5881_vm15, %v7629_v39, %v7630_v46 }
 0xc39   :  { %5147 = vtanh.f32 %v6972_v28 }
 0xc43   :  { %v5148_v8 = vpop.eup %5147 }
 0xc44   :  { %v6975_v5 = vmul.f32 %v5148_v8, %v5146_v63 }
 0xc46   :  { %v3604_v10 = vpack.c.bf16 %v6975_v5, %v6975_v5 }
 0xc48   :  { %3638 = vmatmul.mubr.bf16.vlgmr.msra.gmra.mrb[88].mxu0 %v3604_v10  ;;  %3679 = vmatmul.mubr.bf16.vlgmr.msra.gmra.mrb[80].mxu1 %v3604_v10 }
 0xc49   :  { %3722 = vmatpush1.bf16.msra.mxu0 %v6526_v24  ;;  %3763 = vmatpush1.bf16.msra.mxu1 %v6528_v21 }
 0xc4a   :  { %3723 = vmatprep.subr.bf16.mxu0 %v6537_v20  ;;  %3764 = vmatprep.subr.bf16.mxu1 %v6539_v35 }
 0xc4b   :  { %3753 = vmatprep.mubr.bf16.mxu0 %v7515_v44  ;;  %3794 = vmatprep.mubr.bf16.mxu1 %v7515_v44 }
 0xc4d   :  { %3724 = vmatpush1.bf16.msra.mxu0 %v6543_v25  ;;  %3765 = vmatpush1.bf16.msra.mxu1 %v6545_v30 }
 0xc4e   :  { %3725 = vmatprep.subr.bf16.mxu0 %v6549_v14  ;;  %3766 = vmatprep.subr.bf16.mxu1 %v6551_v15 }
 0xc51   :  { %3726 = vmatpush1.bf16.msra.mxu0 %v6557_v9  ;;  %3767 = vmatpush1.bf16.msra.mxu1 %v6559_v48 }
 0xc52   :  { %3727 = vmatprep.subr.bf16.mxu0 %v6563_v49  ;;  %3768 = vmatprep.subr.bf16.mxu1 %v6565_v50 }
 0xc55   :  { %3728 = vmatpush1.bf16.msra.mxu0 %v6571_v52  ;;  %3769 = vmatpush1.bf16.msra.mxu1 %v6573_v53 }
 0xc56   :  { %3729 = vmatprep.subr.bf16.mxu0 %v6577_v54  ;;  %3770 = vmatprep.subr.bf16.mxu1 %v6579_v51 }
 0xc59   :  { %3730 = vmatpush1.bf16.msra.mxu0 %v6585_v1  ;;  %3771 = vmatpush1.bf16.msra.mxu1 %v6587_v55 }
 0xc5a   :  { %3731 = vmatprep.subr.bf16.mxu0 %v6591_v56  ;;  %3772 = vmatprep.subr.bf16.mxu1 %v6593_v57 }
 0xc5d   :  { %3732 = vmatpush1.bf16.msra.mxu0 %v6599_v58  ;;  %3773 = vmatpush1.bf16.msra.mxu1 %v6601_v59 }
 0xc5e   :  { %3733 = vmatprep.subr.bf16.mxu0 %v6605_v22  ;;  %3774 = vmatprep.subr.bf16.mxu1 %v6607_v11 }
 0xc61   :  { %3734 = vmatpush1.bf16.msra.mxu0 %v6613_v26  ;;  %3775 = vmatpush1.bf16.msra.mxu1 %v7616_v41 }
 0xc62   :  { %3735 = vmatprep.subr.bf16.mxu0 %v7617_v29  ;;  %3776 = vmatprep.subr.bf16.mxu1 %v7618_v13 }
 0xc65   :  { %3736 = vmatpush1.bf16.msra.mxu0 %v7619_v3  ;;  %3777 = vmatpush1.bf16.msra.mxu1 %v7620_v12 }
 0xc66   :  { %3837 = vmatprep.subr.bf16.mxu0 %v7621_v36  ;;  %3878 = vmatprep.subr.bf16.mxu1 %v7622_v45 }
 0xd1b   :  { %v3639_v19 = vpop.f32.mrb[88].mxu0  ;;  %v3680_v18 = vpop.f32.mrb[80].mxu1 }
 0xd1c   :  { %v3687_v62 = vadd.f32 %v3639_v19, %v6770_v4  ;;  %v3689_v2 = vadd.f32 %v3680_v18, %v7626_v34  ;;  %v3641_v38 = vpop.f32.mrb[89].mxu0  ;;  %v3682_v42 = vpop.f32.mrb[81].mxu1 }
 0xd1d   :  { %v3688_v0 = vadd.f32 %v3641_v38, %v7628_v23  ;;  %v3690_v4 = vadd.f32 %v3682_v42, %v7631_v40  ;;  %v3643_v43 = vpop.f32.mrb[90].mxu0  ;;  %v3684_v7 = vpop.f32.mrb[82].mxu1 }
 0xd1e   :  { %v4568_v63 = vmul.f32 -1.442695, %v3687_v62  ;;  %v3644_v8 = vpop.f32.mrb[91].mxu0  ;;  %v3685_v10 = vpop.f32.mrb[83].mxu1  ;;  %v4570_v18 = vmul.f32 -1.442695, %v3689_v2 }
 0xd1f   :  { %v4569_v19 = vmul.f32 -1.442695, %v3688_v0  ;;  %v7633_v10 = vld [vmem:[#allocation38_spill] sm:$0xff] }
 0xd20   :  { %5149 = vpow2.f32 %v4568_v63 }
 0xd21   :  { %5151 = vpow2.f32 %v4569_v19  ;;  %v7634_v19 = vld [vmem:[#allocation28_spill] sm:$0xff] }
 0xd22   :  { %5153 = vtanh.f32 %v3690_v4 }
 0xd23   :  { %5155 = vpow2.f32 %v4570_v18  ;;  %v7635_v18 = vsel %vm5869_vm13, %v7633_v10, %v7634_v19 }
 0xd2a   :  { %v5150_v34 = vpop.eup %5149 }
 0xd2b   :  { %v3700_v61 = vadd.f32 1.0, %v5150_v34  ;;  %v5152_v60 = vpop.eup %5151 }
 0xd2c   :  { %v3701_v38 = vadd.f32 1.0, %v5152_v60  ;;  %v5154_v23 = vpop.eup %5153 }
 0xd2d   :  { %5157 = vrcp.f32 %v3700_v61  ;;  %v5156_v27 = vpop.eup %5155  ;;  %v3599_v61 = vmax.f32 %v6917_v17, %v6975_v5 }
 0xd2e   :  { %5159 = vrcp.f32 %v3701_v38  ;;  %v3702_v62 = vadd.f32 1.0, %v5156_v27 }
 0xd30   :  { %5161 = vrcp.f32 %v3702_v62  ;;  %v7640_v62 = vld [vmem:[#allocation21_spill] sm:$0xff] }
 0xd37   :  { %v5158_v42 = vpop.eup %5157 }
 0xd38   :  { %v3711_v40 = vmul.f32 %v5158_v42, %v5154_v23  ;;  %v5160_v43 = vpop.eup %5159  ;;  %v7636_v42 = vld [vmem:[#allocation39_spill] sm:$0xff] }
 0xd39   :  { %v3710_v7 = vmul.f32 %v5160_v43, %v6972_v28  ;;  %v7632_v28 = vld [vmem:[#allocation49_spill] sm:$0xff] }
 0xd3a   :  { %v5162_v2 = vpop.eup %5161 }
 0xd3b   :  { %v7030_v0 = vadd.f32 %v3711_v40, %v3710_v7  ;;  %v7637_v40 = vld [vmem:[#allocation17_spill] sm:$0xff] }
 0xd3c   :  { %v7638_v43 = vsel %vm5877_vm14, %v7636_v42, %v7637_v40 }
 0xd3d   :  { %5163 = vtanh.f32 %v7030_v0 }
 0xd47   :  { %v5164_v4 = vpop.eup %5163 }
 0xd48   :  { %v3714_v60 = vmul.f32 %v5164_v4, %v5162_v2 }
 0xd4a   :  { %v7035_v63 = vmax.f32 %v3599_v61, %v3714_v60  ;;  %v3720_v8 = vpack.c.bf16 %v3714_v60, %v3714_v60 }
 0xd4c   :  { %3754 = vmatmul.mubr.bf16.vlgmr.msra.gmra.mrb[92].mxu0 %v3720_v8  ;;  %3795 = vmatmul.mubr.bf16.vlgmr.msra.gmra.mrb[84].mxu1 %v3720_v8 }
 0xd4d   :  { %3838 = vmatpush1.bf16.msra.mxu0 %v6526_v24  ;;  %3879 = vmatpush1.bf16.msra.mxu1 %v6528_v21 }
 0xd4e   :  { %3839 = vmatprep.subr.bf16.mxu0 %v6537_v20  ;;  %3880 = vmatprep.subr.bf16.mxu1 %v6539_v35 }
 0xd4f   :  { %3869 = vmatprep.mubr.bf16.mxu0 %v7515_v44  ;;  %3910 = vmatprep.mubr.bf16.mxu1 %v7515_v44 }
 0xd51   :  { %3840 = vmatpush1.bf16.msra.mxu0 %v6543_v25  ;;  %3881 = vmatpush1.bf16.msra.mxu1 %v6545_v30 }
 0xd52   :  { %3841 = vmatprep.subr.bf16.mxu0 %v6549_v14  ;;  %3882 = vmatprep.subr.bf16.mxu1 %v6551_v15 }
 0xd55   :  { %3842 = vmatpush1.bf16.msra.mxu0 %v6557_v9  ;;  %3883 = vmatpush1.bf16.msra.mxu1 %v6559_v48 }
 0xd56   :  { %3843 = vmatprep.subr.bf16.mxu0 %v6563_v49  ;;  %3884 = vmatprep.subr.bf16.mxu1 %v6565_v50 }
 0xd59   :  { %3844 = vmatpush1.bf16.msra.mxu0 %v6571_v52  ;;  %3885 = vmatpush1.bf16.msra.mxu1 %v6573_v53 }
 0xd5a   :  { %3845 = vmatprep.subr.bf16.mxu0 %v6577_v54  ;;  %3886 = vmatprep.subr.bf16.mxu1 %v6579_v51 }
 0xd5d   :  { %3846 = vmatpush1.bf16.msra.mxu0 %v6585_v1  ;;  %3887 = vmatpush1.bf16.msra.mxu1 %v6587_v55 }
 0xd5e   :  { %3847 = vmatprep.subr.bf16.mxu0 %v6591_v56  ;;  %3888 = vmatprep.subr.bf16.mxu1 %v6593_v57 }
 0xd61   :  { %3848 = vmatpush1.bf16.msra.mxu0 %v6599_v58  ;;  %3889 = vmatpush1.bf16.msra.mxu1 %v6601_v59 }
 0xd62   :  { %3849 = vmatprep.subr.bf16.mxu0 %v6605_v22  ;;  %3890 = vmatprep.subr.bf16.mxu1 %v6607_v11 }
 0xd65   :  { %3850 = vmatpush1.bf16.msra.mxu0 %v6613_v26  ;;  %3891 = vmatpush1.bf16.msra.mxu1 %v7616_v41 }
 0xd66   :  { %3851 = vmatprep.subr.bf16.mxu0 %v7617_v29  ;;  %3892 = vmatprep.subr.bf16.mxu1 %v7618_v13 }
 0xd69   :  { %3852 = vmatpush1.bf16.msra.mxu0 %v7619_v3  ;;  %3893 = vmatpush1.bf16.msra.mxu1 %v7620_v12 }
 0xd6a   :  { %3953 = vmatprep.subr.bf16.mxu0 %v7621_v36  ;;  %3994 = vmatprep.subr.bf16.mxu1 %v7622_v45  ;;  %v7639_v45 = vld [vmem:[#allocation37_spill] sm:$0xff] }
 0xd6b   :  { %v7641_v7 = vsel %vm5881_vm15, %v7639_v45, %v7640_v62 }
 0xe1f   :  { %v3755_v27 = vpop.f32.mrb[92].mxu0  ;;  %v3796_v17 = vpop.f32.mrb[84].mxu1 }
 0xe20   :  { %v3803_v5 = vadd.f32 %v3755_v27, %v7632_v28  ;;  %v3805_v34 = vadd.f32 %v3796_v17, %v7635_v18  ;;  %v3757_v38 = vpop.f32.mrb[93].mxu0  ;;  %v3798_v23 = vpop.f32.mrb[85].mxu1 }
 0xe21   :  { %v3804_v36 = vadd.f32 %v3757_v38, %v7638_v43  ;;  %v3806_v2 = vadd.f32 %v3798_v23, %v7641_v7  ;;  %v3759_v4 = vpop.f32.mrb[94].mxu0  ;;  %v3800_v61 = vpop.f32.mrb[86].mxu1 }
 0xe22   :  { %v4571_v60 = vmul.f32 -1.442695, %v3803_v5  ;;  %v3760_v8 = vpop.f32.mrb[95].mxu0  ;;  %v3801_v27 = vpop.f32.mrb[87].mxu1  ;;  %v4573_v28 = vmul.f32 -1.442695, %v3805_v34 }
 0xe23   :  { %v4572_v17 = vmul.f32 -1.442695, %v3804_v36  ;;  %v7160_v8 = vld [vmem:[#allocation13] ss:$16 sps:$4 sm:$0xff]   ;;  %v7163_v27 = vld [vmem:[#allocation13 + $0x8] ss:$16 sps:$4 sm:$0xff]  }
 0xe24   :  { %5165 = vpow2.f32 %v4571_v60 }
 0xe25   :  { %5167 = vpow2.f32 %v4572_v17  ;;  %v7166_v17 = vld [vmem:[#allocation13 + $0x24] ss:$16 sps:$4 sm:$0xff]  }
 0xe26   :  { %5169 = vtanh.f32 %v3806_v2 }
 0xe27   :  { %5171 = vpow2.f32 %v4573_v28  ;;  %v7169_v28 = vld [vmem:[#allocation13 + $0x2c] ss:$16 sps:$4 sm:$0xff]  }
 0xe2e   :  { %v5166_v18 = vpop.eup %5165 }
 0xe2f   :  { %v3816_v39 = vadd.f32 1.0, %v5166_v18  ;;  %v5168_v46 = vpop.eup %5167  ;;  %v7177_v18 = vld [vmem:[#allocation13 + $0x28] ss:$16 sps:$4 sm:$0xff]  }
 0xe30   :  { %v3817_v38 = vadd.f32 1.0, %v5168_v46  ;;  %v5170_v43 = vpop.eup %5169 }
 0xe31   :  { %5173 = vrcp.f32 %v3816_v39  ;;  %v5172_v47 = vpop.eup %5171 }
 0xe32   :  { %5175 = vrcp.f32 %v3817_v38  ;;  %v3818_v5 = vadd.f32 1.0, %v5172_v47  ;;  %v7180_v38 = vld [vmem:[#allocation13 + $0x44] ss:$16 sps:$4 sm:$0xff]  }
 0xe34   :  { %5177 = vrcp.f32 %v3818_v5  ;;  %v7195_v5 = vld [vmem:[#allocation13 + $0x6c] ss:$16 sps:$4 sm:$0xff]  }
 0xe3b   :  { %v5174_v23 = vpop.eup %5173 }
 0xe3c   :  { %v3827_v7 = vmul.f32 %v5174_v23, %v5170_v43  ;;  %v5176_v4 = vpop.eup %5175  ;;  %v7183_v43 = vld [vmem:[#allocation13 + $0x4c] ss:$16 sps:$4 sm:$0xff]   ;;  %v7186_v23 = vld [vmem:[#allocation13 + $0x40] ss:$16 sps:$4 sm:$0xff]  }
 0xe3d   :  { %v3826_v61 = vmul.f32 %v5176_v4, %v7030_v0  ;;  %v7192_v4 = vld [vmem:[#allocation13 + $0x64] ss:$16 sps:$4 sm:$0xff]  }
 0xe3e   :  { %v5178_v34 = vpop.eup %5177 }
 0xe3f   :  { %v7088_v36 = vadd.f32 %v3827_v7, %v3826_v61  ;;  %v7189_v7 = vld [vmem:[#allocation13 + $0x48] ss:$16 sps:$4 sm:$0xff]   ;;  %v7198_v61 = vld [vmem:[#allocation13 + $0x60] ss:$16 sps:$4 sm:$0xff]  }
 0xe41   :  { %5179 = vtanh.f32 %v7088_v36 }
 0xe4b   :  { %v5180_v2 = vpop.eup %5179 }
 0xe4c   :  { %v7091_v60 = vmul.f32 %v5180_v2, %v5178_v34  ;;  %v7204_v34 = vld [vmem:[#allocation13 + $0x84] ss:$16 sps:$4 sm:$0xff]   ;;  %v7207_v2 = vld [vmem:[#allocation13 + $0x8c] ss:$16 sps:$4 sm:$0xff]  }
 0xe4e   :  { %v3836_v39 = vpack.c.bf16 %v7091_v60, %v7091_v60  ;;  %v3831_v46 = vmax.f32 %v7035_v63, %v7091_v60  ;;  %v7174_v63 = vld [vmem:[#allocation13 + $0x20] ss:$16 sps:$4 sm:$0xff]  }
 0xe4f   :  { %v7210_v60 = vld [vmem:[#allocation13 + $0x80] ss:$16 sps:$4 sm:$0xff]  }
 0xe50   :  { %3870 = vmatmul.mubr.bf16.vlgmr.msra.gmra.mrb[96].mxu0 %v3836_v39  ;;  %3911 = vmatmul.mubr.bf16.vlgmr.msra.gmra.mrb[88].mxu1 %v3836_v39  ;;  %v7213_v39 = vld [vmem:[#allocation13 + $0x88] ss:$16 sps:$4 sm:$0xff]  }
 0xe51   :  { %3954 = vmatpush1.bf16.msra.mxu0 %v6526_v24  ;;  %3995 = vmatpush1.bf16.msra.mxu1 %v6528_v21  ;;  %v7129_v24 = vld [vmem:[#allocation13 + $0x4] ss:$16 sps:$4 sm:$0xff]   ;;  %v7132_v21 = vld [vmem:[#allocation13 + $0xc] ss:$16 sps:$4 sm:$0xff]  }
 0xe52   :  { %3955 = vmatprep.subr.bf16.mxu0 %v6537_v20  ;;  %3996 = vmatprep.subr.bf16.mxu1 %v6539_v35 }
 0xe53   :  { %3985 = vmatprep.mubr.bf16.mxu0 %v7515_v44  ;;  %4026 = vmatprep.mubr.bf16.mxu1 %v7515_v44 }
 0xe55   :  { %3956 = vmatpush1.bf16.msra.mxu0 %v6543_v25  ;;  %3997 = vmatpush1.bf16.msra.mxu1 %v6545_v30  ;;  %v7642_v25 = vld [vmem:[#allocation44_spill] sm:$0xff] }
 0xe56   :  { %3957 = vmatprep.subr.bf16.mxu0 %v6549_v14  ;;  %3998 = vmatprep.subr.bf16.mxu1 %v6551_v15  ;;  %v7643_v14 = vsel %vm5869_vm13, %v7634_v19, %v7633_v10 }
 0xe59   :  { %3958 = vmatpush1.bf16.msra.mxu0 %v6557_v9  ;;  %3999 = vmatpush1.bf16.msra.mxu1 %v6559_v48 }
 0xe5a   :  { %3959 = vmatprep.subr.bf16.mxu0 %v6563_v49  ;;  %4000 = vmatprep.subr.bf16.mxu1 %v6565_v50  ;;  %v7644_v49 = vsel %vm5877_vm14, %v7637_v40, %v7636_v42 }
 0xe5d   :  { %3960 = vmatpush1.bf16.msra.mxu0 %v6571_v52  ;;  %4001 = vmatpush1.bf16.msra.mxu1 %v6573_v53  ;;  %v7645_v52 = vsel %vm5881_vm15, %v7640_v62, %v7639_v45 }
 0xe5e   :  { %3961 = vmatprep.subr.bf16.mxu0 %v6577_v54  ;;  %4002 = vmatprep.subr.bf16.mxu1 %v6579_v51 }
 0xe61   :  { %3962 = vmatpush1.bf16.msra.mxu0 %v6585_v1  ;;  %4003 = vmatpush1.bf16.msra.mxu1 %v6587_v55 }
 0xe62   :  { %3963 = vmatprep.subr.bf16.mxu0 %v6591_v56  ;;  %4004 = vmatprep.subr.bf16.mxu1 %v6593_v57 }
 0xe65   :  { %3964 = vmatpush1.bf16.msra.mxu0 %v6599_v58  ;;  %4005 = vmatpush1.bf16.msra.mxu1 %v6601_v59 }
 0xe66   :  { %3965 = vmatprep.subr.bf16.mxu0 %v6605_v22  ;;  %4006 = vmatprep.subr.bf16.mxu1 %v6607_v11 }
 0xe69   :  { %3966 = vmatpush1.bf16.msra.mxu0 %v6613_v26  ;;  %4007 = vmatpush1.bf16.msra.mxu1 %v7616_v41 }
 0xe6a   :  { %3967 = vmatprep.subr.bf16.mxu0 %v7617_v29  ;;  %4008 = vmatprep.subr.bf16.mxu1 %v7618_v13 }
 0xe6d   :  { %3968 = vmatpush1.bf16.msra.mxu0 %v7619_v3  ;;  %4009 = vmatpush1.bf16.msra.mxu1 %v7620_v12 }
 0xe6e   :  { %4069 = vmatprep.subr.bf16.mxu0 %v7129_v24  ;;  %4110 = vmatprep.subr.bf16.mxu1 %v7132_v21 }
 0xf23   :  { %v3871_v20 = vpop.f32.mrb[96].mxu0  ;;  %v3912_v35 = vpop.f32.mrb[88].mxu1 }
 0xf24   :  { %v3919_v30 = vadd.f32 %v3871_v20, %v7642_v25  ;;  %v3921_v15 = vadd.f32 %v3912_v35, %v7643_v14  ;;  %v3873_v9 = vpop.f32.mrb[97].mxu0  ;;  %v3914_v48 = vpop.f32.mrb[89].mxu1  ;;  %v7219_v20 = vld [vmem:[#allocation13 + $0xac] ss:$16 sps:$4 sm:$0xff]   ;;  %v7222_v35 = vld [vmem:[#allocation13 + $0xa0] ss:$16 sps:$4 sm:$0xff]  }
 0xf25   :  { %v3920_v50 = vadd.f32 %v3873_v9, %v7644_v49  ;;  %v3922_v53 = vadd.f32 %v3914_v48, %v7645_v52  ;;  %v3875_v54 = vpop.f32.mrb[98].mxu0  ;;  %v3916_v51 = vpop.f32.mrb[90].mxu1  ;;  %v7225_v25 = vld [vmem:[#allocation13 + $0xa8] ss:$16 sps:$4 sm:$0xff]   ;;  %v7231_v14 = vld [vmem:[#allocation13 + $0xcc] ss:$16 sps:$4 sm:$0xff]  }
 0xf26   :  { %v4574_v1 = vmul.f32 -1.442695, %v3919_v30  ;;  %v3876_v55 = vpop.f32.mrb[99].mxu0  ;;  %v3917_v56 = vpop.f32.mrb[91].mxu1  ;;  %v4576_v58 = vmul.f32 -1.442695, %v3921_v15 }
 0xf27   :  { %v4575_v57 = vmul.f32 -1.442695, %v3920_v50  ;;  %v7228_v30 = vld [vmem:[#allocation13 + $0xc4] ss:$16 sps:$4 sm:$0xff]   ;;  %v7234_v15 = vld [vmem:[#allocation13 + $0xc0] ss:$16 sps:$4 sm:$0xff]   ;;  %v7647_v55 = vsel %vm5869_vm13, %v6744_v33, %v6714_v32 }
 0xf28   :  { %5181 = vpow2.f32 %v4574_v1  ;;  %v7237_v9 = vld [vmem:[#allocation13 + $0xc8] ss:$16 sps:$4 sm:$0xff]   ;;  %v7240_v48 = vld [vmem:[#allocation13 + $0xe4] ss:$16 sps:$4 sm:$0xff]   ;;  %v7243_v49 = vld [vmem:[#allocation13 + $0xec] ss:$16 sps:$4 sm:$0xff]  }
 0xf29   :  { %5183 = vpow2.f32 %v4575_v57  ;;  %v7246_v50 = vld [vmem:[#allocation13 + $0xe0] ss:$16 sps:$4 sm:$0xff]   ;;  %v7249_v52 = vld [vmem:[#allocation13 + $0xe8] ss:$16 sps:$4 sm:$0xff]  }
 0xf2a   :  { %5185 = vtanh.f32 %v3922_v53  ;;  %v7646_v51 = vld [vmem:[#allocation26_spill] sm:$0xff] }
 0xf2b   :  { %5187 = vpow2.f32 %v4576_v58 }
 0xf32   :  { %v5182_v59 = vpop.eup %5181 }
 0xf33   :  { %v3932_v22 = vadd.f32 1.0, %v5182_v59  ;;  %v5184_v11 = vpop.eup %5183  ;;  %v7648_v59 = vld [vmem:[#allocation31_spill] sm:$0xff] }
 0xf34   :  { %v3933_v26 = vadd.f32 1.0, %v5184_v11  ;;  %v5186_v47 = vpop.eup %5185  ;;  %v7651_v11 = vld [vmem:[#allocation34_spill] sm:$0xff] }
 0xf35   :  { %5189 = vrcp.f32 %v3932_v22  ;;  %v5188_v41 = vpop.eup %5187  ;;  %v7649_v22 = vsel %vm5877_vm14, %v7627_v6, %v7648_v59 }
 0xf36   :  { %5191 = vrcp.f32 %v3933_v26  ;;  %v3934_v12 = vadd.f32 1.0, %v5188_v41 }
 0xf38   :  { %5193 = vrcp.f32 %v3934_v12 }
 0xf3f   :  { %v5190_v29 = vpop.eup %5189 }
 0xf40   :  { %v3943_v13 = vmul.f32 %v5190_v29, %v5186_v47  ;;  %v5192_v3 = vpop.eup %5191 }
 0xf41   :  { %v3942_v0 = vmul.f32 %v5192_v3, %v7088_v36  ;;  %v7201_v36 = vld [vmem:[#allocation13 + $0x68] ss:$16 sps:$4 sm:$0xff]  }
 0xf42   :  { %v5194_v19 = vpop.eup %5193 }
 0xf43   :  { %v7152_v10 = vadd.f32 %v3943_v13, %v3942_v0 }
 0xf45   :  { %5195 = vtanh.f32 %v7152_v10 }
 0xf4f   :  { %v5196_v42 = vpop.eup %5195 }
 0xf50   :  { %v3946_v40 = vmul.f32 %v5196_v42, %v5194_v19 }
 0xf52   :  { %v3952_v45 = vpack.c.bf16 %v3946_v40, %v3946_v40  ;;  %v7158_v62 = vmax.f32 %v3831_v46, %v3946_v40  ;;  %v7216_v46 = vld [vmem:[#allocation13 + $0xa4] ss:$16 sps:$4 sm:$0xff]  }
 0xf54   :  { %3986 = vmatmul.mubr.bf16.vlgmr.msra.gmra.mrb[100].mxu0 %v3952_v45  ;;  %4027 = vmatmul.mubr.bf16.vlgmr.msra.gmra.mrb[92].mxu1 %v3952_v45 }
 0xf55   :  { %4070 = vmatpush1.bf16.msra.mxu0 %v7160_v8  ;;  %4111 = vmatpush1.bf16.msra.mxu1 %v7163_v27 }
 0xf56   :  { %4071 = vmatprep.subr.bf16.mxu0 %v7166_v17  ;;  %4112 = vmatprep.subr.bf16.mxu1 %v7169_v28 }
 0xf57   :  { %4101 = vmatprep.mubr.bf16.mxu0 %v7515_v44  ;;  %4142 = vmatprep.mubr.bf16.mxu1 %v7515_v44 }
 0xf59   :  { %4072 = vmatpush1.bf16.msra.mxu0 %v7174_v63  ;;  %4113 = vmatpush1.bf16.msra.mxu1 %v7177_v18 }
 0xf5a   :  { %4073 = vmatprep.subr.bf16.mxu0 %v7180_v38  ;;  %4114 = vmatprep.subr.bf16.mxu1 %v7183_v43 }
 0xf5d   :  { %4074 = vmatpush1.bf16.msra.mxu0 %v7186_v23  ;;  %4115 = vmatpush1.bf16.msra.mxu1 %v7189_v7 }
 0xf5e   :  { %4075 = vmatprep.subr.bf16.mxu0 %v7192_v4  ;;  %4116 = vmatprep.subr.bf16.mxu1 %v7195_v5 }
 0xf61   :  { %4076 = vmatpush1.bf16.msra.mxu0 %v7198_v61  ;;  %4117 = vmatpush1.bf16.msra.mxu1 %v7201_v36 }
 0xf62   :  { %4077 = vmatprep.subr.bf16.mxu0 %v7204_v34  ;;  %4118 = vmatprep.subr.bf16.mxu1 %v7207_v2 }
 0xf65   :  { %4078 = vmatpush1.bf16.msra.mxu0 %v7210_v60  ;;  %4119 = vmatpush1.bf16.msra.mxu1 %v7213_v39 }
 0xf66   :  { %4079 = vmatprep.subr.bf16.mxu0 %v7216_v46  ;;  %4120 = vmatprep.subr.bf16.mxu1 %v7219_v20 }
 0xf69   :  { %4080 = vmatpush1.bf16.msra.mxu0 %v7222_v35  ;;  %4121 = vmatpush1.bf16.msra.mxu1 %v7225_v25 }
 0xf6a   :  { %4081 = vmatprep.subr.bf16.mxu0 %v7228_v30  ;;  %4122 = vmatprep.subr.bf16.mxu1 %v7231_v14 }
 0xf6d   :  { %4082 = vmatpush1.bf16.msra.mxu0 %v7234_v15  ;;  %4123 = vmatpush1.bf16.msra.mxu1 %v7237_v9 }
 0xf6e   :  { %4083 = vmatprep.subr.bf16.mxu0 %v7240_v48  ;;  %4124 = vmatprep.subr.bf16.mxu1 %v7243_v49 }
 0xf71   :  { %4084 = vmatpush1.bf16.msra.mxu0 %v7246_v50  ;;  %4125 = vmatpush1.bf16.msra.mxu1 %v7249_v52 }
 0xf72   :  { %4185 = vmatprep.subr.bf16.mxu0 %v7129_v24  ;;  %4226 = vmatprep.subr.bf16.mxu1 %v7132_v21  ;;  %v7650_v21 = vld [vmem:[#allocation25_spill] sm:$0xff] }
 0xf73   :  { %v7652_v26 = vsel %vm5881_vm15, %v7650_v21, %v7651_v11 }
0x1027   :  { %v3987_v53 = vpop.f32.mrb[100].mxu0  ;;  %v4028_v54 = vpop.f32.mrb[92].mxu1 }
0x1028   :  { %v4035_v1 = vadd.f32 %v3987_v53, %v7646_v51  ;;  %v4037_v56 = vadd.f32 %v4028_v54, %v7647_v55  ;;  %v3989_v57 = vpop.f32.mrb[101].mxu0  ;;  %v4030_v58 = vpop.f32.mrb[93].mxu1 }
0x1029   :  { %v4036_v24 = vadd.f32 %v3989_v57, %v7649_v22  ;;  %v4038_v47 = vadd.f32 %v4030_v58, %v7652_v26  ;;  %v3991_v41 = vpop.f32.mrb[102].mxu0  ;;  %v4032_v29 = vpop.f32.mrb[94].mxu1 }
0x102a   :  { %v4577_v13 = vmul.f32 -1.442695, %v4035_v1  ;;  %v3992_v3 = vpop.f32.mrb[103].mxu0  ;;  %v4033_v33 = vpop.f32.mrb[95].mxu1  ;;  %v4579_v12 = vmul.f32 -1.442695, %v4037_v56 }
0x102b   :  { %v4578_v32 = vmul.f32 -1.442695, %v4036_v24 }
0x102c   :  { %5197 = vpow2.f32 %v4577_v13 }
0x102d   :  { %5199 = vpow2.f32 %v4578_v32 }
0x102e   :  { %5201 = vtanh.f32 %v4038_v47 }
0x102f   :  { %5203 = vpow2.f32 %v4579_v12 }
0x1036   :  { %v5198_v0 = vpop.eup %5197 }
0x1037   :  { %v4048_v19 = vadd.f32 1.0, %v5198_v0  ;;  %v5200_v6 = vpop.eup %5199 }
0x1038   :  { %v4049_v42 = vadd.f32 1.0, %v5200_v6  ;;  %v5202_v40 = vpop.eup %5201 }
0x1039   :  { %5205 = vrcp.f32 %v4048_v19  ;;  %v5204_v45 = vpop.eup %5203  ;;  %v7663_v19 = vld [vmem:[#allocation20_spill] sm:$0xff] }
0x103a   :  { %5207 = vrcp.f32 %v4049_v42  ;;  %v4050_v1 = vadd.f32 1.0, %v5204_v45  ;;  %v7664_v42 = vld [vmem:[#allocation42_spill] sm:$0xff] }
0x103c   :  { %5209 = vrcp.f32 %v4050_v1  ;;  %v7667_v1 = vld [vmem:[#allocation48_spill] sm:$0xff] }
0x1043   :  { %v5206_v53 = vpop.eup %5205 }
0x1044   :  { %v4059_v54 = vmul.f32 %v5206_v53, %v5202_v40  ;;  %v5208_v51 = vpop.eup %5207  ;;  %v7665_v40 = vld [vmem:[#allocation45_spill] sm:$0xff] }
0x1045   :  { %v4058_v55 = vmul.f32 %v5208_v51, %v7152_v10  ;;  %v7666_v45 = vsel %vm5869_vm13, %v7664_v42, %v7665_v40 }
0x1046   :  { %v5210_v56 = vpop.eup %5209 }
0x1047   :  { %v7271_v57 = vadd.f32 %v4059_v54, %v4058_v55  ;;  %v7668_v55 = vld [vmem:[#allocation50_spill] sm:$0xff] }
0x1049   :  { %5211 = vtanh.f32 %v7271_v57 }
0x1053   :  { %v5212_v58 = vpop.eup %5211 }
0x1054   :  { %v7274_v59 = vmul.f32 %v5212_v58, %v5210_v56  ;;  %v7670_v56 = vld [vmem:[#allocation43_spill] sm:$0xff]  ;;  %v7671_v58 = vld [vmem:[#allocation46_spill] sm:$0xff] }
0x1056   :  { %v4068_v22 = vpack.c.bf16 %v7274_v59, %v7274_v59  ;;  %v4063_v24 = vmax.f32 %v7158_v62, %v7274_v59  ;;  %v7669_v62 = vsel %vm5877_vm14, %v7667_v1, %v7668_v55  ;;  %v7672_v59 = vsel %vm5881_vm15, %v7670_v56, %v7671_v58 }
0x1058   :  { %4102 = vmatmul.mubr.bf16.vlgmr.msra.gmra.mrb[104].mxu0 %v4068_v22  ;;  %4143 = vmatmul.mubr.bf16.vlgmr.msra.gmra.mrb[96].mxu1 %v4068_v22 }
0x1059   :  { %4186 = vmatpush1.bf16.msra.mxu0 %v7160_v8  ;;  %4227 = vmatpush1.bf16.msra.mxu1 %v7163_v27  ;;  %v7653_v8 = vld [vmem:[#allocation51_spill] sm:$0xff] }
0x105a   :  { %4187 = vmatprep.subr.bf16.mxu0 %v7166_v17  ;;  %4228 = vmatprep.subr.bf16.mxu1 %v7169_v28  ;;  %v7654_v17 = vld [vmem:[#allocation27_spill] sm:$0xff]  ;;  %v7655_v28 = vld [vmem:[#allocation32_spill] sm:$0xff] }
0x105b   :  { %4217 = vmatprep.mubr.bf16.mxu0 %v7515_v44  ;;  %4258 = vmatprep.mubr.bf16.mxu1 %v7515_v44 }
0x105d   :  { %4188 = vmatpush1.bf16.msra.mxu0 %v7174_v63  ;;  %4229 = vmatpush1.bf16.msra.mxu1 %v7177_v18  ;;  %v7656_v63 = vsel %vm5869_vm13, %v7654_v17, %v7655_v28 }
0x105e   :  { %4189 = vmatprep.subr.bf16.mxu0 %v7180_v38  ;;  %4230 = vmatprep.subr.bf16.mxu1 %v7183_v43 }
0x1061   :  { %4190 = vmatpush1.bf16.msra.mxu0 %v7186_v23  ;;  %4231 = vmatpush1.bf16.msra.mxu1 %v7189_v7  ;;  %v7657_v23 = vld [vmem:[#allocation40_spill] sm:$0xff]  ;;  %v7658_v7 = vld [vmem:[#allocation30_spill] sm:$0xff] }
0x1062   :  { %4191 = vmatprep.subr.bf16.mxu0 %v7192_v4  ;;  %4232 = vmatprep.subr.bf16.mxu1 %v7195_v5  ;;  %v7659_v4 = vsel %vm5877_vm14, %v7657_v23, %v7658_v7 }
0x1065   :  { %4192 = vmatpush1.bf16.msra.mxu0 %v7198_v61  ;;  %4233 = vmatpush1.bf16.msra.mxu1 %v7201_v36  ;;  %v7660_v61 = vld [vmem:[#allocation47_spill] sm:$0xff]  ;;  %v7661_v36 = vld [vmem:[#allocation33_spill] sm:$0xff] }
0x1066   :  { %4193 = vmatprep.subr.bf16.mxu0 %v7204_v34  ;;  %4234 = vmatprep.subr.bf16.mxu1 %v7207_v2  ;;  %v7662_v34 = vsel %vm5881_vm15, %v7660_v61, %v7661_v36 }
0x1069   :  { %4194 = vmatpush1.bf16.msra.mxu0 %v7210_v60  ;;  %4235 = vmatpush1.bf16.msra.mxu1 %v7213_v39 }
0x106a   :  { %4195 = vmatprep.subr.bf16.mxu0 %v7216_v46  ;;  %4236 = vmatprep.subr.bf16.mxu1 %v7219_v20 }
0x106d   :  { %4196 = vmatpush1.bf16.msra.mxu0 %v7222_v35  ;;  %4237 = vmatpush1.bf16.msra.mxu1 %v7225_v25 }
0x106e   :  { %4197 = vmatprep.subr.bf16.mxu0 %v7228_v30  ;;  %4238 = vmatprep.subr.bf16.mxu1 %v7231_v14 }
0x1071   :  { %4198 = vmatpush1.bf16.msra.mxu0 %v7234_v15  ;;  %4239 = vmatpush1.bf16.msra.mxu1 %v7237_v9 }
0x1072   :  { %4199 = vmatprep.subr.bf16.mxu0 %v7240_v48  ;;  %4240 = vmatprep.subr.bf16.mxu1 %v7243_v49 }
0x1075   :  { %4200 = vmatpush1.bf16.msra.mxu0 %v7246_v50  ;;  %4241 = vmatpush1.bf16.msra.mxu1 %v7249_v52 }
0x112b   :  { %v4103_v44 = vpop.f32.mrb[104].mxu0  ;;  %v4144_v10 = vpop.f32.mrb[96].mxu1 }
0x112c   :  { %v4151_v27 = vadd.f32 %v4103_v44, %v7653_v8  ;;  %v4153_v18 = vadd.f32 %v4144_v10, %v7656_v63  ;;  %v4105_v38 = vpop.f32.mrb[105].mxu0  ;;  %v4146_v43 = vpop.f32.mrb[97].mxu1 }
0x112d   :  { %v4152_v5 = vadd.f32 %v4105_v38, %v7659_v4  ;;  %v4154_v2 = vadd.f32 %v4146_v43, %v7662_v34  ;;  %v4107_v60 = vpop.f32.mrb[106].mxu0  ;;  %v4148_v39 = vpop.f32.mrb[98].mxu1 }
0x112e   :  { %v4580_v46 = vmul.f32 -1.442695, %v4151_v27  ;;  %v4108_v20 = vpop.f32.mrb[107].mxu0  ;;  %v4149_v35 = vpop.f32.mrb[99].mxu1  ;;  %v4582_v30 = vmul.f32 -1.442695, %v4153_v18 }
0x112f   :  { %v4581_v25 = vmul.f32 -1.442695, %v4152_v5  ;;  %v4586_v60 = vld [vmem:[%s7362_s8] ss:$0 sm:$0xff] }
0x1130   :  { %5213 = vpow2.f32 %v4580_v46  ;;  %v4587_v20 = vld [vmem:[#allocation5] ss:$0 sm:$0xff] }
0x1131   :  { %5215 = vpow2.f32 %v4581_v25 }
0x1132   :  { %5217 = vtanh.f32 %v4154_v2 }
0x1133   :  { %5219 = vpow2.f32 %v4582_v30 }
0x113a   :  { %v5214_v14 = vpop.eup %5213 }
0x113b   :  { %v4164_v15 = vadd.f32 1.0, %v5214_v14  ;;  %v5216_v9 = vpop.eup %5215 }
0x113c   :  { %v4165_v48 = vadd.f32 1.0, %v5216_v9  ;;  %v5218_v49 = vpop.eup %5217 }
0x113d   :  { %5221 = vrcp.f32 %v4164_v15  ;;  %v5220_v50 = vpop.eup %5219 }
0x113e   :  { %5223 = vrcp.f32 %v4165_v48  ;;  %v4166_v26 = vadd.f32 1.0, %v5220_v50 }
0x1140   :  { %5225 = vrcp.f32 %v4166_v26 }
0x1147   :  { %v5222_v52 = vpop.eup %5221 }
0x1148   :  { %v4175_v21 = vmul.f32 %v5222_v52, %v5218_v49  ;;  %v5224_v11 = vpop.eup %5223 }
0x1149   :  { %v4174_v47 = vmul.f32 %v5224_v11, %v7271_v57 }
0x114a   :  { %v5226_v29 = vpop.eup %5225 }
0x114b   :  { %v4176_v41 = vadd.f32 %v4175_v21, %v4174_v47 }
0x114d   :  { %5227 = vtanh.f32 %v4176_v41 }
0x1157   :  { %v5228_v13 = vpop.eup %5227 }
0x1158   :  { %v4178_v3 = vmul.f32 %v5228_v13, %v5226_v29 }
0x115a   :  { %v4184_v33 = vpack.c.bf16 %v4178_v3, %v4178_v3  ;;  %v4179_v32 = vmax.f32 %v4063_v24, %v4178_v3 }
0x115c   :  { %4218 = vmatmul.mubr.bf16.vlgmr.msra.gmra.mrb[108].mxu0 %v4184_v33  ;;  %4259 = vmatmul.mubr.bf16.vlgmr.msra.gmra.mrb[100].mxu1 %v4184_v33 }
0x122f   :  { %v4219_v12 = vpop.f32.mrb[108].mxu0  ;;  %v4260_v0 = vpop.f32.mrb[100].mxu1 }
0x1230   :  { %v4267_v6 = vadd.f32 %v4219_v12, %v7663_v19  ;;  %v4269_v53 = vadd.f32 %v4260_v0, %v7666_v45  ;;  %v4221_v54 = vpop.f32.mrb[109].mxu0  ;;  %v4262_v51 = vpop.f32.mrb[101].mxu1 }
0x1231   :  { %v4268_v57 = vadd.f32 %v4221_v54, %v7669_v62  ;;  %v4270_v22 = vadd.f32 %v4262_v51, %v7672_v59  ;;  %v4223_v24 = vpop.f32.mrb[110].mxu0  ;;  %v4264_v31 = vpop.f32.mrb[102].mxu1 }
0x1232   :  { %v4583_v44 = vmul.f32 -1.442695, %v4267_v6  ;;  %v4224_v10 = vpop.f32.mrb[111].mxu0  ;;  %v4265_v8 = vpop.f32.mrb[103].mxu1  ;;  %v4585_v17 = vmul.f32 -1.442695, %v4269_v53 }
0x1233   :  { %v4584_v27 = vmul.f32 -1.442695, %v4268_v57 }
0x1234   :  { %5229 = vpow2.f32 %v4583_v44 }
0x1235   :  { %5231 = vpow2.f32 %v4584_v27 }
0x1236   :  { %5233 = vtanh.f32 %v4270_v22 }
0x1237   :  { %5235 = vpow2.f32 %v4585_v17 }
0x123e   :  { %v5230_v16 = vpop.eup %5229 }
0x123f   :  { %v4280_v28 = vadd.f32 1.0, %v5230_v16  ;;  %v5232_v63 = vpop.eup %5231 }
0x1240   :  { %v4281_v37 = vadd.f32 1.0, %v5232_v63  ;;  %v5234_v18 = vpop.eup %5233 }
0x1241   :  { %5237 = vrcp.f32 %v4280_v28  ;;  %v5236_v38 = vpop.eup %5235 }
0x1242   :  { %5239 = vrcp.f32 %v4281_v37  ;;  %v4282_v4 = vadd.f32 1.0, %v5236_v38 }
0x1244   :  { %5241 = vrcp.f32 %v4282_v4 }
0x124b   :  { %v5238_v43 = vpop.eup %5237 }
0x124c   :  { %v4291_v23 = vmul.f32 %v5238_v43, %v5234_v18  ;;  %v5240_v7 = vpop.eup %5239 }
0x124d   :  { %v4290_v5 = vmul.f32 %v5240_v7, %v4176_v41 }
0x124e   :  { %v5242_v36 = vpop.eup %5241 }
0x124f   :  { %v4292_v61 = vadd.f32 %v4291_v23, %v4290_v5 }
0x1251   :  { %5243 = vtanh.f32 %v4292_v61 }
0x125b   :  { %v5244_v34 = vpop.eup %5243 }
0x125c   :  { %v4294_v2 = vmul.f32 %v5244_v34, %v5242_v36 }
0x125e   :  { %v4295_v39 = vmax.f32 %v4179_v32, %v4294_v2 }
0x1260   :  { %v4303_v46 = vmul.f32 %v4586_v60, %v4295_v39 }
0x1262   :  { %4304 = vadd.xlane.f32.xlu0 %v4303_v46 }
0x12ef   :  { %v4305_v35 = vpop.xlane.xlu0 %4304 }
0x12f0   :  { %v4313_v25 = vadd.f32 %v4587_v20, %v4305_v35 }
0x12f2   :  { %4315 = vst.msk [vmem:[%s7364_s10] sm:$0xff] %vm4314_vm0, %v4313_v25 }
0x12f3   :  { %4320 = vsyncpa [#allocation7], 1 }
0x12f4   :  { %4321 = vsyncpa [#allocation9], 1 }
0x12f5   :  { %4322 = vsyncpa [#allocation12], 1 }

</bundles_post_ra>
